<compile_context>
chip_gen: v6e
topology: v6e:2x2x1
jax: 0.10.0
libtpu: 0.0.40
codegen_flags: <defaults>
</compile_context>

<pallas_src>
import functools
import math

import jax
import jax.numpy as jnp
from jax import lax
from jax.experimental import pallas as pl
from jax.experimental.pallas import tpu as pltpu


CFG = dict(vocab=50, max_pos=16, type_vocab=2, hidden=32, heads=2,
           layers=2, intermediate=64, num_labels=5)


# ----------------------------------------------------------------------------
# In-kernel helpers
# ----------------------------------------------------------------------------

_SQRT_HALF = 0.7071067811865476


def _erf_approx(x):
    # Abramowitz & Stegun 7.1.26 (max abs err ~1.5e-7): exact-GELU semantics using
    # only mul/add/exp/where (guaranteed Mosaic lowering).
    a1, a2, a3, a4, a5 = (0.254829592, -0.284496736, 1.421413741,
                          -1.453152027, 1.061405429)
    p = 0.3275911
    ax = jnp.abs(x)
    t = 1.0 / (1.0 + p * ax)
    poly = t * (a1 + t * (a2 + t * (a3 + t * (a4 + t * a5))))
    y = 1.0 - poly * jnp.exp(-ax * ax)
    return jnp.where(x >= 0.0, y, -y)


def _gelu_exact(x):
    return 0.5 * x * (1.0 + _erf_approx(x * _SQRT_HALF))


def _layernorm(x, g, b, eps=1e-12):
    mu = jnp.mean(x, axis=-1, keepdims=True)
    xc = x - mu
    var = jnp.mean(xc * xc, axis=-1, keepdims=True)
    return xc * lax.rsqrt(var + eps) * g + b


def _argmax_last(x):
    """argmax over last axis (first max wins), lane-friendly int32."""
    m = jnp.max(x, axis=-1, keepdims=True)
    iota = lax.broadcasted_iota(jnp.int32, x.shape, x.ndim - 1)
    big = jnp.full(x.shape, x.shape[-1], jnp.int32)
    return jnp.min(jnp.where(x >= m, iota, big), axis=-1)


def _bf16(x):
    return x.astype(jnp.bfloat16)


# ----------------------------------------------------------------------------
# Single fused kernel: encoder + repack + classifier + CRF loss + Viterbi decode
# ----------------------------------------------------------------------------

def _bert_crf_kernel(x_ref, bias_ref,
                     emb_g_ref, emb_b_ref,
                     wqkv_ref, bqkv_ref, wo_ref, bo_ref,
                     ln1_g_ref, ln1_b_ref, w1_ref, b1_ref,
                     w2_ref, b2_ref, ln2_g_ref, ln2_b_ref,
                     perm_ref, mask_ref, oh_ref,
                     clsw_ref, clsb_ref,
                     trans_ref, transt_ref, start_ref, end_ref,
                     loss_ref, tags_ref,
                     *, n_layers, n_heads, batch, seq):
    B, S = batch, seq
    H = x_ref.shape[-1]
    dh = H // n_heads
    L = trans_ref.shape[0]
    scale = 1.0 / math.sqrt(dh)

    bias = bias_ref[...]                                   # (B, 1, S) additive mask

    # ---------------- BERT encoder: all layers, activations VMEM/vreg-resident ---
    x2 = _layernorm(x_ref[...], emb_g_ref[...], emb_b_ref[...])       # (B*S, H) f32

    for l in range(n_layers):
        xb = _bf16(x2)
        # one fused QKV matmul per layer: (B*S, H) @ (H, 3H)   [weights already bf16]
        qkv = jnp.dot(xb, wqkv_ref[l],
                      preferred_element_type=jnp.float32) + bqkv_ref[l]
        ctx_heads = []
        for h in range(n_heads):
            q_h = qkv[:, h * dh:(h + 1) * dh].reshape(B, S, dh)
            k_h = qkv[:, H + h * dh:H + (h + 1) * dh].reshape(B, S, dh)
            v_h = qkv[:, 2 * H + h * dh:2 * H + (h + 1) * dh].reshape(B, S, dh)
            s = jnp.einsum("bqd,bkd->bqk", _bf16(q_h), _bf16(k_h),
                           preferred_element_type=jnp.float32) * scale + bias
            m = jnp.max(s, axis=-1, keepdims=True)
            p = jnp.exp(s - m)                             # softmax in f32
            p = p / jnp.sum(p, axis=-1, keepdims=True)
            ctx = jnp.einsum("bqk,bkd->bqd", _bf16(p), _bf16(v_h),
                             preferred_element_type=jnp.float32)       # (B, S, dh)
            ctx_heads.append(ctx.reshape(B * S, dh))
        # single output projection on the lane-concatenated heads
        ctx_all = jnp.concatenate(ctx_heads, axis=-1)                  # (B*S, H)
        attn = jnp.dot(_bf16(ctx_all), wo_ref[l],
                       preferred_element_type=jnp.float32) + bo_ref[l]

        x2 = _layernorm(x2 + attn, ln1_g_ref[l], ln1_b_ref[l])

        hid = jnp.dot(_bf16(x2), w1_ref[l],
                      preferred_element_type=jnp.float32) + b1_ref[l]
        hid = _gelu_exact(hid)                             # exact (erf) GELU, f32
        ffn = jnp.dot(_bf16(hid), w2_ref[l],
                      preferred_element_type=jnp.float32) + b2_ref[l]

        x2 = _layernorm(x2 + ffn, ln2_g_ref[l], ln2_b_ref[l])

    # ------------- classifier, then valid-token repack via 0/1 permutation -------
    # (repack commutes with the linear classifier on kept rows; dropped rows are
    #  zeroed but only ever seen under mask==0 by the CRF, so semantics match.)
    em_all = jnp.dot(_bf16(x2), clsw_ref[...],
                     preferred_element_type=jnp.float32) + clsb_ref[...]   # (B*S, L)
    em = jnp.einsum("bij,bjl->bil", perm_ref[...], em_all.reshape(B, S, L),
                    preferred_element_type=jnp.float32)                    # (B, S, L)

    # --------------------------- CRF: loss + Viterbi ------------------------------
    # torchcrf semantics (batch_first=True, reduction='sum'); requires mask[:, 0]==1,
    # which holds whenever each sequence has >=1 valid token.
    mask = mask_ref[...]                 # (B, S) f32 repacked mask
    oh = oh_ref[...]                     # (B, S, L) f32 gold one-hots (labels clamped >=0)
    trans = trans_ref[...]               # (L, L)  T[i -> j]
    trans_t = transt_ref[...]            # (L, L)  T transposed
    start = start_ref[...]               # (1, L)
    end = end_ref[...]                   # (1, L)

    em0 = em[:, 0, :]
    oh0 = oh[:, 0, :]
    score_num = jnp.sum((start + em0) * oh0, axis=-1, keepdims=True)   # gold path (B,1)
    alpha = start + em0                                                # log-partition (B,L)
    vit = start + em0                                                  # Viterbi scores (B,L)
    oh_prev = oh0
    oh_last = oh0
    hist = []                                                          # back-pointers (regs)

    # fully unrolled time loop: S is a compile-time constant, so every slice below is
    # static (no dynamic sublane offsets) and the LLO scheduler sees the whole chain.
    for t in range(1, S):
        em_t = em[:, t, :]
        oh_t = oh[:, t, :]
        m_t = mask[:, t:t + 1]                                         # (B, 1)
        # gold-path terms; one-hot gather of T[prev, cur] as a tiny MXU matmul
        prev_row = jnp.dot(oh_prev, trans, preferred_element_type=jnp.float32)
        score_num = score_num + m_t * (
            jnp.sum(prev_row * oh_t, axis=-1, keepdims=True)
            + jnp.sum(em_t * oh_t, axis=-1, keepdims=True))
        oh_last = jnp.where(m_t > 0.5, oh_t, oh_last)
        oh_prev = oh_t
        # forward algorithm (log-sum-exp over previous tag)
        x = alpha[:, None, :] + trans_t[None, :, :]                    # (B, Lj, Li)
        mx = jnp.max(x, axis=-1)
        lse = mx + jnp.log(jnp.sum(jnp.exp(x - mx[:, :, None]), axis=-1))
        alpha = jnp.where(m_t > 0.5, lse + em_t, alpha)
        # Viterbi forward (max-product); back-pointers stay in registers
        xv = vit[:, None, :] + trans_t[None, :, :]
        hist.append(_argmax_last(xv))                                  # (B, L) int32
        vit = jnp.where(m_t > 0.5, jnp.max(xv, axis=-1) + em_t, vit)

    # loss (module returns -1 * crf(...), reduction='sum')
    score_num = score_num + jnp.sum(oh_last * end, axis=-1, keepdims=True)
    alpha_end = alpha + end
    mx = jnp.max(alpha_end, axis=-1, keepdims=True)
    denom = mx + jnp.log(jnp.sum(jnp.exp(alpha_end - mx), axis=-1, keepdims=True))
    loss_ref[...] = -jnp.sum(score_num - denom, keepdims=True)

    # Viterbi backtrack (unrolled); single lane-dense (B, S) store, -1 at padding
    seq_len = jnp.sum(mask, axis=1, keepdims=True)                     # (B, 1) f32
    cur = _argmax_last(vit + end)[:, None]                             # (B, 1) int32
    lane = lax.broadcasted_iota(jnp.int32, (B, L), 1)
    t_iota = lax.broadcasted_iota(jnp.int32, (B, S), 1)
    neg1 = jnp.full((B, 1), -1, jnp.int32)
    tags = jnp.zeros((B, S), jnp.int32)
    for t in range(S - 1, 0, -1):
        valid_t = seq_len > float(t)
        tags = jnp.where(t_iota == t, jnp.where(valid_t, cur, neg1), tags)
        prev = jnp.sum(jnp.where(lane == cur, hist[t - 1], 0),
                       axis=-1, keepdims=True)                         # one-hot gather
        cur = jnp.where(mask[:, t:t + 1] > 0.5, prev, cur)
    tags_ref[...] = jnp.where(t_iota == 0, cur, tags)


# ----------------------------------------------------------------------------
# Plain-JAX glue: embedding gather, repack plan, parameter init, forward wrapper
# ----------------------------------------------------------------------------

def init_params(key, cfg):
    H, FF, L = cfg["hidden"], cfg["intermediate"], cfg["num_labels"]
    nL = cfg["layers"]
    kit = iter(jax.random.split(key, 32))

    def nrm(shape, dtype=jnp.bfloat16, scale=0.02):
        return (scale * jax.random.normal(next(kit), shape)).astype(dtype)

    def uni(shape):
        return jax.random.uniform(next(kit), shape, minval=-0.1,
                                  maxval=0.1).astype(jnp.float32)

    return {
        "word_emb": nrm((cfg["vocab"], H), jnp.float32),
        "pos_emb": nrm((cfg["max_pos"], H), jnp.float32),
        "type_emb": nrm((cfg["type_vocab"], H), jnp.float32),
        "emb_ln_g": jnp.ones((1, H), jnp.float32),
        "emb_ln_b": jnp.zeros((1, H), jnp.float32),
        # matmul weights stored bf16 (MXU-native); biases / LN / CRF params f32
        "wqkv": nrm((nL, H, 3 * H)),                 # fused Q|K|V per layer
        "bqkv": jnp.zeros((nL, 1, 3 * H), jnp.float32),
        "wo": nrm((nL, H, H)),
        "bo": jnp.zeros((nL, 1, H), jnp.float32),
        "ln1_g": jnp.ones((nL, 1, H), jnp.float32),
        "ln1_b": jnp.zeros((nL, 1, H), jnp.float32),
        "w1": nrm((nL, H, FF)),
        "b1": jnp.zeros((nL, 1, FF), jnp.float32),
        "w2": nrm((nL, FF, H)),
        "b2": jnp.zeros((nL, 1, H), jnp.float32),
        "ln2_g": jnp.ones((nL, 1, H), jnp.float32),
        "ln2_b": jnp.zeros((nL, 1, H), jnp.float32),
        "cls_w": nrm((H, L)),
        "cls_b": jnp.zeros((1, L), jnp.float32),
        # CRF params (torchcrf init: uniform(-0.1, 0.1))
        "crf_start": uni((1, L)),
        "crf_end": uni((1, L)),
        "crf_trans": uni((L, L)),
    }


def _repack_plan(valid_mask, attention_mask):
    """valid_sequence_output as a per-batch 0/1 permutation matrix + repacked mask."""
    B, S = valid_mask.shape
    order = jnp.argsort(1 - valid_mask, axis=1, stable=True)   # valid first, stable
    n_valid = jnp.sum(valid_mask, axis=1, keepdims=True)
    keep = jnp.arange(S)[None, :] < n_valid
    perm = (jax.nn.one_hot(order, S, dtype=jnp.float32)
            * keep[:, :, None].astype(jnp.float32))            # (B, S, S)
    gathered = jnp.take_along_axis(attention_mask, order, axis=1)
    crf_mask = jnp.where(keep, gathered, 0).astype(jnp.float32)   # (B, S)
    return perm, crf_mask


def bert_crf_forward(params, cfg, input_ids, attention_mask, token_type_ids,
                     valid_mask, label_ids, mode):
    B, S = input_ids.shape
    H, L = cfg["hidden"], cfg["num_labels"]

    # embedding gathers stay in plain JAX (data-dependent gather)
    pos_ids = jnp.arange(S)[None, :]
    x = (params["word_emb"][input_ids]
         + params["pos_emb"][pos_ids]
         + params["type_emb"][token_type_ids]).reshape(B * S, H).astype(jnp.float32)
    bias = ((1.0 - attention_mask.astype(jnp.float32)) * -10000.0)[:, None, :]

    perm, crf_mask = _repack_plan(valid_mask, attention_mask)
    # nn.Dropout: identity (eval / deterministic run).
    labels = jnp.where(label_ids >= 0, label_ids, jnp.zeros_like(label_ids))
    oh = jax.nn.one_hot(labels, L, dtype=jnp.float32)                      # (B, S, L)

    kernel = functools.partial(_bert_crf_kernel, n_layers=cfg["layers"],
                               n_heads=cfg["heads"], batch=B, seq=S)
    operands = (x, bias,
                params["emb_ln_g"], params["emb_ln_b"],
                params["wqkv"], params["bqkv"], params["wo"], params["bo"],
                params["ln1_g"], params["ln1_b"], params["w1"], params["b1"],
                params["w2"], params["b2"], params["ln2_g"], params["ln2_b"],
                perm, crf_mask, oh,
                params["cls_w"], params["cls_b"],
                params["crf_trans"], params["crf_trans"].T,
                params["crf_start"], params["crf_end"])

    loss, tags = pl.pallas_call(
        kernel,
        out_shape=(jax.ShapeDtypeStruct((1, 1), jnp.float32),
                   jax.ShapeDtypeStruct((B, S), jnp.int32)),
        in_specs=[pl.BlockSpec(memory_space=pltpu.MemorySpace.VMEM)] * len(operands),
        out_specs=(pl.BlockSpec(memory_space=pltpu.MemorySpace.VMEM),
                   pl.BlockSpec(memory_space=pltpu.MemorySpace.VMEM)),
    )(*operands)

    loss = loss[0, 0]
    if mode == "train":
        return loss
    return tags, loss


# ----------------------------------------------------------------------------
if __name__ == "__main__":
    key = jax.random.PRNGKey(0)
    k_param, k_ids, k_lab = jax.random.split(key, 3)

    params = init_params(k_param, CFG)

    B, S, L = 2, 8, CFG["num_labels"]
    input_ids = jax.random.randint(k_ids, (B, S), 0, CFG["vocab"], dtype=jnp.int32)
    token_type_ids = jnp.zeros((B, S), jnp.int32)
    attention_mask = jnp.array([[1, 1, 1, 1, 1, 1, 1, 1],
                                [1, 1, 1, 1, 1, 1, 0, 0]], jnp.int32)
    valid_mask = jnp.array([[1, 1, 0, 1, 1, 1, 0, 1],
                            [1, 0, 1, 1, 1, 1, 0, 0]], jnp.int32)
    label_ids = jax.random.randint(k_lab, (B, S), 0, L, dtype=jnp.int32)
    label_ids = label_ids.at[0, 7].set(-100).at[1, 6].set(-100)   # some ignored labels

    run_eval = jax.jit(lambda p, a, b, c, d, e:
                       bert_crf_forward(p, CFG, a, b, c, d, e, "eval"))
    tags, loss = run_eval(params, input_ids, attention_mask, token_type_ids,
                          valid_mask, label_ids)
    jax.block_until_ready((tags, loss))
    print("KERNEL_OK")
</pallas_src>

<mosaic_0001>
module attributes {stable_mosaic.version = 11 : i64} {
  func.func @_bert_crf_kernel(%arg0: memref<16x32xf32, #tpu.memory_space<vmem>>, %arg1: memref<2x1x8xf32, #tpu.memory_space<vmem>>, %arg2: memref<1x32xf32, #tpu.memory_space<vmem>>, %arg3: memref<1x32xf32, #tpu.memory_space<vmem>>, %arg4: memref<2x32x96xbf16, #tpu.memory_space<vmem>>, %arg5: memref<2x1x96xf32, #tpu.memory_space<vmem>>, %arg6: memref<2x32x32xbf16, #tpu.memory_space<vmem>>, %arg7: memref<2x1x32xf32, #tpu.memory_space<vmem>>, %arg8: memref<2x1x32xf32, #tpu.memory_space<vmem>>, %arg9: memref<2x1x32xf32, #tpu.memory_space<vmem>>, %arg10: memref<2x32x64xbf16, #tpu.memory_space<vmem>>, %arg11: memref<2x1x64xf32, #tpu.memory_space<vmem>>, %arg12: memref<2x64x32xbf16, #tpu.memory_space<vmem>>, %arg13: memref<2x1x32xf32, #tpu.memory_space<vmem>>, %arg14: memref<2x1x32xf32, #tpu.memory_space<vmem>>, %arg15: memref<2x1x32xf32, #tpu.memory_space<vmem>>, %arg16: memref<2x8x8xf32, #tpu.memory_space<vmem>>, %arg17: memref<2x8xf32, #tpu.memory_space<vmem>>, %arg18: memref<2x8x5xf32, #tpu.memory_space<vmem>>, %arg19: memref<32x5xbf16, #tpu.memory_space<vmem>>, %arg20: memref<1x5xf32, #tpu.memory_space<vmem>>, %arg21: memref<5x5xf32, #tpu.memory_space<vmem>>, %arg22: memref<5x5xf32, #tpu.memory_space<vmem>>, %arg23: memref<1x5xf32, #tpu.memory_space<vmem>>, %arg24: memref<1x5xf32, #tpu.memory_space<vmem>>, %arg25: memref<1x1xf32, #tpu.memory_space<vmem>>, %arg26: memref<2x8xi32, #tpu.memory_space<vmem>>) attributes {dimension_semantics = [], scalar_prefetch = 0 : i64, scratch_operands = 0 : i64, tpu.core_type = #tpu.core_type<tc>} {
    %c0 = arith.constant 0 : index
    %c0_0 = arith.constant 0 : index
    %c0_1 = arith.constant 0 : index
    %0 = vector.load %arg1[%c0, %c0_0, %c0_1] : memref<2x1x8xf32, #tpu.memory_space<vmem>>, vector<2x1x8xf32>
    %c0_2 = arith.constant 0 : index
    %c0_3 = arith.constant 0 : index
    %1 = vector.load %arg0[%c0_2, %c0_3] : memref<16x32xf32, #tpu.memory_space<vmem>>, vector<16x32xf32>
    %c0_4 = arith.constant 0 : index
    %c0_5 = arith.constant 0 : index
    %2 = vector.load %arg2[%c0_4, %c0_5] : memref<1x32xf32, #tpu.memory_space<vmem>>, vector<1x32xf32>
    %c0_6 = arith.constant 0 : index
    %c0_7 = arith.constant 0 : index
    %3 = vector.load %arg3[%c0_6, %c0_7] : memref<1x32xf32, #tpu.memory_space<vmem>>, vector<1x32xf32>
    %cst = arith.constant dense<0.000000e+00> : vector<16xf32>
    %4 = vector.multi_reduction <add>, %1, %cst [1] : vector<16x32xf32> to vector<16xf32>
    %5 = vector.shape_cast %4 : vector<16xf32> to vector<16x1xf32>
    %cst_8 = arith.constant 3.200000e+01 : f32
    %6 = vector.broadcast %cst_8 : f32 to vector<16x1xf32>
    %7 = arith.divf %5, %6 : vector<16x1xf32>
    %8 = vector.broadcast %7 : vector<16x1xf32> to vector<16x32xf32>
    %9 = arith.subf %1, %8 : vector<16x32xf32>
    %10 = arith.mulf %9, %9 : vector<16x32xf32>
    %cst_9 = arith.constant dense<0.000000e+00> : vector<16xf32>
    %11 = vector.multi_reduction <add>, %10, %cst_9 [1] : vector<16x32xf32> to vector<16xf32>
    %12 = vector.shape_cast %11 : vector<16xf32> to vector<16x1xf32>
    %cst_10 = arith.constant 3.200000e+01 : f32
    %13 = vector.broadcast %cst_10 : f32 to vector<16x1xf32>
    %14 = arith.divf %12, %13 : vector<16x1xf32>
    %cst_11 = arith.constant 9.99999996E-13 : f32
    %15 = vector.broadcast %cst_11 : f32 to vector<16x1xf32>
    %16 = arith.addf %14, %15 : vector<16x1xf32>
    %17 = math.rsqrt %16 : vector<16x1xf32>
    %18 = vector.broadcast %17 : vector<16x1xf32> to vector<16x32xf32>
    %19 = arith.mulf %9, %18 : vector<16x32xf32>
    %20 = vector.broadcast %2 : vector<1x32xf32> to vector<16x32xf32>
    %21 = arith.mulf %19, %20 : vector<16x32xf32>
    %22 = vector.broadcast %3 : vector<1x32xf32> to vector<16x32xf32>
    %23 = arith.addf %21, %22 : vector<16x32xf32>
    %24 = arith.truncf %23 : vector<16x32xf32> to vector<16x32xbf16>
    %c0_12 = arith.constant 0 : index
    %c0_13 = arith.constant 0 : index
    %c0_14 = arith.constant 0 : index
    %25 = vector.load %arg4[%c0_12, %c0_13, %c0_14] : memref<2x32x96xbf16, #tpu.memory_space<vmem>>, vector<1x32x96xbf16>
    %26 = vector.shape_cast %25 : vector<1x32x96xbf16> to vector<32x96xbf16>
    %cst_15 = arith.constant dense<0.000000e+00> : vector<16x96xf32>
    %27 = tpu.matmul %24, %26, %cst_15 {dimension_numbers = #tpu.dot_dimension_numbers<[1], [0], [0], [1], [0, 0, 1, 1], [], []>} : vector<16x32xbf16>, vector<32x96xbf16>, vector<16x96xf32> -> vector<16x96xf32>
    %c0_16 = arith.constant 0 : index
    %c0_17 = arith.constant 0 : index
    %c0_18 = arith.constant 0 : index
    %28 = vector.load %arg5[%c0_16, %c0_17, %c0_18] : memref<2x1x96xf32, #tpu.memory_space<vmem>>, vector<1x1x96xf32>
    %29 = vector.shape_cast %28 : vector<1x1x96xf32> to vector<1x96xf32>
    %30 = vector.broadcast %29 : vector<1x96xf32> to vector<16x96xf32>
    %31 = arith.addf %27, %30 : vector<16x96xf32>
    %32 = vector.extract_strided_slice %31 {offsets = [0, 0], sizes = [16, 16], strides = [1, 1]} : vector<16x96xf32> to vector<16x16xf32>
    %33 = vector.shape_cast %32 : vector<16x16xf32> to vector<2x8x16xf32>
    %34 = vector.extract_strided_slice %31 {offsets = [0, 32], sizes = [16, 16], strides = [1, 1]} : vector<16x96xf32> to vector<16x16xf32>
    %35 = vector.shape_cast %34 : vector<16x16xf32> to vector<2x8x16xf32>
    %36 = vector.extract_strided_slice %31 {offsets = [0, 64], sizes = [16, 16], strides = [1, 1]} : vector<16x96xf32> to vector<16x16xf32>
    %37 = vector.shape_cast %36 : vector<16x16xf32> to vector<2x8x16xf32>
    %38 = arith.truncf %33 : vector<2x8x16xf32> to vector<2x8x16xbf16>
    %39 = arith.truncf %35 : vector<2x8x16xf32> to vector<2x8x16xbf16>
    "tpu.trace_start"() <{level = 10 : i32, message = "bqd,bkd->bqk"}> : () -> ()
    %cst_19 = arith.constant dense<0.000000e+00> : vector<2x8x8xf32>
    %40 = tpu.matmul %38, %39, %cst_19 {dimension_numbers = #tpu.dot_dimension_numbers<[2], [2], [1], [1], [0, 0, 0, 1, 1, 1], [0], [0]>} : vector<2x8x16xbf16>, vector<2x8x16xbf16>, vector<2x8x8xf32> -> vector<2x8x8xf32>
    "tpu.trace_stop"() : () -> ()
    %cst_20 = arith.constant 2.500000e-01 : f32
    %41 = vector.broadcast %cst_20 : f32 to vector<2x8x8xf32>
    %42 = arith.mulf %40, %41 : vector<2x8x8xf32>
    %43 = vector.broadcast %0 : vector<2x1x8xf32> to vector<2x8x8xf32>
    %44 = arith.addf %42, %43 : vector<2x8x8xf32>
    %cst_21 = arith.constant dense<0xFF800000> : vector<2x8xf32>
    %45 = vector.multi_reduction <maximumf>, %44, %cst_21 [2] : vector<2x8x8xf32> to vector<2x8xf32>
    %46 = vector.shape_cast %45 : vector<2x8xf32> to vector<2x8x1xf32>
    %47 = vector.broadcast %46 : vector<2x8x1xf32> to vector<2x8x8xf32>
    %48 = arith.subf %44, %47 : vector<2x8x8xf32>
    %49 = math.exp %48 : vector<2x8x8xf32>
    %cst_22 = arith.constant dense<0.000000e+00> : vector<2x8xf32>
    %50 = vector.multi_reduction <add>, %49, %cst_22 [2] : vector<2x8x8xf32> to vector<2x8xf32>
    %51 = vector.shape_cast %50 : vector<2x8xf32> to vector<2x8x1xf32>
    %52 = vector.broadcast %51 : vector<2x8x1xf32> to vector<2x8x8xf32>
    %53 = arith.divf %49, %52 : vector<2x8x8xf32>
    %54 = arith.truncf %53 : vector<2x8x8xf32> to vector<2x8x8xbf16>
    %55 = arith.truncf %37 : vector<2x8x16xf32> to vector<2x8x16xbf16>
    "tpu.trace_start"() <{level = 10 : i32, message = "bqk,bkd->bqd"}> : () -> ()
    %cst_23 = arith.constant dense<0.000000e+00> : vector<2x8x16xf32>
    %56 = tpu.matmul %54, %55, %cst_23 {dimension_numbers = #tpu.dot_dimension_numbers<[2], [1], [1], [2], [0, 0, 0, 1, 1, 2], [0], [0]>} : vector<2x8x8xbf16>, vector<2x8x16xbf16>, vector<2x8x16xf32> -> vector<2x8x16xf32>
    "tpu.trace_stop"() : () -> ()
    %57 = vector.shape_cast %56 : vector<2x8x16xf32> to vector<16x16xf32>
    %58 = vector.extract_strided_slice %31 {offsets = [0, 16], sizes = [16, 16], strides = [1, 1]} : vector<16x96xf32> to vector<16x16xf32>
    %59 = vector.shape_cast %58 : vector<16x16xf32> to vector<2x8x16xf32>
    %60 = vector.extract_strided_slice %31 {offsets = [0, 48], sizes = [16, 16], strides = [1, 1]} : vector<16x96xf32> to vector<16x16xf32>
    %61 = vector.shape_cast %60 : vector<16x16xf32> to vector<2x8x16xf32>
    %62 = vector.extract_strided_slice %31 {offsets = [0, 80], sizes = [16, 16], strides = [1, 1]} : vector<16x96xf32> to vector<16x16xf32>
    %63 = vector.shape_cast %62 : vector<16x16xf32> to vector<2x8x16xf32>
    %64 = arith.truncf %59 : vector<2x8x16xf32> to vector<2x8x16xbf16>
    %65 = arith.truncf %61 : vector<2x8x16xf32> to vector<2x8x16xbf16>
    "tpu.trace_start"() <{level = 10 : i32, message = "bqd,bkd->bqk"}> : () -> ()
    %cst_24 = arith.constant dense<0.000000e+00> : vector<2x8x8xf32>
    %66 = tpu.matmul %64, %65, %cst_24 {dimension_numbers = #tpu.dot_dimension_numbers<[2], [2], [1], [1], [0, 0, 0, 1, 1, 1], [0], [0]>} : vector<2x8x16xbf16>, vector<2x8x16xbf16>, vector<2x8x8xf32> -> vector<2x8x8xf32>
    "tpu.trace_stop"() : () -> ()
    %cst_25 = arith.constant 2.500000e-01 : f32
    %67 = vector.broadcast %cst_25 : f32 to vector<2x8x8xf32>
    %68 = arith.mulf %66, %67 : vector<2x8x8xf32>
    %69 = vector.broadcast %0 : vector<2x1x8xf32> to vector<2x8x8xf32>
    %70 = arith.addf %68, %69 : vector<2x8x8xf32>
    %cst_26 = arith.constant dense<0xFF800000> : vector<2x8xf32>
    %71 = vector.multi_reduction <maximumf>, %70, %cst_26 [2] : vector<2x8x8xf32> to vector<2x8xf32>
    %72 = vector.shape_cast %71 : vector<2x8xf32> to vector<2x8x1xf32>
    %73 = vector.broadcast %72 : vector<2x8x1xf32> to vector<2x8x8xf32>
    %74 = arith.subf %70, %73 : vector<2x8x8xf32>
    %75 = math.exp %74 : vector<2x8x8xf32>
    %cst_27 = arith.constant dense<0.000000e+00> : vector<2x8xf32>
    %76 = vector.multi_reduction <add>, %75, %cst_27 [2] : vector<2x8x8xf32> to vector<2x8xf32>
    %77 = vector.shape_cast %76 : vector<2x8xf32> to vector<2x8x1xf32>
    %78 = vector.broadcast %77 : vector<2x8x1xf32> to vector<2x8x8xf32>
    %79 = arith.divf %75, %78 : vector<2x8x8xf32>
    %80 = arith.truncf %79 : vector<2x8x8xf32> to vector<2x8x8xbf16>
    %81 = arith.truncf %63 : vector<2x8x16xf32> to vector<2x8x16xbf16>
    "tpu.trace_start"() <{level = 10 : i32, message = "bqk,bkd->bqd"}> : () -> ()
    %cst_28 = arith.constant dense<0.000000e+00> : vector<2x8x16xf32>
    %82 = tpu.matmul %80, %81, %cst_28 {dimension_numbers = #tpu.dot_dimension_numbers<[2], [1], [1], [2], [0, 0, 0, 1, 1, 2], [0], [0]>} : vector<2x8x8xbf16>, vector<2x8x16xbf16>, vector<2x8x16xf32> -> vector<2x8x16xf32>
    "tpu.trace_stop"() : () -> ()
    %83 = vector.shape_cast %82 : vector<2x8x16xf32> to vector<16x16xf32>
    %84 = tpu.concatenate %57, %83 in 1 : vector<16x16xf32>, vector<16x16xf32> -> vector<16x32xf32>
    %85 = arith.truncf %84 : vector<16x32xf32> to vector<16x32xbf16>
    %c0_29 = arith.constant 0 : index
    %c0_30 = arith.constant 0 : index
    %c0_31 = arith.constant 0 : index
    %86 = vector.load %arg6[%c0_29, %c0_30, %c0_31] : memref<2x32x32xbf16, #tpu.memory_space<vmem>>, vector<1x32x32xbf16>
    %87 = vector.shape_cast %86 : vector<1x32x32xbf16> to vector<32x32xbf16>
    %cst_32 = arith.constant dense<0.000000e+00> : vector<16x32xf32>
    %88 = tpu.matmul %85, %87, %cst_32 {dimension_numbers = #tpu.dot_dimension_numbers<[1], [0], [0], [1], [0, 0, 1, 1], [], []>} : vector<16x32xbf16>, vector<32x32xbf16>, vector<16x32xf32> -> vector<16x32xf32>
    %c0_33 = arith.constant 0 : index
    %c0_34 = arith.constant 0 : index
    %c0_35 = arith.constant 0 : index
    %89 = vector.load %arg7[%c0_33, %c0_34, %c0_35] : memref<2x1x32xf32, #tpu.memory_space<vmem>>, vector<1x1x32xf32>
    %90 = vector.shape_cast %89 : vector<1x1x32xf32> to vector<1x32xf32>
    %91 = vector.broadcast %90 : vector<1x32xf32> to vector<16x32xf32>
    %92 = arith.addf %88, %91 : vector<16x32xf32>
    %93 = arith.addf %23, %92 : vector<16x32xf32>
    %c0_36 = arith.constant 0 : index
    %c0_37 = arith.constant 0 : index
    %c0_38 = arith.constant 0 : index
    %94 = vector.load %arg8[%c0_36, %c0_37, %c0_38] : memref<2x1x32xf32, #tpu.memory_space<vmem>>, vector<1x1x32xf32>
    %95 = vector.shape_cast %94 : vector<1x1x32xf32> to vector<1x32xf32>
    %c0_39 = arith.constant 0 : index
    %c0_40 = arith.constant 0 : index
    %c0_41 = arith.constant 0 : index
    %96 = vector.load %arg9[%c0_39, %c0_40, %c0_41] : memref<2x1x32xf32, #tpu.memory_space<vmem>>, vector<1x1x32xf32>
    %97 = vector.shape_cast %96 : vector<1x1x32xf32> to vector<1x32xf32>
    %cst_42 = arith.constant dense<0.000000e+00> : vector<16xf32>
    %98 = vector.multi_reduction <add>, %93, %cst_42 [1] : vector<16x32xf32> to vector<16xf32>
    %99 = vector.shape_cast %98 : vector<16xf32> to vector<16x1xf32>
    %cst_43 = arith.constant 3.200000e+01 : f32
    %100 = vector.broadcast %cst_43 : f32 to vector<16x1xf32>
    %101 = arith.divf %99, %100 : vector<16x1xf32>
    %102 = vector.broadcast %101 : vector<16x1xf32> to vector<16x32xf32>
    %103 = arith.subf %93, %102 : vector<16x32xf32>
    %104 = arith.mulf %103, %103 : vector<16x32xf32>
    %cst_44 = arith.constant dense<0.000000e+00> : vector<16xf32>
    %105 = vector.multi_reduction <add>, %104, %cst_44 [1] : vector<16x32xf32> to vector<16xf32>
    %106 = vector.shape_cast %105 : vector<16xf32> to vector<16x1xf32>
    %cst_45 = arith.constant 3.200000e+01 : f32
    %107 = vector.broadcast %cst_45 : f32 to vector<16x1xf32>
    %108 = arith.divf %106, %107 : vector<16x1xf32>
    %cst_46 = arith.constant 9.99999996E-13 : f32
    %109 = vector.broadcast %cst_46 : f32 to vector<16x1xf32>
    %110 = arith.addf %108, %109 : vector<16x1xf32>
    %111 = math.rsqrt %110 : vector<16x1xf32>
    %112 = vector.broadcast %111 : vector<16x1xf32> to vector<16x32xf32>
    %113 = arith.mulf %103, %112 : vector<16x32xf32>
    %114 = vector.broadcast %95 : vector<1x32xf32> to vector<16x32xf32>
    %115 = arith.mulf %113, %114 : vector<16x32xf32>
    %116 = vector.broadcast %97 : vector<1x32xf32> to vector<16x32xf32>
    %117 = arith.addf %115, %116 : vector<16x32xf32>
    %118 = arith.truncf %117 : vector<16x32xf32> to vector<16x32xbf16>
    %c0_47 = arith.constant 0 : index
    %c0_48 = arith.constant 0 : index
    %c0_49 = arith.constant 0 : index
    %119 = vector.load %arg10[%c0_47, %c0_48, %c0_49] : memref<2x32x64xbf16, #tpu.memory_space<vmem>>, vector<1x32x64xbf16>
    %120 = vector.shape_cast %119 : vector<1x32x64xbf16> to vector<32x64xbf16>
    %cst_50 = arith.constant dense<0.000000e+00> : vector<16x64xf32>
    %121 = tpu.matmul %118, %120, %cst_50 {dimension_numbers = #tpu.dot_dimension_numbers<[1], [0], [0], [1], [0, 0, 1, 1], [], []>} : vector<16x32xbf16>, vector<32x64xbf16>, vector<16x64xf32> -> vector<16x64xf32>
    %c0_51 = arith.constant 0 : index
    %c0_52 = arith.constant 0 : index
    %c0_53 = arith.constant 0 : index
    %122 = vector.load %arg11[%c0_51, %c0_52, %c0_53] : memref<2x1x64xf32, #tpu.memory_space<vmem>>, vector<1x1x64xf32>
    %123 = vector.shape_cast %122 : vector<1x1x64xf32> to vector<1x64xf32>
    %124 = vector.broadcast %123 : vector<1x64xf32> to vector<16x64xf32>
    %125 = arith.addf %121, %124 : vector<16x64xf32>
    %cst_54 = arith.constant 5.000000e-01 : f32
    %126 = vector.broadcast %cst_54 : f32 to vector<16x64xf32>
    %127 = arith.mulf %126, %125 : vector<16x64xf32>
    %cst_55 = arith.constant 0.707106769 : f32
    %128 = vector.broadcast %cst_55 : f32 to vector<16x64xf32>
    %129 = arith.mulf %125, %128 : vector<16x64xf32>
    %130 = math.absf %129 : vector<16x64xf32>
    %cst_56 = arith.constant 0.327591091 : f32
    %131 = vector.broadcast %cst_56 : f32 to vector<16x64xf32>
    %132 = arith.mulf %131, %130 : vector<16x64xf32>
    %cst_57 = arith.constant 1.000000e+00 : f32
    %133 = vector.broadcast %cst_57 : f32 to vector<16x64xf32>
    %134 = arith.addf %133, %132 : vector<16x64xf32>
    %cst_58 = arith.constant 1.000000e+00 : f32
    %135 = vector.broadcast %cst_58 : f32 to vector<16x64xf32>
    %136 = arith.divf %135, %134 : vector<16x64xf32>
    %cst_59 = arith.constant 1.06140542 : f32
    %137 = vector.broadcast %cst_59 : f32 to vector<16x64xf32>
    %138 = arith.mulf %136, %137 : vector<16x64xf32>
    %cst_60 = arith.constant -1.45315206 : f32
    %139 = vector.broadcast %cst_60 : f32 to vector<16x64xf32>
    %140 = arith.addf %139, %138 : vector<16x64xf32>
    %141 = arith.mulf %136, %140 : vector<16x64xf32>
    %cst_61 = arith.constant 1.42141378 : f32
    %142 = vector.broadcast %cst_61 : f32 to vector<16x64xf32>
    %143 = arith.addf %142, %141 : vector<16x64xf32>
    %144 = arith.mulf %136, %143 : vector<16x64xf32>
    %cst_62 = arith.constant -0.284496725 : f32
    %145 = vector.broadcast %cst_62 : f32 to vector<16x64xf32>
    %146 = arith.addf %145, %144 : vector<16x64xf32>
    %147 = arith.mulf %136, %146 : vector<16x64xf32>
    %cst_63 = arith.constant 0.254829586 : f32
    %148 = vector.broadcast %cst_63 : f32 to vector<16x64xf32>
    %149 = arith.addf %148, %147 : vector<16x64xf32>
    %150 = arith.mulf %136, %149 : vector<16x64xf32>
    %cst_64 = arith.constant 0.000000e+00 : f32
    %151 = vector.broadcast %cst_64 : f32 to vector<16x64xf32>
    %152 = arith.subf %151, %130 : vector<16x64xf32>
    %153 = arith.mulf %152, %130 : vector<16x64xf32>
    %154 = math.exp %153 : vector<16x64xf32>
    %155 = arith.mulf %150, %154 : vector<16x64xf32>
    %cst_65 = arith.constant 1.000000e+00 : f32
    %156 = vector.broadcast %cst_65 : f32 to vector<16x64xf32>
    %157 = arith.subf %156, %155 : vector<16x64xf32>
    %cst_66 = arith.constant 0.000000e+00 : f32
    %158 = vector.broadcast %cst_66 : f32 to vector<16x64xf32>
    %159 = arith.cmpf oge, %129, %158 : vector<16x64xf32>
    %cst_67 = arith.constant 0.000000e+00 : f32
    %160 = vector.broadcast %cst_67 : f32 to vector<16x64xf32>
    %161 = arith.subf %160, %157 : vector<16x64xf32>
    %162 = arith.select %159, %157, %161 : vector<16x64xi1>, vector<16x64xf32>
    %cst_68 = arith.constant 1.000000e+00 : f32
    %163 = vector.broadcast %cst_68 : f32 to vector<16x64xf32>
    %164 = arith.addf %163, %162 : vector<16x64xf32>
    %165 = arith.mulf %127, %164 : vector<16x64xf32>
    %166 = arith.truncf %165 : vector<16x64xf32> to vector<16x64xbf16>
    %c0_69 = arith.constant 0 : index
    %c0_70 = arith.constant 0 : index
    %c0_71 = arith.constant 0 : index
    %167 = vector.load %arg12[%c0_69, %c0_70, %c0_71] : memref<2x64x32xbf16, #tpu.memory_space<vmem>>, vector<1x64x32xbf16>
    %168 = vector.shape_cast %167 : vector<1x64x32xbf16> to vector<64x32xbf16>
    %cst_72 = arith.constant dense<0.000000e+00> : vector<16x32xf32>
    %169 = tpu.matmul %166, %168, %cst_72 {dimension_numbers = #tpu.dot_dimension_numbers<[1], [0], [0], [1], [0, 0, 1, 1], [], []>} : vector<16x64xbf16>, vector<64x32xbf16>, vector<16x32xf32> -> vector<16x32xf32>
    %c0_73 = arith.constant 0 : index
    %c0_74 = arith.constant 0 : index
    %c0_75 = arith.constant 0 : index
    %170 = vector.load %arg13[%c0_73, %c0_74, %c0_75] : memref<2x1x32xf32, #tpu.memory_space<vmem>>, vector<1x1x32xf32>
    %171 = vector.shape_cast %170 : vector<1x1x32xf32> to vector<1x32xf32>
    %172 = vector.broadcast %171 : vector<1x32xf32> to vector<16x32xf32>
    %173 = arith.addf %169, %172 : vector<16x32xf32>
    %174 = arith.addf %117, %173 : vector<16x32xf32>
    %c0_76 = arith.constant 0 : index
    %c0_77 = arith.constant 0 : index
    %c0_78 = arith.constant 0 : index
    %175 = vector.load %arg14[%c0_76, %c0_77, %c0_78] : memref<2x1x32xf32, #tpu.memory_space<vmem>>, vector<1x1x32xf32>
    %176 = vector.shape_cast %175 : vector<1x1x32xf32> to vector<1x32xf32>
    %c0_79 = arith.constant 0 : index
    %c0_80 = arith.constant 0 : index
    %c0_81 = arith.constant 0 : index
    %177 = vector.load %arg15[%c0_79, %c0_80, %c0_81] : memref<2x1x32xf32, #tpu.memory_space<vmem>>, vector<1x1x32xf32>
    %178 = vector.shape_cast %177 : vector<1x1x32xf32> to vector<1x32xf32>
    %cst_82 = arith.constant dense<0.000000e+00> : vector<16xf32>
    %179 = vector.multi_reduction <add>, %174, %cst_82 [1] : vector<16x32xf32> to vector<16xf32>
    %180 = vector.shape_cast %179 : vector<16xf32> to vector<16x1xf32>
    %cst_83 = arith.constant 3.200000e+01 : f32
    %181 = vector.broadcast %cst_83 : f32 to vector<16x1xf32>
    %182 = arith.divf %180, %181 : vector<16x1xf32>
    %183 = vector.broadcast %182 : vector<16x1xf32> to vector<16x32xf32>
    %184 = arith.subf %174, %183 : vector<16x32xf32>
    %185 = arith.mulf %184, %184 : vector<16x32xf32>
    %cst_84 = arith.constant dense<0.000000e+00> : vector<16xf32>
    %186 = vector.multi_reduction <add>, %185, %cst_84 [1] : vector<16x32xf32> to vector<16xf32>
    %187 = vector.shape_cast %186 : vector<16xf32> to vector<16x1xf32>
    %cst_85 = arith.constant 3.200000e+01 : f32
    %188 = vector.broadcast %cst_85 : f32 to vector<16x1xf32>
    %189 = arith.divf %187, %188 : vector<16x1xf32>
    %cst_86 = arith.constant 9.99999996E-13 : f32
    %190 = vector.broadcast %cst_86 : f32 to vector<16x1xf32>
    %191 = arith.addf %189, %190 : vector<16x1xf32>
    %192 = math.rsqrt %191 : vector<16x1xf32>
    %193 = vector.broadcast %192 : vector<16x1xf32> to vector<16x32xf32>
    %194 = arith.mulf %184, %193 : vector<16x32xf32>
    %195 = vector.broadcast %176 : vector<1x32xf32> to vector<16x32xf32>
    %196 = arith.mulf %194, %195 : vector<16x32xf32>
    %197 = vector.broadcast %178 : vector<1x32xf32> to vector<16x32xf32>
    %198 = arith.addf %196, %197 : vector<16x32xf32>
    %199 = arith.truncf %198 : vector<16x32xf32> to vector<16x32xbf16>
    %c1 = arith.constant 1 : index
    %c0_87 = arith.constant 0 : index
    %c0_88 = arith.constant 0 : index
    %200 = vector.load %arg4[%c1, %c0_87, %c0_88] : memref<2x32x96xbf16, #tpu.memory_space<vmem>>, vector<1x32x96xbf16>
    %201 = vector.shape_cast %200 : vector<1x32x96xbf16> to vector<32x96xbf16>
    %cst_89 = arith.constant dense<0.000000e+00> : vector<16x96xf32>
    %202 = tpu.matmul %199, %201, %cst_89 {dimension_numbers = #tpu.dot_dimension_numbers<[1], [0], [0], [1], [0, 0, 1, 1], [], []>} : vector<16x32xbf16>, vector<32x96xbf16>, vector<16x96xf32> -> vector<16x96xf32>
    %c1_90 = arith.constant 1 : index
    %c0_91 = arith.constant 0 : index
    %c0_92 = arith.constant 0 : index
    %203 = vector.load %arg5[%c1_90, %c0_91, %c0_92] : memref<2x1x96xf32, #tpu.memory_space<vmem>>, vector<1x1x96xf32>
    %204 = vector.shape_cast %203 : vector<1x1x96xf32> to vector<1x96xf32>
    %205 = vector.broadcast %204 : vector<1x96xf32> to vector<16x96xf32>
    %206 = arith.addf %202, %205 : vector<16x96xf32>
    %207 = vector.extract_strided_slice %206 {offsets = [0, 0], sizes = [16, 16], strides = [1, 1]} : vector<16x96xf32> to vector<16x16xf32>
    %208 = vector.shape_cast %207 : vector<16x16xf32> to vector<2x8x16xf32>
    %209 = vector.extract_strided_slice %206 {offsets = [0, 32], sizes = [16, 16], strides = [1, 1]} : vector<16x96xf32> to vector<16x16xf32>
    %210 = vector.shape_cast %209 : vector<16x16xf32> to vector<2x8x16xf32>
    %211 = vector.extract_strided_slice %206 {offsets = [0, 64], sizes = [16, 16], strides = [1, 1]} : vector<16x96xf32> to vector<16x16xf32>
    %212 = vector.shape_cast %211 : vector<16x16xf32> to vector<2x8x16xf32>
    %213 = arith.truncf %208 : vector<2x8x16xf32> to vector<2x8x16xbf16>
    %214 = arith.truncf %210 : vector<2x8x16xf32> to vector<2x8x16xbf16>
    "tpu.trace_start"() <{level = 10 : i32, message = "bqd,bkd->bqk"}> : () -> ()
    %cst_93 = arith.constant dense<0.000000e+00> : vector<2x8x8xf32>
    %215 = tpu.matmul %213, %214, %cst_93 {dimension_numbers = #tpu.dot_dimension_numbers<[2], [2], [1], [1], [0, 0, 0, 1, 1, 1], [0], [0]>} : vector<2x8x16xbf16>, vector<2x8x16xbf16>, vector<2x8x8xf32> -> vector<2x8x8xf32>
    "tpu.trace_stop"() : () -> ()
    %cst_94 = arith.constant 2.500000e-01 : f32
    %216 = vector.broadcast %cst_94 : f32 to vector<2x8x8xf32>
    %217 = arith.mulf %215, %216 : vector<2x8x8xf32>
    %218 = vector.broadcast %0 : vector<2x1x8xf32> to vector<2x8x8xf32>
    %219 = arith.addf %217, %218 : vector<2x8x8xf32>
    %cst_95 = arith.constant dense<0xFF800000> : vector<2x8xf32>
    %220 = vector.multi_reduction <maximumf>, %219, %cst_95 [2] : vector<2x8x8xf32> to vector<2x8xf32>
    %221 = vector.shape_cast %220 : vector<2x8xf32> to vector<2x8x1xf32>
    %222 = vector.broadcast %221 : vector<2x8x1xf32> to vector<2x8x8xf32>
    %223 = arith.subf %219, %222 : vector<2x8x8xf32>
    %224 = math.exp %223 : vector<2x8x8xf32>
    %cst_96 = arith.constant dense<0.000000e+00> : vector<2x8xf32>
    %225 = vector.multi_reduction <add>, %224, %cst_96 [2] : vector<2x8x8xf32> to vector<2x8xf32>
    %226 = vector.shape_cast %225 : vector<2x8xf32> to vector<2x8x1xf32>
    %227 = vector.broadcast %226 : vector<2x8x1xf32> to vector<2x8x8xf32>
    %228 = arith.divf %224, %227 : vector<2x8x8xf32>
    %229 = arith.truncf %228 : vector<2x8x8xf32> to vector<2x8x8xbf16>
    %230 = arith.truncf %212 : vector<2x8x16xf32> to vector<2x8x16xbf16>
    "tpu.trace_start"() <{level = 10 : i32, message = "bqk,bkd->bqd"}> : () -> ()
    %cst_97 = arith.constant dense<0.000000e+00> : vector<2x8x16xf32>
    %231 = tpu.matmul %229, %230, %cst_97 {dimension_numbers = #tpu.dot_dimension_numbers<[2], [1], [1], [2], [0, 0, 0, 1, 1, 2], [0], [0]>} : vector<2x8x8xbf16>, vector<2x8x16xbf16>, vector<2x8x16xf32> -> vector<2x8x16xf32>
    "tpu.trace_stop"() : () -> ()
    %232 = vector.shape_cast %231 : vector<2x8x16xf32> to vector<16x16xf32>
    %233 = vector.extract_strided_slice %206 {offsets = [0, 16], sizes = [16, 16], strides = [1, 1]} : vector<16x96xf32> to vector<16x16xf32>
    %234 = vector.shape_cast %233 : vector<16x16xf32> to vector<2x8x16xf32>
    %235 = vector.extract_strided_slice %206 {offsets = [0, 48], sizes = [16, 16], strides = [1, 1]} : vector<16x96xf32> to vector<16x16xf32>
    %236 = vector.shape_cast %235 : vector<16x16xf32> to vector<2x8x16xf32>
    %237 = vector.extract_strided_slice %206 {offsets = [0, 80], sizes = [16, 16], strides = [1, 1]} : vector<16x96xf32> to vector<16x16xf32>
    %238 = vector.shape_cast %237 : vector<16x16xf32> to vector<2x8x16xf32>
    %239 = arith.truncf %234 : vector<2x8x16xf32> to vector<2x8x16xbf16>
    %240 = arith.truncf %236 : vector<2x8x16xf32> to vector<2x8x16xbf16>
    "tpu.trace_start"() <{level = 10 : i32, message = "bqd,bkd->bqk"}> : () -> ()
    %cst_98 = arith.constant dense<0.000000e+00> : vector<2x8x8xf32>
    %241 = tpu.matmul %239, %240, %cst_98 {dimension_numbers = #tpu.dot_dimension_numbers<[2], [2], [1], [1], [0, 0, 0, 1, 1, 1], [0], [0]>} : vector<2x8x16xbf16>, vector<2x8x16xbf16>, vector<2x8x8xf32> -> vector<2x8x8xf32>
    "tpu.trace_stop"() : () -> ()
    %cst_99 = arith.constant 2.500000e-01 : f32
    %242 = vector.broadcast %cst_99 : f32 to vector<2x8x8xf32>
    %243 = arith.mulf %241, %242 : vector<2x8x8xf32>
    %244 = vector.broadcast %0 : vector<2x1x8xf32> to vector<2x8x8xf32>
    %245 = arith.addf %243, %244 : vector<2x8x8xf32>
    %cst_100 = arith.constant dense<0xFF800000> : vector<2x8xf32>
    %246 = vector.multi_reduction <maximumf>, %245, %cst_100 [2] : vector<2x8x8xf32> to vector<2x8xf32>
    %247 = vector.shape_cast %246 : vector<2x8xf32> to vector<2x8x1xf32>
    %248 = vector.broadcast %247 : vector<2x8x1xf32> to vector<2x8x8xf32>
    %249 = arith.subf %245, %248 : vector<2x8x8xf32>
    %250 = math.exp %249 : vector<2x8x8xf32>
    %cst_101 = arith.constant dense<0.000000e+00> : vector<2x8xf32>
    %251 = vector.multi_reduction <add>, %250, %cst_101 [2] : vector<2x8x8xf32> to vector<2x8xf32>
    %252 = vector.shape_cast %251 : vector<2x8xf32> to vector<2x8x1xf32>
    %253 = vector.broadcast %252 : vector<2x8x1xf32> to vector<2x8x8xf32>
    %254 = arith.divf %250, %253 : vector<2x8x8xf32>
    %255 = arith.truncf %254 : vector<2x8x8xf32> to vector<2x8x8xbf16>
    %256 = arith.truncf %238 : vector<2x8x16xf32> to vector<2x8x16xbf16>
    "tpu.trace_start"() <{level = 10 : i32, message = "bqk,bkd->bqd"}> : () -> ()
    %cst_102 = arith.constant dense<0.000000e+00> : vector<2x8x16xf32>
    %257 = tpu.matmul %255, %256, %cst_102 {dimension_numbers = #tpu.dot_dimension_numbers<[2], [1], [1], [2], [0, 0, 0, 1, 1, 2], [0], [0]>} : vector<2x8x8xbf16>, vector<2x8x16xbf16>, vector<2x8x16xf32> -> vector<2x8x16xf32>
    "tpu.trace_stop"() : () -> ()
    %258 = vector.shape_cast %257 : vector<2x8x16xf32> to vector<16x16xf32>
    %259 = tpu.concatenate %232, %258 in 1 : vector<16x16xf32>, vector<16x16xf32> -> vector<16x32xf32>
    %260 = arith.truncf %259 : vector<16x32xf32> to vector<16x32xbf16>
    %c1_103 = arith.constant 1 : index
    %c0_104 = arith.constant 0 : index
    %c0_105 = arith.constant 0 : index
    %261 = vector.load %arg6[%c1_103, %c0_104, %c0_105] : memref<2x32x32xbf16, #tpu.memory_space<vmem>>, vector<1x32x32xbf16>
    %262 = vector.shape_cast %261 : vector<1x32x32xbf16> to vector<32x32xbf16>
    %cst_106 = arith.constant dense<0.000000e+00> : vector<16x32xf32>
    %263 = tpu.matmul %260, %262, %cst_106 {dimension_numbers = #tpu.dot_dimension_numbers<[1], [0], [0], [1], [0, 0, 1, 1], [], []>} : vector<16x32xbf16>, vector<32x32xbf16>, vector<16x32xf32> -> vector<16x32xf32>
    %c1_107 = arith.constant 1 : index
    %c0_108 = arith.constant 0 : index
    %c0_109 = arith.constant 0 : index
    %264 = vector.load %arg7[%c1_107, %c0_108, %c0_109] : memref<2x1x32xf32, #tpu.memory_space<vmem>>, vector<1x1x32xf32>
    %265 = vector.shape_cast %264 : vector<1x1x32xf32> to vector<1x32xf32>
    %266 = vector.broadcast %265 : vector<1x32xf32> to vector<16x32xf32>
    %267 = arith.addf %263, %266 : vector<16x32xf32>
    %268 = arith.addf %198, %267 : vector<16x32xf32>
    %c1_110 = arith.constant 1 : index
    %c0_111 = arith.constant 0 : index
    %c0_112 = arith.constant 0 : index
    %269 = vector.load %arg8[%c1_110, %c0_111, %c0_112] : memref<2x1x32xf32, #tpu.memory_space<vmem>>, vector<1x1x32xf32>
    %270 = vector.shape_cast %269 : vector<1x1x32xf32> to vector<1x32xf32>
    %c1_113 = arith.constant 1 : index
    %c0_114 = arith.constant 0 : index
    %c0_115 = arith.constant 0 : index
    %271 = vector.load %arg9[%c1_113, %c0_114, %c0_115] : memref<2x1x32xf32, #tpu.memory_space<vmem>>, vector<1x1x32xf32>
    %272 = vector.shape_cast %271 : vector<1x1x32xf32> to vector<1x32xf32>
    %cst_116 = arith.constant dense<0.000000e+00> : vector<16xf32>
    %273 = vector.multi_reduction <add>, %268, %cst_116 [1] : vector<16x32xf32> to vector<16xf32>
    %274 = vector.shape_cast %273 : vector<16xf32> to vector<16x1xf32>
    %cst_117 = arith.constant 3.200000e+01 : f32
    %275 = vector.broadcast %cst_117 : f32 to vector<16x1xf32>
    %276 = arith.divf %274, %275 : vector<16x1xf32>
    %277 = vector.broadcast %276 : vector<16x1xf32> to vector<16x32xf32>
    %278 = arith.subf %268, %277 : vector<16x32xf32>
    %279 = arith.mulf %278, %278 : vector<16x32xf32>
    %cst_118 = arith.constant dense<0.000000e+00> : vector<16xf32>
    %280 = vector.multi_reduction <add>, %279, %cst_118 [1] : vector<16x32xf32> to vector<16xf32>
    %281 = vector.shape_cast %280 : vector<16xf32> to vector<16x1xf32>
    %cst_119 = arith.constant 3.200000e+01 : f32
    %282 = vector.broadcast %cst_119 : f32 to vector<16x1xf32>
    %283 = arith.divf %281, %282 : vector<16x1xf32>
    %cst_120 = arith.constant 9.99999996E-13 : f32
    %284 = vector.broadcast %cst_120 : f32 to vector<16x1xf32>
    %285 = arith.addf %283, %284 : vector<16x1xf32>
    %286 = math.rsqrt %285 : vector<16x1xf32>
    %287 = vector.broadcast %286 : vector<16x1xf32> to vector<16x32xf32>
    %288 = arith.mulf %278, %287 : vector<16x32xf32>
    %289 = vector.broadcast %270 : vector<1x32xf32> to vector<16x32xf32>
    %290 = arith.mulf %288, %289 : vector<16x32xf32>
    %291 = vector.broadcast %272 : vector<1x32xf32> to vector<16x32xf32>
    %292 = arith.addf %290, %291 : vector<16x32xf32>
    %293 = arith.truncf %292 : vector<16x32xf32> to vector<16x32xbf16>
    %c1_121 = arith.constant 1 : index
    %c0_122 = arith.constant 0 : index
    %c0_123 = arith.constant 0 : index
    %294 = vector.load %arg10[%c1_121, %c0_122, %c0_123] : memref<2x32x64xbf16, #tpu.memory_space<vmem>>, vector<1x32x64xbf16>
    %295 = vector.shape_cast %294 : vector<1x32x64xbf16> to vector<32x64xbf16>
    %cst_124 = arith.constant dense<0.000000e+00> : vector<16x64xf32>
    %296 = tpu.matmul %293, %295, %cst_124 {dimension_numbers = #tpu.dot_dimension_numbers<[1], [0], [0], [1], [0, 0, 1, 1], [], []>} : vector<16x32xbf16>, vector<32x64xbf16>, vector<16x64xf32> -> vector<16x64xf32>
    %c1_125 = arith.constant 1 : index
    %c0_126 = arith.constant 0 : index
    %c0_127 = arith.constant 0 : index
    %297 = vector.load %arg11[%c1_125, %c0_126, %c0_127] : memref<2x1x64xf32, #tpu.memory_space<vmem>>, vector<1x1x64xf32>
    %298 = vector.shape_cast %297 : vector<1x1x64xf32> to vector<1x64xf32>
    %299 = vector.broadcast %298 : vector<1x64xf32> to vector<16x64xf32>
    %300 = arith.addf %296, %299 : vector<16x64xf32>
    %cst_128 = arith.constant 5.000000e-01 : f32
    %301 = vector.broadcast %cst_128 : f32 to vector<16x64xf32>
    %302 = arith.mulf %301, %300 : vector<16x64xf32>
    %cst_129 = arith.constant 0.707106769 : f32
    %303 = vector.broadcast %cst_129 : f32 to vector<16x64xf32>
    %304 = arith.mulf %300, %303 : vector<16x64xf32>
    %305 = math.absf %304 : vector<16x64xf32>
    %cst_130 = arith.constant 0.327591091 : f32
    %306 = vector.broadcast %cst_130 : f32 to vector<16x64xf32>
    %307 = arith.mulf %306, %305 : vector<16x64xf32>
    %cst_131 = arith.constant 1.000000e+00 : f32
    %308 = vector.broadcast %cst_131 : f32 to vector<16x64xf32>
    %309 = arith.addf %308, %307 : vector<16x64xf32>
    %cst_132 = arith.constant 1.000000e+00 : f32
    %310 = vector.broadcast %cst_132 : f32 to vector<16x64xf32>
    %311 = arith.divf %310, %309 : vector<16x64xf32>
    %cst_133 = arith.constant 1.06140542 : f32
    %312 = vector.broadcast %cst_133 : f32 to vector<16x64xf32>
    %313 = arith.mulf %311, %312 : vector<16x64xf32>
    %cst_134 = arith.constant -1.45315206 : f32
    %314 = vector.broadcast %cst_134 : f32 to vector<16x64xf32>
    %315 = arith.addf %314, %313 : vector<16x64xf32>
    %316 = arith.mulf %311, %315 : vector<16x64xf32>
    %cst_135 = arith.constant 1.42141378 : f32
    %317 = vector.broadcast %cst_135 : f32 to vector<16x64xf32>
    %318 = arith.addf %317, %316 : vector<16x64xf32>
    %319 = arith.mulf %311, %318 : vector<16x64xf32>
    %cst_136 = arith.constant -0.284496725 : f32
    %320 = vector.broadcast %cst_136 : f32 to vector<16x64xf32>
    %321 = arith.addf %320, %319 : vector<16x64xf32>
    %322 = arith.mulf %311, %321 : vector<16x64xf32>
    %cst_137 = arith.constant 0.254829586 : f32
    %323 = vector.broadcast %cst_137 : f32 to vector<16x64xf32>
    %324 = arith.addf %323, %322 : vector<16x64xf32>
    %325 = arith.mulf %311, %324 : vector<16x64xf32>
    %cst_138 = arith.constant 0.000000e+00 : f32
    %326 = vector.broadcast %cst_138 : f32 to vector<16x64xf32>
    %327 = arith.subf %326, %305 : vector<16x64xf32>
    %328 = arith.mulf %327, %305 : vector<16x64xf32>
    %329 = math.exp %328 : vector<16x64xf32>
    %330 = arith.mulf %325, %329 : vector<16x64xf32>
    %cst_139 = arith.constant 1.000000e+00 : f32
    %331 = vector.broadcast %cst_139 : f32 to vector<16x64xf32>
    %332 = arith.subf %331, %330 : vector<16x64xf32>
    %cst_140 = arith.constant 0.000000e+00 : f32
    %333 = vector.broadcast %cst_140 : f32 to vector<16x64xf32>
    %334 = arith.cmpf oge, %304, %333 : vector<16x64xf32>
    %cst_141 = arith.constant 0.000000e+00 : f32
    %335 = vector.broadcast %cst_141 : f32 to vector<16x64xf32>
    %336 = arith.subf %335, %332 : vector<16x64xf32>
    %337 = arith.select %334, %332, %336 : vector<16x64xi1>, vector<16x64xf32>
    %cst_142 = arith.constant 1.000000e+00 : f32
    %338 = vector.broadcast %cst_142 : f32 to vector<16x64xf32>
    %339 = arith.addf %338, %337 : vector<16x64xf32>
    %340 = arith.mulf %302, %339 : vector<16x64xf32>
    %341 = arith.truncf %340 : vector<16x64xf32> to vector<16x64xbf16>
    %c1_143 = arith.constant 1 : index
    %c0_144 = arith.constant 0 : index
    %c0_145 = arith.constant 0 : index
    %342 = vector.load %arg12[%c1_143, %c0_144, %c0_145] : memref<2x64x32xbf16, #tpu.memory_space<vmem>>, vector<1x64x32xbf16>
    %343 = vector.shape_cast %342 : vector<1x64x32xbf16> to vector<64x32xbf16>
    %cst_146 = arith.constant dense<0.000000e+00> : vector<16x32xf32>
    %344 = tpu.matmul %341, %343, %cst_146 {dimension_numbers = #tpu.dot_dimension_numbers<[1], [0], [0], [1], [0, 0, 1, 1], [], []>} : vector<16x64xbf16>, vector<64x32xbf16>, vector<16x32xf32> -> vector<16x32xf32>
    %c1_147 = arith.constant 1 : index
    %c0_148 = arith.constant 0 : index
    %c0_149 = arith.constant 0 : index
    %345 = vector.load %arg13[%c1_147, %c0_148, %c0_149] : memref<2x1x32xf32, #tpu.memory_space<vmem>>, vector<1x1x32xf32>
    %346 = vector.shape_cast %345 : vector<1x1x32xf32> to vector<1x32xf32>
    %347 = vector.broadcast %346 : vector<1x32xf32> to vector<16x32xf32>
    %348 = arith.addf %344, %347 : vector<16x32xf32>
    %349 = arith.addf %292, %348 : vector<16x32xf32>
    %c1_150 = arith.constant 1 : index
    %c0_151 = arith.constant 0 : index
    %c0_152 = arith.constant 0 : index
    %350 = vector.load %arg14[%c1_150, %c0_151, %c0_152] : memref<2x1x32xf32, #tpu.memory_space<vmem>>, vector<1x1x32xf32>
    %351 = vector.shape_cast %350 : vector<1x1x32xf32> to vector<1x32xf32>
    %c1_153 = arith.constant 1 : index
    %c0_154 = arith.constant 0 : index
    %c0_155 = arith.constant 0 : index
    %352 = vector.load %arg15[%c1_153, %c0_154, %c0_155] : memref<2x1x32xf32, #tpu.memory_space<vmem>>, vector<1x1x32xf32>
    %353 = vector.shape_cast %352 : vector<1x1x32xf32> to vector<1x32xf32>
    %cst_156 = arith.constant dense<0.000000e+00> : vector<16xf32>
    %354 = vector.multi_reduction <add>, %349, %cst_156 [1] : vector<16x32xf32> to vector<16xf32>
    %355 = vector.shape_cast %354 : vector<16xf32> to vector<16x1xf32>
    %cst_157 = arith.constant 3.200000e+01 : f32
    %356 = vector.broadcast %cst_157 : f32 to vector<16x1xf32>
    %357 = arith.divf %355, %356 : vector<16x1xf32>
    %358 = vector.broadcast %357 : vector<16x1xf32> to vector<16x32xf32>
    %359 = arith.subf %349, %358 : vector<16x32xf32>
    %360 = arith.mulf %359, %359 : vector<16x32xf32>
    %cst_158 = arith.constant dense<0.000000e+00> : vector<16xf32>
    %361 = vector.multi_reduction <add>, %360, %cst_158 [1] : vector<16x32xf32> to vector<16xf32>
    %362 = vector.shape_cast %361 : vector<16xf32> to vector<16x1xf32>
    %cst_159 = arith.constant 3.200000e+01 : f32
    %363 = vector.broadcast %cst_159 : f32 to vector<16x1xf32>
    %364 = arith.divf %362, %363 : vector<16x1xf32>
    %cst_160 = arith.constant 9.99999996E-13 : f32
    %365 = vector.broadcast %cst_160 : f32 to vector<16x1xf32>
    %366 = arith.addf %364, %365 : vector<16x1xf32>
    %367 = math.rsqrt %366 : vector<16x1xf32>
    %368 = vector.broadcast %367 : vector<16x1xf32> to vector<16x32xf32>
    %369 = arith.mulf %359, %368 : vector<16x32xf32>
    %370 = vector.broadcast %351 : vector<1x32xf32> to vector<16x32xf32>
    %371 = arith.mulf %369, %370 : vector<16x32xf32>
    %372 = vector.broadcast %353 : vector<1x32xf32> to vector<16x32xf32>
    %373 = arith.addf %371, %372 : vector<16x32xf32>
    %374 = arith.truncf %373 : vector<16x32xf32> to vector<16x32xbf16>
    %c0_161 = arith.constant 0 : index
    %c0_162 = arith.constant 0 : index
    %375 = vector.load %arg19[%c0_161, %c0_162] : memref<32x5xbf16, #tpu.memory_space<vmem>>, vector<32x5xbf16>
    %cst_163 = arith.constant dense<0.000000e+00> : vector<16x5xf32>
    %376 = tpu.matmul %374, %375, %cst_163 {dimension_numbers = #tpu.dot_dimension_numbers<[1], [0], [0], [1], [0, 0, 1, 1], [], []>} : vector<16x32xbf16>, vector<32x5xbf16>, vector<16x5xf32> -> vector<16x5xf32>
    %c0_164 = arith.constant 0 : index
    %c0_165 = arith.constant 0 : index
    %377 = vector.load %arg20[%c0_164, %c0_165] : memref<1x5xf32, #tpu.memory_space<vmem>>, vector<1x5xf32>
    %378 = vector.broadcast %377 : vector<1x5xf32> to vector<16x5xf32>
    %379 = arith.addf %376, %378 : vector<16x5xf32>
    %c0_166 = arith.constant 0 : index
    %c0_167 = arith.constant 0 : index
    %c0_168 = arith.constant 0 : index
    %380 = vector.load %arg16[%c0_166, %c0_167, %c0_168] : memref<2x8x8xf32, #tpu.memory_space<vmem>>, vector<2x8x8xf32>
    %381 = vector.shape_cast %379 : vector<16x5xf32> to vector<2x8x5xf32>
    "tpu.trace_start"() <{level = 10 : i32, message = "bij,bjl->bil"}> : () -> ()
    %cst_169 = arith.constant dense<0.000000e+00> : vector<2x8x5xf32>
    %382 = tpu.matmul %380, %381, %cst_169 {dimension_numbers = #tpu.dot_dimension_numbers<[2], [1], [1], [2], [0, 0, 0, 1, 1, 2], [0], [0]>} : vector<2x8x8xf32>, vector<2x8x5xf32>, vector<2x8x5xf32> -> vector<2x8x5xf32>
    "tpu.trace_stop"() : () -> ()
    %c0_170 = arith.constant 0 : index
    %c0_171 = arith.constant 0 : index
    %383 = vector.load %arg17[%c0_170, %c0_171] : memref<2x8xf32, #tpu.memory_space<vmem>>, vector<2x8xf32>
    %c0_172 = arith.constant 0 : index
    %c0_173 = arith.constant 0 : index
    %c0_174 = arith.constant 0 : index
    %384 = vector.load %arg18[%c0_172, %c0_173, %c0_174] : memref<2x8x5xf32, #tpu.memory_space<vmem>>, vector<2x8x5xf32>
    %c0_175 = arith.constant 0 : index
    %c0_176 = arith.constant 0 : index
    %385 = vector.load %arg21[%c0_175, %c0_176] : memref<5x5xf32, #tpu.memory_space<vmem>>, vector<5x5xf32>
    %c0_177 = arith.constant 0 : index
    %c0_178 = arith.constant 0 : index
    %386 = vector.load %arg22[%c0_177, %c0_178] : memref<5x5xf32, #tpu.memory_space<vmem>>, vector<5x5xf32>
    %c0_179 = arith.constant 0 : index
    %c0_180 = arith.constant 0 : index
    %387 = vector.load %arg23[%c0_179, %c0_180] : memref<1x5xf32, #tpu.memory_space<vmem>>, vector<1x5xf32>
    %c0_181 = arith.constant 0 : index
    %c0_182 = arith.constant 0 : index
    %388 = vector.load %arg24[%c0_181, %c0_182] : memref<1x5xf32, #tpu.memory_space<vmem>>, vector<1x5xf32>
    %389 = vector.extract_strided_slice %382 {offsets = [0, 0, 0], sizes = [2, 1, 5], strides = [1, 1, 1]} : vector<2x8x5xf32> to vector<2x1x5xf32>
    %390 = vector.shape_cast %389 : vector<2x1x5xf32> to vector<2x5xf32>
    %391 = vector.extract_strided_slice %384 {offsets = [0, 0, 0], sizes = [2, 1, 5], strides = [1, 1, 1]} : vector<2x8x5xf32> to vector<2x1x5xf32>
    %392 = vector.shape_cast %391 : vector<2x1x5xf32> to vector<2x5xf32>
    %393 = vector.broadcast %387 : vector<1x5xf32> to vector<2x5xf32>
    %394 = arith.addf %393, %390 : vector<2x5xf32>
    %395 = arith.mulf %394, %392 : vector<2x5xf32>
    %cst_183 = arith.constant dense<0.000000e+00> : vector<2xf32>
    %396 = vector.multi_reduction <add>, %395, %cst_183 [1] : vector<2x5xf32> to vector<2xf32>
    %397 = vector.shape_cast %396 : vector<2xf32> to vector<2x1xf32>
    %398 = vector.broadcast %387 : vector<1x5xf32> to vector<2x5xf32>
    %399 = arith.addf %398, %390 : vector<2x5xf32>
    %400 = vector.broadcast %387 : vector<1x5xf32> to vector<2x5xf32>
    %401 = arith.addf %400, %390 : vector<2x5xf32>
    %402 = vector.extract_strided_slice %382 {offsets = [0, 1, 0], sizes = [2, 1, 5], strides = [1, 1, 1]} : vector<2x8x5xf32> to vector<2x1x5xf32>
    %403 = vector.shape_cast %402 : vector<2x1x5xf32> to vector<2x5xf32>
    %404 = vector.extract_strided_slice %384 {offsets = [0, 1, 0], sizes = [2, 1, 5], strides = [1, 1, 1]} : vector<2x8x5xf32> to vector<2x1x5xf32>
    %405 = vector.shape_cast %404 : vector<2x1x5xf32> to vector<2x5xf32>
    %406 = vector.extract_strided_slice %383 {offsets = [0, 1], sizes = [2, 1], strides = [1, 1]} : vector<2x8xf32> to vector<2x1xf32>
    %cst_184 = arith.constant dense<0.000000e+00> : vector<2x5xf32>
    %407 = tpu.matmul %392, %385, %cst_184 {dimension_numbers = #tpu.dot_dimension_numbers<[1], [0], [0], [1], [0, 0, 1, 1], [], []>} : vector<2x5xf32>, vector<5x5xf32>, vector<2x5xf32> -> vector<2x5xf32>
    %408 = arith.mulf %407, %405 : vector<2x5xf32>
    %cst_185 = arith.constant dense<0.000000e+00> : vector<2xf32>
    %409 = vector.multi_reduction <add>, %408, %cst_185 [1] : vector<2x5xf32> to vector<2xf32>
    %410 = vector.shape_cast %409 : vector<2xf32> to vector<2x1xf32>
    %411 = arith.mulf %403, %405 : vector<2x5xf32>
    %cst_186 = arith.constant dense<0.000000e+00> : vector<2xf32>
    %412 = vector.multi_reduction <add>, %411, %cst_186 [1] : vector<2x5xf32> to vector<2xf32>
    %413 = vector.shape_cast %412 : vector<2xf32> to vector<2x1xf32>
    %414 = arith.addf %410, %413 : vector<2x1xf32>
    %415 = arith.mulf %406, %414 : vector<2x1xf32>
    %416 = arith.addf %397, %415 : vector<2x1xf32>
    %cst_187 = arith.constant 5.000000e-01 : f32
    %417 = vector.broadcast %cst_187 : f32 to vector<2x1xf32>
    %418 = arith.cmpf ogt, %406, %417 : vector<2x1xf32>
    %419 = vector.shape_cast %418 : vector<2x1xi1> to vector<2x1xi1>
    %420 = vector.broadcast %419 : vector<2x1xi1> to vector<2x5xi1>
    %421 = arith.select %420, %405, %392 : vector<2x5xi1>, vector<2x5xf32>
    %422 = vector.shape_cast %399 : vector<2x5xf32> to vector<2x1x5xf32>
    %423 = vector.shape_cast %386 : vector<5x5xf32> to vector<1x5x5xf32>
    %424 = vector.broadcast %422 : vector<2x1x5xf32> to vector<2x5x5xf32>
    %425 = vector.broadcast %423 : vector<1x5x5xf32> to vector<2x5x5xf32>
    %426 = arith.addf %424, %425 : vector<2x5x5xf32>
    %cst_188 = arith.constant dense<0xFF800000> : vector<2x5xf32>
    %427 = vector.multi_reduction <maximumf>, %426, %cst_188 [2] : vector<2x5x5xf32> to vector<2x5xf32>
    %428 = vector.shape_cast %427 : vector<2x5xf32> to vector<2x5x1xf32>
    %429 = vector.broadcast %428 : vector<2x5x1xf32> to vector<2x5x5xf32>
    %430 = arith.subf %426, %429 : vector<2x5x5xf32>
    %431 = math.exp %430 : vector<2x5x5xf32>
    %cst_189 = arith.constant dense<0.000000e+00> : vector<2x5xf32>
    %432 = vector.multi_reduction <add>, %431, %cst_189 [2] : vector<2x5x5xf32> to vector<2x5xf32>
    %433 = math.log %432 : vector<2x5xf32>
    %434 = arith.addf %427, %433 : vector<2x5xf32>
    %cst_190 = arith.constant 5.000000e-01 : f32
    %435 = vector.broadcast %cst_190 : f32 to vector<2x1xf32>
    %436 = arith.cmpf ogt, %406, %435 : vector<2x1xf32>
    %437 = arith.addf %434, %403 : vector<2x5xf32>
    %438 = vector.shape_cast %436 : vector<2x1xi1> to vector<2x1xi1>
    %439 = vector.broadcast %438 : vector<2x1xi1> to vector<2x5xi1>
    %440 = arith.select %439, %437, %399 : vector<2x5xi1>, vector<2x5xf32>
    %441 = vector.shape_cast %401 : vector<2x5xf32> to vector<2x1x5xf32>
    %442 = vector.shape_cast %386 : vector<5x5xf32> to vector<1x5x5xf32>
    %443 = vector.broadcast %441 : vector<2x1x5xf32> to vector<2x5x5xf32>
    %444 = vector.broadcast %442 : vector<1x5x5xf32> to vector<2x5x5xf32>
    %445 = arith.addf %443, %444 : vector<2x5x5xf32>
    %cst_191 = arith.constant dense<0xFF800000> : vector<2x5xf32>
    %446 = vector.multi_reduction <maximumf>, %445, %cst_191 [2] : vector<2x5x5xf32> to vector<2x5xf32>
    %447 = vector.shape_cast %446 : vector<2x5xf32> to vector<2x5x1xf32>
    %448 = tpu.iota {dimensions = array<i32: 2>} : vector<2x5x5xi32>
    %c5_i32 = arith.constant 5 : i32
    %449 = vector.broadcast %c5_i32 : i32 to vector<2x5x5xi32>
    %450 = vector.broadcast %447 : vector<2x5x1xf32> to vector<2x5x5xf32>
    %451 = arith.cmpf oge, %445, %450 : vector<2x5x5xf32>
    %452 = arith.select %451, %448, %449 : vector<2x5x5xi1>, vector<2x5x5xi32>
    %cst_192 = arith.constant dense<2147483647> : vector<2x5xi32>
    %453 = vector.multi_reduction <minsi>, %452, %cst_192 [2] : vector<2x5x5xi32> to vector<2x5xi32>
    %cst_193 = arith.constant 5.000000e-01 : f32
    %454 = vector.broadcast %cst_193 : f32 to vector<2x1xf32>
    %455 = arith.cmpf ogt, %406, %454 : vector<2x1xf32>
    %cst_194 = arith.constant dense<0xFF800000> : vector<2x5xf32>
    %456 = vector.multi_reduction <maximumf>, %445, %cst_194 [2] : vector<2x5x5xf32> to vector<2x5xf32>
    %457 = arith.addf %456, %403 : vector<2x5xf32>
    %458 = vector.shape_cast %455 : vector<2x1xi1> to vector<2x1xi1>
    %459 = vector.broadcast %458 : vector<2x1xi1> to vector<2x5xi1>
    %460 = arith.select %459, %457, %401 : vector<2x5xi1>, vector<2x5xf32>
    %461 = vector.extract_strided_slice %382 {offsets = [0, 2, 0], sizes = [2, 1, 5], strides = [1, 1, 1]} : vector<2x8x5xf32> to vector<2x1x5xf32>
    %462 = vector.shape_cast %461 : vector<2x1x5xf32> to vector<2x5xf32>
    %463 = vector.extract_strided_slice %384 {offsets = [0, 2, 0], sizes = [2, 1, 5], strides = [1, 1, 1]} : vector<2x8x5xf32> to vector<2x1x5xf32>
    %464 = vector.shape_cast %463 : vector<2x1x5xf32> to vector<2x5xf32>
    %465 = vector.extract_strided_slice %383 {offsets = [0, 2], sizes = [2, 1], strides = [1, 1]} : vector<2x8xf32> to vector<2x1xf32>
    %cst_195 = arith.constant dense<0.000000e+00> : vector<2x5xf32>
    %466 = tpu.matmul %405, %385, %cst_195 {dimension_numbers = #tpu.dot_dimension_numbers<[1], [0], [0], [1], [0, 0, 1, 1], [], []>} : vector<2x5xf32>, vector<5x5xf32>, vector<2x5xf32> -> vector<2x5xf32>
    %467 = arith.mulf %466, %464 : vector<2x5xf32>
    %cst_196 = arith.constant dense<0.000000e+00> : vector<2xf32>
    %468 = vector.multi_reduction <add>, %467, %cst_196 [1] : vector<2x5xf32> to vector<2xf32>
    %469 = vector.shape_cast %468 : vector<2xf32> to vector<2x1xf32>
    %470 = arith.mulf %462, %464 : vector<2x5xf32>
    %cst_197 = arith.constant dense<0.000000e+00> : vector<2xf32>
    %471 = vector.multi_reduction <add>, %470, %cst_197 [1] : vector<2x5xf32> to vector<2xf32>
    %472 = vector.shape_cast %471 : vector<2xf32> to vector<2x1xf32>
    %473 = arith.addf %469, %472 : vector<2x1xf32>
    %474 = arith.mulf %465, %473 : vector<2x1xf32>
    %475 = arith.addf %416, %474 : vector<2x1xf32>
    %cst_198 = arith.constant 5.000000e-01 : f32
    %476 = vector.broadcast %cst_198 : f32 to vector<2x1xf32>
    %477 = arith.cmpf ogt, %465, %476 : vector<2x1xf32>
    %478 = vector.shape_cast %477 : vector<2x1xi1> to vector<2x1xi1>
    %479 = vector.broadcast %478 : vector<2x1xi1> to vector<2x5xi1>
    %480 = arith.select %479, %464, %421 : vector<2x5xi1>, vector<2x5xf32>
    %481 = vector.shape_cast %440 : vector<2x5xf32> to vector<2x1x5xf32>
    %482 = vector.shape_cast %386 : vector<5x5xf32> to vector<1x5x5xf32>
    %483 = vector.broadcast %481 : vector<2x1x5xf32> to vector<2x5x5xf32>
    %484 = vector.broadcast %482 : vector<1x5x5xf32> to vector<2x5x5xf32>
    %485 = arith.addf %483, %484 : vector<2x5x5xf32>
    %cst_199 = arith.constant dense<0xFF800000> : vector<2x5xf32>
    %486 = vector.multi_reduction <maximumf>, %485, %cst_199 [2] : vector<2x5x5xf32> to vector<2x5xf32>
    %487 = vector.shape_cast %486 : vector<2x5xf32> to vector<2x5x1xf32>
    %488 = vector.broadcast %487 : vector<2x5x1xf32> to vector<2x5x5xf32>
    %489 = arith.subf %485, %488 : vector<2x5x5xf32>
    %490 = math.exp %489 : vector<2x5x5xf32>
    %cst_200 = arith.constant dense<0.000000e+00> : vector<2x5xf32>
    %491 = vector.multi_reduction <add>, %490, %cst_200 [2] : vector<2x5x5xf32> to vector<2x5xf32>
    %492 = math.log %491 : vector<2x5xf32>
    %493 = arith.addf %486, %492 : vector<2x5xf32>
    %cst_201 = arith.constant 5.000000e-01 : f32
    %494 = vector.broadcast %cst_201 : f32 to vector<2x1xf32>
    %495 = arith.cmpf ogt, %465, %494 : vector<2x1xf32>
    %496 = arith.addf %493, %462 : vector<2x5xf32>
    %497 = vector.shape_cast %495 : vector<2x1xi1> to vector<2x1xi1>
    %498 = vector.broadcast %497 : vector<2x1xi1> to vector<2x5xi1>
    %499 = arith.select %498, %496, %440 : vector<2x5xi1>, vector<2x5xf32>
    %500 = vector.shape_cast %460 : vector<2x5xf32> to vector<2x1x5xf32>
    %501 = vector.shape_cast %386 : vector<5x5xf32> to vector<1x5x5xf32>
    %502 = vector.broadcast %500 : vector<2x1x5xf32> to vector<2x5x5xf32>
    %503 = vector.broadcast %501 : vector<1x5x5xf32> to vector<2x5x5xf32>
    %504 = arith.addf %502, %503 : vector<2x5x5xf32>
    %cst_202 = arith.constant dense<0xFF800000> : vector<2x5xf32>
    %505 = vector.multi_reduction <maximumf>, %504, %cst_202 [2] : vector<2x5x5xf32> to vector<2x5xf32>
    %506 = vector.shape_cast %505 : vector<2x5xf32> to vector<2x5x1xf32>
    %507 = tpu.iota {dimensions = array<i32: 2>} : vector<2x5x5xi32>
    %c5_i32_203 = arith.constant 5 : i32
    %508 = vector.broadcast %c5_i32_203 : i32 to vector<2x5x5xi32>
    %509 = vector.broadcast %506 : vector<2x5x1xf32> to vector<2x5x5xf32>
    %510 = arith.cmpf oge, %504, %509 : vector<2x5x5xf32>
    %511 = arith.select %510, %507, %508 : vector<2x5x5xi1>, vector<2x5x5xi32>
    %cst_204 = arith.constant dense<2147483647> : vector<2x5xi32>
    %512 = vector.multi_reduction <minsi>, %511, %cst_204 [2] : vector<2x5x5xi32> to vector<2x5xi32>
    %cst_205 = arith.constant 5.000000e-01 : f32
    %513 = vector.broadcast %cst_205 : f32 to vector<2x1xf32>
    %514 = arith.cmpf ogt, %465, %513 : vector<2x1xf32>
    %cst_206 = arith.constant dense<0xFF800000> : vector<2x5xf32>
    %515 = vector.multi_reduction <maximumf>, %504, %cst_206 [2] : vector<2x5x5xf32> to vector<2x5xf32>
    %516 = arith.addf %515, %462 : vector<2x5xf32>
    %517 = vector.shape_cast %514 : vector<2x1xi1> to vector<2x1xi1>
    %518 = vector.broadcast %517 : vector<2x1xi1> to vector<2x5xi1>
    %519 = arith.select %518, %516, %460 : vector<2x5xi1>, vector<2x5xf32>
    %520 = vector.extract_strided_slice %382 {offsets = [0, 3, 0], sizes = [2, 1, 5], strides = [1, 1, 1]} : vector<2x8x5xf32> to vector<2x1x5xf32>
    %521 = vector.shape_cast %520 : vector<2x1x5xf32> to vector<2x5xf32>
    %522 = vector.extract_strided_slice %384 {offsets = [0, 3, 0], sizes = [2, 1, 5], strides = [1, 1, 1]} : vector<2x8x5xf32> to vector<2x1x5xf32>
    %523 = vector.shape_cast %522 : vector<2x1x5xf32> to vector<2x5xf32>
    %524 = vector.extract_strided_slice %383 {offsets = [0, 3], sizes = [2, 1], strides = [1, 1]} : vector<2x8xf32> to vector<2x1xf32>
    %cst_207 = arith.constant dense<0.000000e+00> : vector<2x5xf32>
    %525 = tpu.matmul %464, %385, %cst_207 {dimension_numbers = #tpu.dot_dimension_numbers<[1], [0], [0], [1], [0, 0, 1, 1], [], []>} : vector<2x5xf32>, vector<5x5xf32>, vector<2x5xf32> -> vector<2x5xf32>
    %526 = arith.mulf %525, %523 : vector<2x5xf32>
    %cst_208 = arith.constant dense<0.000000e+00> : vector<2xf32>
    %527 = vector.multi_reduction <add>, %526, %cst_208 [1] : vector<2x5xf32> to vector<2xf32>
    %528 = vector.shape_cast %527 : vector<2xf32> to vector<2x1xf32>
    %529 = arith.mulf %521, %523 : vector<2x5xf32>
    %cst_209 = arith.constant dense<0.000000e+00> : vector<2xf32>
    %530 = vector.multi_reduction <add>, %529, %cst_209 [1] : vector<2x5xf32> to vector<2xf32>
    %531 = vector.shape_cast %530 : vector<2xf32> to vector<2x1xf32>
    %532 = arith.addf %528, %531 : vector<2x1xf32>
    %533 = arith.mulf %524, %532 : vector<2x1xf32>
    %534 = arith.addf %475, %533 : vector<2x1xf32>
    %cst_210 = arith.constant 5.000000e-01 : f32
    %535 = vector.broadcast %cst_210 : f32 to vector<2x1xf32>
    %536 = arith.cmpf ogt, %524, %535 : vector<2x1xf32>
    %537 = vector.shape_cast %536 : vector<2x1xi1> to vector<2x1xi1>
    %538 = vector.broadcast %537 : vector<2x1xi1> to vector<2x5xi1>
    %539 = arith.select %538, %523, %480 : vector<2x5xi1>, vector<2x5xf32>
    %540 = vector.shape_cast %499 : vector<2x5xf32> to vector<2x1x5xf32>
    %541 = vector.shape_cast %386 : vector<5x5xf32> to vector<1x5x5xf32>
    %542 = vector.broadcast %540 : vector<2x1x5xf32> to vector<2x5x5xf32>
    %543 = vector.broadcast %541 : vector<1x5x5xf32> to vector<2x5x5xf32>
    %544 = arith.addf %542, %543 : vector<2x5x5xf32>
    %cst_211 = arith.constant dense<0xFF800000> : vector<2x5xf32>
    %545 = vector.multi_reduction <maximumf>, %544, %cst_211 [2] : vector<2x5x5xf32> to vector<2x5xf32>
    %546 = vector.shape_cast %545 : vector<2x5xf32> to vector<2x5x1xf32>
    %547 = vector.broadcast %546 : vector<2x5x1xf32> to vector<2x5x5xf32>
    %548 = arith.subf %544, %547 : vector<2x5x5xf32>
    %549 = math.exp %548 : vector<2x5x5xf32>
    %cst_212 = arith.constant dense<0.000000e+00> : vector<2x5xf32>
    %550 = vector.multi_reduction <add>, %549, %cst_212 [2] : vector<2x5x5xf32> to vector<2x5xf32>
    %551 = math.log %550 : vector<2x5xf32>
    %552 = arith.addf %545, %551 : vector<2x5xf32>
    %cst_213 = arith.constant 5.000000e-01 : f32
    %553 = vector.broadcast %cst_213 : f32 to vector<2x1xf32>
    %554 = arith.cmpf ogt, %524, %553 : vector<2x1xf32>
    %555 = arith.addf %552, %521 : vector<2x5xf32>
    %556 = vector.shape_cast %554 : vector<2x1xi1> to vector<2x1xi1>
    %557 = vector.broadcast %556 : vector<2x1xi1> to vector<2x5xi1>
    %558 = arith.select %557, %555, %499 : vector<2x5xi1>, vector<2x5xf32>
    %559 = vector.shape_cast %519 : vector<2x5xf32> to vector<2x1x5xf32>
    %560 = vector.shape_cast %386 : vector<5x5xf32> to vector<1x5x5xf32>
    %561 = vector.broadcast %559 : vector<2x1x5xf32> to vector<2x5x5xf32>
    %562 = vector.broadcast %560 : vector<1x5x5xf32> to vector<2x5x5xf32>
    %563 = arith.addf %561, %562 : vector<2x5x5xf32>
    %cst_214 = arith.constant dense<0xFF800000> : vector<2x5xf32>
    %564 = vector.multi_reduction <maximumf>, %563, %cst_214 [2] : vector<2x5x5xf32> to vector<2x5xf32>
    %565 = vector.shape_cast %564 : vector<2x5xf32> to vector<2x5x1xf32>
    %566 = tpu.iota {dimensions = array<i32: 2>} : vector<2x5x5xi32>
    %c5_i32_215 = arith.constant 5 : i32
    %567 = vector.broadcast %c5_i32_215 : i32 to vector<2x5x5xi32>
    %568 = vector.broadcast %565 : vector<2x5x1xf32> to vector<2x5x5xf32>
    %569 = arith.cmpf oge, %563, %568 : vector<2x5x5xf32>
    %570 = arith.select %569, %566, %567 : vector<2x5x5xi1>, vector<2x5x5xi32>
    %cst_216 = arith.constant dense<2147483647> : vector<2x5xi32>
    %571 = vector.multi_reduction <minsi>, %570, %cst_216 [2] : vector<2x5x5xi32> to vector<2x5xi32>
    %cst_217 = arith.constant 5.000000e-01 : f32
    %572 = vector.broadcast %cst_217 : f32 to vector<2x1xf32>
    %573 = arith.cmpf ogt, %524, %572 : vector<2x1xf32>
    %cst_218 = arith.constant dense<0xFF800000> : vector<2x5xf32>
    %574 = vector.multi_reduction <maximumf>, %563, %cst_218 [2] : vector<2x5x5xf32> to vector<2x5xf32>
    %575 = arith.addf %574, %521 : vector<2x5xf32>
    %576 = vector.shape_cast %573 : vector<2x1xi1> to vector<2x1xi1>
    %577 = vector.broadcast %576 : vector<2x1xi1> to vector<2x5xi1>
    %578 = arith.select %577, %575, %519 : vector<2x5xi1>, vector<2x5xf32>
    %579 = vector.extract_strided_slice %382 {offsets = [0, 4, 0], sizes = [2, 1, 5], strides = [1, 1, 1]} : vector<2x8x5xf32> to vector<2x1x5xf32>
    %580 = vector.shape_cast %579 : vector<2x1x5xf32> to vector<2x5xf32>
    %581 = vector.extract_strided_slice %384 {offsets = [0, 4, 0], sizes = [2, 1, 5], strides = [1, 1, 1]} : vector<2x8x5xf32> to vector<2x1x5xf32>
    %582 = vector.shape_cast %581 : vector<2x1x5xf32> to vector<2x5xf32>
    %583 = vector.extract_strided_slice %383 {offsets = [0, 4], sizes = [2, 1], strides = [1, 1]} : vector<2x8xf32> to vector<2x1xf32>
    %cst_219 = arith.constant dense<0.000000e+00> : vector<2x5xf32>
    %584 = tpu.matmul %523, %385, %cst_219 {dimension_numbers = #tpu.dot_dimension_numbers<[1], [0], [0], [1], [0, 0, 1, 1], [], []>} : vector<2x5xf32>, vector<5x5xf32>, vector<2x5xf32> -> vector<2x5xf32>
    %585 = arith.mulf %584, %582 : vector<2x5xf32>
    %cst_220 = arith.constant dense<0.000000e+00> : vector<2xf32>
    %586 = vector.multi_reduction <add>, %585, %cst_220 [1] : vector<2x5xf32> to vector<2xf32>
    %587 = vector.shape_cast %586 : vector<2xf32> to vector<2x1xf32>
    %588 = arith.mulf %580, %582 : vector<2x5xf32>
    %cst_221 = arith.constant dense<0.000000e+00> : vector<2xf32>
    %589 = vector.multi_reduction <add>, %588, %cst_221 [1] : vector<2x5xf32> to vector<2xf32>
    %590 = vector.shape_cast %589 : vector<2xf32> to vector<2x1xf32>
    %591 = arith.addf %587, %590 : vector<2x1xf32>
    %592 = arith.mulf %583, %591 : vector<2x1xf32>
    %593 = arith.addf %534, %592 : vector<2x1xf32>
    %cst_222 = arith.constant 5.000000e-01 : f32
    %594 = vector.broadcast %cst_222 : f32 to vector<2x1xf32>
    %595 = arith.cmpf ogt, %583, %594 : vector<2x1xf32>
    %596 = vector.shape_cast %595 : vector<2x1xi1> to vector<2x1xi1>
    %597 = vector.broadcast %596 : vector<2x1xi1> to vector<2x5xi1>
    %598 = arith.select %597, %582, %539 : vector<2x5xi1>, vector<2x5xf32>
    %599 = vector.shape_cast %558 : vector<2x5xf32> to vector<2x1x5xf32>
    %600 = vector.shape_cast %386 : vector<5x5xf32> to vector<1x5x5xf32>
    %601 = vector.broadcast %599 : vector<2x1x5xf32> to vector<2x5x5xf32>
    %602 = vector.broadcast %600 : vector<1x5x5xf32> to vector<2x5x5xf32>
    %603 = arith.addf %601, %602 : vector<2x5x5xf32>
    %cst_223 = arith.constant dense<0xFF800000> : vector<2x5xf32>
    %604 = vector.multi_reduction <maximumf>, %603, %cst_223 [2] : vector<2x5x5xf32> to vector<2x5xf32>
    %605 = vector.shape_cast %604 : vector<2x5xf32> to vector<2x5x1xf32>
    %606 = vector.broadcast %605 : vector<2x5x1xf32> to vector<2x5x5xf32>
    %607 = arith.subf %603, %606 : vector<2x5x5xf32>
    %608 = math.exp %607 : vector<2x5x5xf32>
    %cst_224 = arith.constant dense<0.000000e+00> : vector<2x5xf32>
    %609 = vector.multi_reduction <add>, %608, %cst_224 [2] : vector<2x5x5xf32> to vector<2x5xf32>
    %610 = math.log %609 : vector<2x5xf32>
    %611 = arith.addf %604, %610 : vector<2x5xf32>
    %cst_225 = arith.constant 5.000000e-01 : f32
    %612 = vector.broadcast %cst_225 : f32 to vector<2x1xf32>
    %613 = arith.cmpf ogt, %583, %612 : vector<2x1xf32>
    %614 = arith.addf %611, %580 : vector<2x5xf32>
    %615 = vector.shape_cast %613 : vector<2x1xi1> to vector<2x1xi1>
    %616 = vector.broadcast %615 : vector<2x1xi1> to vector<2x5xi1>
    %617 = arith.select %616, %614, %558 : vector<2x5xi1>, vector<2x5xf32>
    %618 = vector.shape_cast %578 : vector<2x5xf32> to vector<2x1x5xf32>
    %619 = vector.shape_cast %386 : vector<5x5xf32> to vector<1x5x5xf32>
    %620 = vector.broadcast %618 : vector<2x1x5xf32> to vector<2x5x5xf32>
    %621 = vector.broadcast %619 : vector<1x5x5xf32> to vector<2x5x5xf32>
    %622 = arith.addf %620, %621 : vector<2x5x5xf32>
    %cst_226 = arith.constant dense<0xFF800000> : vector<2x5xf32>
    %623 = vector.multi_reduction <maximumf>, %622, %cst_226 [2] : vector<2x5x5xf32> to vector<2x5xf32>
    %624 = vector.shape_cast %623 : vector<2x5xf32> to vector<2x5x1xf32>
    %625 = tpu.iota {dimensions = array<i32: 2>} : vector<2x5x5xi32>
    %c5_i32_227 = arith.constant 5 : i32
    %626 = vector.broadcast %c5_i32_227 : i32 to vector<2x5x5xi32>
    %627 = vector.broadcast %624 : vector<2x5x1xf32> to vector<2x5x5xf32>
    %628 = arith.cmpf oge, %622, %627 : vector<2x5x5xf32>
    %629 = arith.select %628, %625, %626 : vector<2x5x5xi1>, vector<2x5x5xi32>
    %cst_228 = arith.constant dense<2147483647> : vector<2x5xi32>
    %630 = vector.multi_reduction <minsi>, %629, %cst_228 [2] : vector<2x5x5xi32> to vector<2x5xi32>
    %cst_229 = arith.constant 5.000000e-01 : f32
    %631 = vector.broadcast %cst_229 : f32 to vector<2x1xf32>
    %632 = arith.cmpf ogt, %583, %631 : vector<2x1xf32>
    %cst_230 = arith.constant dense<0xFF800000> : vector<2x5xf32>
    %633 = vector.multi_reduction <maximumf>, %622, %cst_230 [2] : vector<2x5x5xf32> to vector<2x5xf32>
    %634 = arith.addf %633, %580 : vector<2x5xf32>
    %635 = vector.shape_cast %632 : vector<2x1xi1> to vector<2x1xi1>
    %636 = vector.broadcast %635 : vector<2x1xi1> to vector<2x5xi1>
    %637 = arith.select %636, %634, %578 : vector<2x5xi1>, vector<2x5xf32>
    %638 = vector.extract_strided_slice %382 {offsets = [0, 5, 0], sizes = [2, 1, 5], strides = [1, 1, 1]} : vector<2x8x5xf32> to vector<2x1x5xf32>
    %639 = vector.shape_cast %638 : vector<2x1x5xf32> to vector<2x5xf32>
    %640 = vector.extract_strided_slice %384 {offsets = [0, 5, 0], sizes = [2, 1, 5], strides = [1, 1, 1]} : vector<2x8x5xf32> to vector<2x1x5xf32>
    %641 = vector.shape_cast %640 : vector<2x1x5xf32> to vector<2x5xf32>
    %642 = vector.extract_strided_slice %383 {offsets = [0, 5], sizes = [2, 1], strides = [1, 1]} : vector<2x8xf32> to vector<2x1xf32>
    %cst_231 = arith.constant dense<0.000000e+00> : vector<2x5xf32>
    %643 = tpu.matmul %582, %385, %cst_231 {dimension_numbers = #tpu.dot_dimension_numbers<[1], [0], [0], [1], [0, 0, 1, 1], [], []>} : vector<2x5xf32>, vector<5x5xf32>, vector<2x5xf32> -> vector<2x5xf32>
    %644 = arith.mulf %643, %641 : vector<2x5xf32>
    %cst_232 = arith.constant dense<0.000000e+00> : vector<2xf32>
    %645 = vector.multi_reduction <add>, %644, %cst_232 [1] : vector<2x5xf32> to vector<2xf32>
    %646 = vector.shape_cast %645 : vector<2xf32> to vector<2x1xf32>
    %647 = arith.mulf %639, %641 : vector<2x5xf32>
    %cst_233 = arith.constant dense<0.000000e+00> : vector<2xf32>
    %648 = vector.multi_reduction <add>, %647, %cst_233 [1] : vector<2x5xf32> to vector<2xf32>
    %649 = vector.shape_cast %648 : vector<2xf32> to vector<2x1xf32>
    %650 = arith.addf %646, %649 : vector<2x1xf32>
    %651 = arith.mulf %642, %650 : vector<2x1xf32>
    %652 = arith.addf %593, %651 : vector<2x1xf32>
    %cst_234 = arith.constant 5.000000e-01 : f32
    %653 = vector.broadcast %cst_234 : f32 to vector<2x1xf32>
    %654 = arith.cmpf ogt, %642, %653 : vector<2x1xf32>
    %655 = vector.shape_cast %654 : vector<2x1xi1> to vector<2x1xi1>
    %656 = vector.broadcast %655 : vector<2x1xi1> to vector<2x5xi1>
    %657 = arith.select %656, %641, %598 : vector<2x5xi1>, vector<2x5xf32>
    %658 = vector.shape_cast %617 : vector<2x5xf32> to vector<2x1x5xf32>
    %659 = vector.shape_cast %386 : vector<5x5xf32> to vector<1x5x5xf32>
    %660 = vector.broadcast %658 : vector<2x1x5xf32> to vector<2x5x5xf32>
    %661 = vector.broadcast %659 : vector<1x5x5xf32> to vector<2x5x5xf32>
    %662 = arith.addf %660, %661 : vector<2x5x5xf32>
    %cst_235 = arith.constant dense<0xFF800000> : vector<2x5xf32>
    %663 = vector.multi_reduction <maximumf>, %662, %cst_235 [2] : vector<2x5x5xf32> to vector<2x5xf32>
    %664 = vector.shape_cast %663 : vector<2x5xf32> to vector<2x5x1xf32>
    %665 = vector.broadcast %664 : vector<2x5x1xf32> to vector<2x5x5xf32>
    %666 = arith.subf %662, %665 : vector<2x5x5xf32>
    %667 = math.exp %666 : vector<2x5x5xf32>
    %cst_236 = arith.constant dense<0.000000e+00> : vector<2x5xf32>
    %668 = vector.multi_reduction <add>, %667, %cst_236 [2] : vector<2x5x5xf32> to vector<2x5xf32>
    %669 = math.log %668 : vector<2x5xf32>
    %670 = arith.addf %663, %669 : vector<2x5xf32>
    %cst_237 = arith.constant 5.000000e-01 : f32
    %671 = vector.broadcast %cst_237 : f32 to vector<2x1xf32>
    %672 = arith.cmpf ogt, %642, %671 : vector<2x1xf32>
    %673 = arith.addf %670, %639 : vector<2x5xf32>
    %674 = vector.shape_cast %672 : vector<2x1xi1> to vector<2x1xi1>
    %675 = vector.broadcast %674 : vector<2x1xi1> to vector<2x5xi1>
    %676 = arith.select %675, %673, %617 : vector<2x5xi1>, vector<2x5xf32>
    %677 = vector.shape_cast %637 : vector<2x5xf32> to vector<2x1x5xf32>
    %678 = vector.shape_cast %386 : vector<5x5xf32> to vector<1x5x5xf32>
    %679 = vector.broadcast %677 : vector<2x1x5xf32> to vector<2x5x5xf32>
    %680 = vector.broadcast %678 : vector<1x5x5xf32> to vector<2x5x5xf32>
    %681 = arith.addf %679, %680 : vector<2x5x5xf32>
    %cst_238 = arith.constant dense<0xFF800000> : vector<2x5xf32>
    %682 = vector.multi_reduction <maximumf>, %681, %cst_238 [2] : vector<2x5x5xf32> to vector<2x5xf32>
    %683 = vector.shape_cast %682 : vector<2x5xf32> to vector<2x5x1xf32>
    %684 = tpu.iota {dimensions = array<i32: 2>} : vector<2x5x5xi32>
    %c5_i32_239 = arith.constant 5 : i32
    %685 = vector.broadcast %c5_i32_239 : i32 to vector<2x5x5xi32>
    %686 = vector.broadcast %683 : vector<2x5x1xf32> to vector<2x5x5xf32>
    %687 = arith.cmpf oge, %681, %686 : vector<2x5x5xf32>
    %688 = arith.select %687, %684, %685 : vector<2x5x5xi1>, vector<2x5x5xi32>
    %cst_240 = arith.constant dense<2147483647> : vector<2x5xi32>
    %689 = vector.multi_reduction <minsi>, %688, %cst_240 [2] : vector<2x5x5xi32> to vector<2x5xi32>
    %cst_241 = arith.constant 5.000000e-01 : f32
    %690 = vector.broadcast %cst_241 : f32 to vector<2x1xf32>
    %691 = arith.cmpf ogt, %642, %690 : vector<2x1xf32>
    %cst_242 = arith.constant dense<0xFF800000> : vector<2x5xf32>
    %692 = vector.multi_reduction <maximumf>, %681, %cst_242 [2] : vector<2x5x5xf32> to vector<2x5xf32>
    %693 = arith.addf %692, %639 : vector<2x5xf32>
    %694 = vector.shape_cast %691 : vector<2x1xi1> to vector<2x1xi1>
    %695 = vector.broadcast %694 : vector<2x1xi1> to vector<2x5xi1>
    %696 = arith.select %695, %693, %637 : vector<2x5xi1>, vector<2x5xf32>
    %697 = vector.extract_strided_slice %382 {offsets = [0, 6, 0], sizes = [2, 1, 5], strides = [1, 1, 1]} : vector<2x8x5xf32> to vector<2x1x5xf32>
    %698 = vector.shape_cast %697 : vector<2x1x5xf32> to vector<2x5xf32>
    %699 = vector.extract_strided_slice %384 {offsets = [0, 6, 0], sizes = [2, 1, 5], strides = [1, 1, 1]} : vector<2x8x5xf32> to vector<2x1x5xf32>
    %700 = vector.shape_cast %699 : vector<2x1x5xf32> to vector<2x5xf32>
    %701 = vector.extract_strided_slice %383 {offsets = [0, 6], sizes = [2, 1], strides = [1, 1]} : vector<2x8xf32> to vector<2x1xf32>
    %cst_243 = arith.constant dense<0.000000e+00> : vector<2x5xf32>
    %702 = tpu.matmul %641, %385, %cst_243 {dimension_numbers = #tpu.dot_dimension_numbers<[1], [0], [0], [1], [0, 0, 1, 1], [], []>} : vector<2x5xf32>, vector<5x5xf32>, vector<2x5xf32> -> vector<2x5xf32>
    %703 = arith.mulf %702, %700 : vector<2x5xf32>
    %cst_244 = arith.constant dense<0.000000e+00> : vector<2xf32>
    %704 = vector.multi_reduction <add>, %703, %cst_244 [1] : vector<2x5xf32> to vector<2xf32>
    %705 = vector.shape_cast %704 : vector<2xf32> to vector<2x1xf32>
    %706 = arith.mulf %698, %700 : vector<2x5xf32>
    %cst_245 = arith.constant dense<0.000000e+00> : vector<2xf32>
    %707 = vector.multi_reduction <add>, %706, %cst_245 [1] : vector<2x5xf32> to vector<2xf32>
    %708 = vector.shape_cast %707 : vector<2xf32> to vector<2x1xf32>
    %709 = arith.addf %705, %708 : vector<2x1xf32>
    %710 = arith.mulf %701, %709 : vector<2x1xf32>
    %711 = arith.addf %652, %710 : vector<2x1xf32>
    %cst_246 = arith.constant 5.000000e-01 : f32
    %712 = vector.broadcast %cst_246 : f32 to vector<2x1xf32>
    %713 = arith.cmpf ogt, %701, %712 : vector<2x1xf32>
    %714 = vector.shape_cast %713 : vector<2x1xi1> to vector<2x1xi1>
    %715 = vector.broadcast %714 : vector<2x1xi1> to vector<2x5xi1>
    %716 = arith.select %715, %700, %657 : vector<2x5xi1>, vector<2x5xf32>
    %717 = vector.shape_cast %676 : vector<2x5xf32> to vector<2x1x5xf32>
    %718 = vector.shape_cast %386 : vector<5x5xf32> to vector<1x5x5xf32>
    %719 = vector.broadcast %717 : vector<2x1x5xf32> to vector<2x5x5xf32>
    %720 = vector.broadcast %718 : vector<1x5x5xf32> to vector<2x5x5xf32>
    %721 = arith.addf %719, %720 : vector<2x5x5xf32>
    %cst_247 = arith.constant dense<0xFF800000> : vector<2x5xf32>
    %722 = vector.multi_reduction <maximumf>, %721, %cst_247 [2] : vector<2x5x5xf32> to vector<2x5xf32>
    %723 = vector.shape_cast %722 : vector<2x5xf32> to vector<2x5x1xf32>
    %724 = vector.broadcast %723 : vector<2x5x1xf32> to vector<2x5x5xf32>
    %725 = arith.subf %721, %724 : vector<2x5x5xf32>
    %726 = math.exp %725 : vector<2x5x5xf32>
    %cst_248 = arith.constant dense<0.000000e+00> : vector<2x5xf32>
    %727 = vector.multi_reduction <add>, %726, %cst_248 [2] : vector<2x5x5xf32> to vector<2x5xf32>
    %728 = math.log %727 : vector<2x5xf32>
    %729 = arith.addf %722, %728 : vector<2x5xf32>
    %cst_249 = arith.constant 5.000000e-01 : f32
    %730 = vector.broadcast %cst_249 : f32 to vector<2x1xf32>
    %731 = arith.cmpf ogt, %701, %730 : vector<2x1xf32>
    %732 = arith.addf %729, %698 : vector<2x5xf32>
    %733 = vector.shape_cast %731 : vector<2x1xi1> to vector<2x1xi1>
    %734 = vector.broadcast %733 : vector<2x1xi1> to vector<2x5xi1>
    %735 = arith.select %734, %732, %676 : vector<2x5xi1>, vector<2x5xf32>
    %736 = vector.shape_cast %696 : vector<2x5xf32> to vector<2x1x5xf32>
    %737 = vector.shape_cast %386 : vector<5x5xf32> to vector<1x5x5xf32>
    %738 = vector.broadcast %736 : vector<2x1x5xf32> to vector<2x5x5xf32>
    %739 = vector.broadcast %737 : vector<1x5x5xf32> to vector<2x5x5xf32>
    %740 = arith.addf %738, %739 : vector<2x5x5xf32>
    %cst_250 = arith.constant dense<0xFF800000> : vector<2x5xf32>
    %741 = vector.multi_reduction <maximumf>, %740, %cst_250 [2] : vector<2x5x5xf32> to vector<2x5xf32>
    %742 = vector.shape_cast %741 : vector<2x5xf32> to vector<2x5x1xf32>
    %743 = tpu.iota {dimensions = array<i32: 2>} : vector<2x5x5xi32>
    %c5_i32_251 = arith.constant 5 : i32
    %744 = vector.broadcast %c5_i32_251 : i32 to vector<2x5x5xi32>
    %745 = vector.broadcast %742 : vector<2x5x1xf32> to vector<2x5x5xf32>
    %746 = arith.cmpf oge, %740, %745 : vector<2x5x5xf32>
    %747 = arith.select %746, %743, %744 : vector<2x5x5xi1>, vector<2x5x5xi32>
    %cst_252 = arith.constant dense<2147483647> : vector<2x5xi32>
    %748 = vector.multi_reduction <minsi>, %747, %cst_252 [2] : vector<2x5x5xi32> to vector<2x5xi32>
    %cst_253 = arith.constant 5.000000e-01 : f32
    %749 = vector.broadcast %cst_253 : f32 to vector<2x1xf32>
    %750 = arith.cmpf ogt, %701, %749 : vector<2x1xf32>
    %cst_254 = arith.constant dense<0xFF800000> : vector<2x5xf32>
    %751 = vector.multi_reduction <maximumf>, %740, %cst_254 [2] : vector<2x5x5xf32> to vector<2x5xf32>
    %752 = arith.addf %751, %698 : vector<2x5xf32>
    %753 = vector.shape_cast %750 : vector<2x1xi1> to vector<2x1xi1>
    %754 = vector.broadcast %753 : vector<2x1xi1> to vector<2x5xi1>
    %755 = arith.select %754, %752, %696 : vector<2x5xi1>, vector<2x5xf32>
    %756 = vector.extract_strided_slice %382 {offsets = [0, 7, 0], sizes = [2, 1, 5], strides = [1, 1, 1]} : vector<2x8x5xf32> to vector<2x1x5xf32>
    %757 = vector.shape_cast %756 : vector<2x1x5xf32> to vector<2x5xf32>
    %758 = vector.extract_strided_slice %384 {offsets = [0, 7, 0], sizes = [2, 1, 5], strides = [1, 1, 1]} : vector<2x8x5xf32> to vector<2x1x5xf32>
    %759 = vector.shape_cast %758 : vector<2x1x5xf32> to vector<2x5xf32>
    %760 = vector.extract_strided_slice %383 {offsets = [0, 7], sizes = [2, 1], strides = [1, 1]} : vector<2x8xf32> to vector<2x1xf32>
    %cst_255 = arith.constant dense<0.000000e+00> : vector<2x5xf32>
    %761 = tpu.matmul %700, %385, %cst_255 {dimension_numbers = #tpu.dot_dimension_numbers<[1], [0], [0], [1], [0, 0, 1, 1], [], []>} : vector<2x5xf32>, vector<5x5xf32>, vector<2x5xf32> -> vector<2x5xf32>
    %762 = arith.mulf %761, %759 : vector<2x5xf32>
    %cst_256 = arith.constant dense<0.000000e+00> : vector<2xf32>
    %763 = vector.multi_reduction <add>, %762, %cst_256 [1] : vector<2x5xf32> to vector<2xf32>
    %764 = vector.shape_cast %763 : vector<2xf32> to vector<2x1xf32>
    %765 = arith.mulf %757, %759 : vector<2x5xf32>
    %cst_257 = arith.constant dense<0.000000e+00> : vector<2xf32>
    %766 = vector.multi_reduction <add>, %765, %cst_257 [1] : vector<2x5xf32> to vector<2xf32>
    %767 = vector.shape_cast %766 : vector<2xf32> to vector<2x1xf32>
    %768 = arith.addf %764, %767 : vector<2x1xf32>
    %769 = arith.mulf %760, %768 : vector<2x1xf32>
    %770 = arith.addf %711, %769 : vector<2x1xf32>
    %cst_258 = arith.constant 5.000000e-01 : f32
    %771 = vector.broadcast %cst_258 : f32 to vector<2x1xf32>
    %772 = arith.cmpf ogt, %760, %771 : vector<2x1xf32>
    %773 = vector.shape_cast %772 : vector<2x1xi1> to vector<2x1xi1>
    %774 = vector.broadcast %773 : vector<2x1xi1> to vector<2x5xi1>
    %775 = arith.select %774, %759, %716 : vector<2x5xi1>, vector<2x5xf32>
    %776 = vector.shape_cast %735 : vector<2x5xf32> to vector<2x1x5xf32>
    %777 = vector.shape_cast %386 : vector<5x5xf32> to vector<1x5x5xf32>
    %778 = vector.broadcast %776 : vector<2x1x5xf32> to vector<2x5x5xf32>
    %779 = vector.broadcast %777 : vector<1x5x5xf32> to vector<2x5x5xf32>
    %780 = arith.addf %778, %779 : vector<2x5x5xf32>
    %cst_259 = arith.constant dense<0xFF800000> : vector<2x5xf32>
    %781 = vector.multi_reduction <maximumf>, %780, %cst_259 [2] : vector<2x5x5xf32> to vector<2x5xf32>
    %782 = vector.shape_cast %781 : vector<2x5xf32> to vector<2x5x1xf32>
    %783 = vector.broadcast %782 : vector<2x5x1xf32> to vector<2x5x5xf32>
    %784 = arith.subf %780, %783 : vector<2x5x5xf32>
    %785 = math.exp %784 : vector<2x5x5xf32>
    %cst_260 = arith.constant dense<0.000000e+00> : vector<2x5xf32>
    %786 = vector.multi_reduction <add>, %785, %cst_260 [2] : vector<2x5x5xf32> to vector<2x5xf32>
    %787 = math.log %786 : vector<2x5xf32>
    %788 = arith.addf %781, %787 : vector<2x5xf32>
    %cst_261 = arith.constant 5.000000e-01 : f32
    %789 = vector.broadcast %cst_261 : f32 to vector<2x1xf32>
    %790 = arith.cmpf ogt, %760, %789 : vector<2x1xf32>
    %791 = arith.addf %788, %757 : vector<2x5xf32>
    %792 = vector.shape_cast %790 : vector<2x1xi1> to vector<2x1xi1>
    %793 = vector.broadcast %792 : vector<2x1xi1> to vector<2x5xi1>
    %794 = arith.select %793, %791, %735 : vector<2x5xi1>, vector<2x5xf32>
    %795 = vector.shape_cast %755 : vector<2x5xf32> to vector<2x1x5xf32>
    %796 = vector.shape_cast %386 : vector<5x5xf32> to vector<1x5x5xf32>
    %797 = vector.broadcast %795 : vector<2x1x5xf32> to vector<2x5x5xf32>
    %798 = vector.broadcast %796 : vector<1x5x5xf32> to vector<2x5x5xf32>
    %799 = arith.addf %797, %798 : vector<2x5x5xf32>
    %cst_262 = arith.constant dense<0xFF800000> : vector<2x5xf32>
    %800 = vector.multi_reduction <maximumf>, %799, %cst_262 [2] : vector<2x5x5xf32> to vector<2x5xf32>
    %801 = vector.shape_cast %800 : vector<2x5xf32> to vector<2x5x1xf32>
    %802 = tpu.iota {dimensions = array<i32: 2>} : vector<2x5x5xi32>
    %c5_i32_263 = arith.constant 5 : i32
    %803 = vector.broadcast %c5_i32_263 : i32 to vector<2x5x5xi32>
    %804 = vector.broadcast %801 : vector<2x5x1xf32> to vector<2x5x5xf32>
    %805 = arith.cmpf oge, %799, %804 : vector<2x5x5xf32>
    %806 = arith.select %805, %802, %803 : vector<2x5x5xi1>, vector<2x5x5xi32>
    %cst_264 = arith.constant dense<2147483647> : vector<2x5xi32>
    %807 = vector.multi_reduction <minsi>, %806, %cst_264 [2] : vector<2x5x5xi32> to vector<2x5xi32>
    %cst_265 = arith.constant 5.000000e-01 : f32
    %808 = vector.broadcast %cst_265 : f32 to vector<2x1xf32>
    %809 = arith.cmpf ogt, %760, %808 : vector<2x1xf32>
    %cst_266 = arith.constant dense<0xFF800000> : vector<2x5xf32>
    %810 = vector.multi_reduction <maximumf>, %799, %cst_266 [2] : vector<2x5x5xf32> to vector<2x5xf32>
    %811 = arith.addf %810, %757 : vector<2x5xf32>
    %812 = vector.shape_cast %809 : vector<2x1xi1> to vector<2x1xi1>
    %813 = vector.broadcast %812 : vector<2x1xi1> to vector<2x5xi1>
    %814 = arith.select %813, %811, %755 : vector<2x5xi1>, vector<2x5xf32>
    %815 = vector.broadcast %388 : vector<1x5xf32> to vector<2x5xf32>
    %816 = arith.mulf %775, %815 : vector<2x5xf32>
    %cst_267 = arith.constant dense<0.000000e+00> : vector<2xf32>
    %817 = vector.multi_reduction <add>, %816, %cst_267 [1] : vector<2x5xf32> to vector<2xf32>
    %818 = vector.shape_cast %817 : vector<2xf32> to vector<2x1xf32>
    %819 = arith.addf %770, %818 : vector<2x1xf32>
    %820 = vector.broadcast %388 : vector<1x5xf32> to vector<2x5xf32>
    %821 = arith.addf %794, %820 : vector<2x5xf32>
    %cst_268 = arith.constant dense<0xFF800000> : vector<2xf32>
    %822 = vector.multi_reduction <maximumf>, %821, %cst_268 [1] : vector<2x5xf32> to vector<2xf32>
    %823 = vector.shape_cast %822 : vector<2xf32> to vector<2x1xf32>
    %824 = vector.broadcast %823 : vector<2x1xf32> to vector<2x5xf32>
    %825 = arith.subf %821, %824 : vector<2x5xf32>
    %826 = math.exp %825 : vector<2x5xf32>
    %cst_269 = arith.constant dense<0.000000e+00> : vector<2xf32>
    %827 = vector.multi_reduction <add>, %826, %cst_269 [1] : vector<2x5xf32> to vector<2xf32>
    %828 = vector.shape_cast %827 : vector<2xf32> to vector<2x1xf32>
    %829 = math.log %828 : vector<2x1xf32>
    %830 = arith.addf %823, %829 : vector<2x1xf32>
    %831 = arith.subf %819, %830 : vector<2x1xf32>
    %832 = vector.shape_cast %831 : vector<2x1xf32> to vector<1x2x1xf32>
    %cst_270 = arith.constant dense<0.000000e+00> : vector<1xf32>
    %833 = vector.multi_reduction <add>, %832, %cst_270 [1, 2] : vector<1x2x1xf32> to vector<1xf32>
    %834 = vector.shape_cast %833 : vector<1xf32> to vector<1x1x1xf32>
    %835 = vector.extract %834[0, 0, 0] : f32 from vector<1x1x1xf32>
    %836 = vector.broadcast %835 : f32 to vector<1x1xf32>
    %cst_271 = arith.constant 0.000000e+00 : f32
    %837 = vector.broadcast %cst_271 : f32 to vector<1x1xf32>
    %838 = arith.subf %837, %836 : vector<1x1xf32>
    %c0_272 = arith.constant 0 : index
    %c0_273 = arith.constant 0 : index
    %839 = vector.load %arg25[%c0_272, %c0_273] : memref<1x1xf32, #tpu.memory_space<vmem>>, vector<1x1xf32>
    tpu.vector_store %arg25[%c0_272, %c0_273], %838 {strides = array<i32>} : memref<1x1xf32, #tpu.memory_space<vmem>>, vector<1x1xf32>,
    %cst_274 = arith.constant dense<0.000000e+00> : vector<2xf32>
    %840 = vector.multi_reduction <add>, %383, %cst_274 [1] : vector<2x8xf32> to vector<2xf32>
    %841 = vector.shape_cast %840 : vector<2xf32> to vector<2x1xf32>
    %842 = vector.broadcast %388 : vector<1x5xf32> to vector<2x5xf32>
    %843 = arith.addf %814, %842 : vector<2x5xf32>
    %cst_275 = arith.constant dense<0xFF800000> : vector<2xf32>
    %844 = vector.multi_reduction <maximumf>, %843, %cst_275 [1] : vector<2x5xf32> to vector<2xf32>
    %845 = vector.shape_cast %844 : vector<2xf32> to vector<2x1xf32>
    %846 = tpu.iota {dimensions = array<i32: 1>} : vector<2x5xi32>
    %c5_i32_276 = arith.constant 5 : i32
    %847 = vector.broadcast %c5_i32_276 : i32 to vector<2x5xi32>
    %848 = vector.broadcast %845 : vector<2x1xf32> to vector<2x5xf32>
    %849 = arith.cmpf oge, %843, %848 : vector<2x5xf32>
    %850 = arith.select %849, %846, %847 : vector<2x5xi1>, vector<2x5xi32>
    %cst_277 = arith.constant dense<2147483647> : vector<2xi32>
    %851 = vector.multi_reduction <minsi>, %850, %cst_277 [1] : vector<2x5xi32> to vector<2xi32>
    %852 = vector.shape_cast %851 : vector<2xi32> to vector<2x1xi32>
    %853 = tpu.iota {dimensions = array<i32: 1>} : vector<2x5xi32>
    %854 = tpu.iota {dimensions = array<i32: 1>} : vector<2x8xi32>
    %c-1_i32 = arith.constant -1 : i32
    %855 = vector.broadcast %c-1_i32 : i32 to vector<2x1xi32>
    %c0_i32 = arith.constant 0 : i32
    %856 = vector.broadcast %c0_i32 : i32 to vector<2x8xi32>
    %cst_278 = arith.constant 7.000000e+00 : f32
    %857 = vector.broadcast %cst_278 : f32 to vector<2x1xf32>
    %858 = arith.cmpf ogt, %841, %857 : vector<2x1xf32>
    %c7_i32 = arith.constant 7 : i32
    %859 = vector.broadcast %c7_i32 : i32 to vector<2x8xi32>
    %860 = arith.cmpi eq, %854, %859 : vector<2x8xi32>
    %861 = arith.select %858, %852, %855 : vector<2x1xi1>, vector<2x1xi32>
    %862 = vector.shape_cast %861 : vector<2x1xi32> to vector<2x1xi32>
    %863 = vector.broadcast %862 : vector<2x1xi32> to vector<2x8xi32>
    %864 = arith.select %860, %863, %856 : vector<2x8xi1>, vector<2x8xi32>
    %865 = vector.broadcast %852 : vector<2x1xi32> to vector<2x5xi32>
    %866 = arith.cmpi eq, %853, %865 : vector<2x5xi32>
    %c0_i32_279 = arith.constant 0 : i32
    %867 = vector.broadcast %c0_i32_279 : i32 to vector<2x5xi32>
    %868 = arith.select %866, %807, %867 : vector<2x5xi1>, vector<2x5xi32>
    %cst_280 = arith.constant dense<0> : vector<2xi32>
    %869 = vector.multi_reduction <add>, %868, %cst_280 [1] : vector<2x5xi32> to vector<2xi32>
    %870 = vector.shape_cast %869 : vector<2xi32> to vector<2x1xi32>
    %871 = vector.extract_strided_slice %383 {offsets = [0, 7], sizes = [2, 1], strides = [1, 1]} : vector<2x8xf32> to vector<2x1xf32>
    %cst_281 = arith.constant 5.000000e-01 : f32
    %872 = vector.broadcast %cst_281 : f32 to vector<2x1xf32>
    %873 = arith.cmpf ogt, %871, %872 : vector<2x1xf32>
    %874 = arith.select %873, %870, %852 : vector<2x1xi1>, vector<2x1xi32>
    %cst_282 = arith.constant 6.000000e+00 : f32
    %875 = vector.broadcast %cst_282 : f32 to vector<2x1xf32>
    %876 = arith.cmpf ogt, %841, %875 : vector<2x1xf32>
    %c6_i32 = arith.constant 6 : i32
    %877 = vector.broadcast %c6_i32 : i32 to vector<2x8xi32>
    %878 = arith.cmpi eq, %854, %877 : vector<2x8xi32>
    %879 = arith.select %876, %874, %855 : vector<2x1xi1>, vector<2x1xi32>
    %880 = vector.shape_cast %879 : vector<2x1xi32> to vector<2x1xi32>
    %881 = vector.broadcast %880 : vector<2x1xi32> to vector<2x8xi32>
    %882 = arith.select %878, %881, %864 : vector<2x8xi1>, vector<2x8xi32>
    %883 = vector.broadcast %874 : vector<2x1xi32> to vector<2x5xi32>
    %884 = arith.cmpi eq, %853, %883 : vector<2x5xi32>
    %c0_i32_283 = arith.constant 0 : i32
    %885 = vector.broadcast %c0_i32_283 : i32 to vector<2x5xi32>
    %886 = arith.select %884, %748, %885 : vector<2x5xi1>, vector<2x5xi32>
    %cst_284 = arith.constant dense<0> : vector<2xi32>
    %887 = vector.multi_reduction <add>, %886, %cst_284 [1] : vector<2x5xi32> to vector<2xi32>
    %888 = vector.shape_cast %887 : vector<2xi32> to vector<2x1xi32>
    %889 = vector.extract_strided_slice %383 {offsets = [0, 6], sizes = [2, 1], strides = [1, 1]} : vector<2x8xf32> to vector<2x1xf32>
    %cst_285 = arith.constant 5.000000e-01 : f32
    %890 = vector.broadcast %cst_285 : f32 to vector<2x1xf32>
    %891 = arith.cmpf ogt, %889, %890 : vector<2x1xf32>
    %892 = arith.select %891, %888, %874 : vector<2x1xi1>, vector<2x1xi32>
    %cst_286 = arith.constant 5.000000e+00 : f32
    %893 = vector.broadcast %cst_286 : f32 to vector<2x1xf32>
    %894 = arith.cmpf ogt, %841, %893 : vector<2x1xf32>
    %c5_i32_287 = arith.constant 5 : i32
    %895 = vector.broadcast %c5_i32_287 : i32 to vector<2x8xi32>
    %896 = arith.cmpi eq, %854, %895 : vector<2x8xi32>
    %897 = arith.select %894, %892, %855 : vector<2x1xi1>, vector<2x1xi32>
    %898 = vector.shape_cast %897 : vector<2x1xi32> to vector<2x1xi32>
    %899 = vector.broadcast %898 : vector<2x1xi32> to vector<2x8xi32>
    %900 = arith.select %896, %899, %882 : vector<2x8xi1>, vector<2x8xi32>
    %901 = vector.broadcast %892 : vector<2x1xi32> to vector<2x5xi32>
    %902 = arith.cmpi eq, %853, %901 : vector<2x5xi32>
    %c0_i32_288 = arith.constant 0 : i32
    %903 = vector.broadcast %c0_i32_288 : i32 to vector<2x5xi32>
    %904 = arith.select %902, %689, %903 : vector<2x5xi1>, vector<2x5xi32>
    %cst_289 = arith.constant dense<0> : vector<2xi32>
    %905 = vector.multi_reduction <add>, %904, %cst_289 [1] : vector<2x5xi32> to vector<2xi32>
    %906 = vector.shape_cast %905 : vector<2xi32> to vector<2x1xi32>
    %907 = vector.extract_strided_slice %383 {offsets = [0, 5], sizes = [2, 1], strides = [1, 1]} : vector<2x8xf32> to vector<2x1xf32>
    %cst_290 = arith.constant 5.000000e-01 : f32
    %908 = vector.broadcast %cst_290 : f32 to vector<2x1xf32>
    %909 = arith.cmpf ogt, %907, %908 : vector<2x1xf32>
    %910 = arith.select %909, %906, %892 : vector<2x1xi1>, vector<2x1xi32>
    %cst_291 = arith.constant 4.000000e+00 : f32
    %911 = vector.broadcast %cst_291 : f32 to vector<2x1xf32>
    %912 = arith.cmpf ogt, %841, %911 : vector<2x1xf32>
    %c4_i32 = arith.constant 4 : i32
    %913 = vector.broadcast %c4_i32 : i32 to vector<2x8xi32>
    %914 = arith.cmpi eq, %854, %913 : vector<2x8xi32>
    %915 = arith.select %912, %910, %855 : vector<2x1xi1>, vector<2x1xi32>
    %916 = vector.shape_cast %915 : vector<2x1xi32> to vector<2x1xi32>
    %917 = vector.broadcast %916 : vector<2x1xi32> to vector<2x8xi32>
    %918 = arith.select %914, %917, %900 : vector<2x8xi1>, vector<2x8xi32>
    %919 = vector.broadcast %910 : vector<2x1xi32> to vector<2x5xi32>
    %920 = arith.cmpi eq, %853, %919 : vector<2x5xi32>
    %c0_i32_292 = arith.constant 0 : i32
    %921 = vector.broadcast %c0_i32_292 : i32 to vector<2x5xi32>
    %922 = arith.select %920, %630, %921 : vector<2x5xi1>, vector<2x5xi32>
    %cst_293 = arith.constant dense<0> : vector<2xi32>
    %923 = vector.multi_reduction <add>, %922, %cst_293 [1] : vector<2x5xi32> to vector<2xi32>
    %924 = vector.shape_cast %923 : vector<2xi32> to vector<2x1xi32>
    %925 = vector.extract_strided_slice %383 {offsets = [0, 4], sizes = [2, 1], strides = [1, 1]} : vector<2x8xf32> to vector<2x1xf32>
    %cst_294 = arith.constant 5.000000e-01 : f32
    %926 = vector.broadcast %cst_294 : f32 to vector<2x1xf32>
    %927 = arith.cmpf ogt, %925, %926 : vector<2x1xf32>
    %928 = arith.select %927, %924, %910 : vector<2x1xi1>, vector<2x1xi32>
    %cst_295 = arith.constant 3.000000e+00 : f32
    %929 = vector.broadcast %cst_295 : f32 to vector<2x1xf32>
    %930 = arith.cmpf ogt, %841, %929 : vector<2x1xf32>
    %c3_i32 = arith.constant 3 : i32
    %931 = vector.broadcast %c3_i32 : i32 to vector<2x8xi32>
    %932 = arith.cmpi eq, %854, %931 : vector<2x8xi32>
    %933 = arith.select %930, %928, %855 : vector<2x1xi1>, vector<2x1xi32>
    %934 = vector.shape_cast %933 : vector<2x1xi32> to vector<2x1xi32>
    %935 = vector.broadcast %934 : vector<2x1xi32> to vector<2x8xi32>
    %936 = arith.select %932, %935, %918 : vector<2x8xi1>, vector<2x8xi32>
    %937 = vector.broadcast %928 : vector<2x1xi32> to vector<2x5xi32>
    %938 = arith.cmpi eq, %853, %937 : vector<2x5xi32>
    %c0_i32_296 = arith.constant 0 : i32
    %939 = vector.broadcast %c0_i32_296 : i32 to vector<2x5xi32>
    %940 = arith.select %938, %571, %939 : vector<2x5xi1>, vector<2x5xi32>
    %cst_297 = arith.constant dense<0> : vector<2xi32>
    %941 = vector.multi_reduction <add>, %940, %cst_297 [1] : vector<2x5xi32> to vector<2xi32>
    %942 = vector.shape_cast %941 : vector<2xi32> to vector<2x1xi32>
    %943 = vector.extract_strided_slice %383 {offsets = [0, 3], sizes = [2, 1], strides = [1, 1]} : vector<2x8xf32> to vector<2x1xf32>
    %cst_298 = arith.constant 5.000000e-01 : f32
    %944 = vector.broadcast %cst_298 : f32 to vector<2x1xf32>
    %945 = arith.cmpf ogt, %943, %944 : vector<2x1xf32>
    %946 = arith.select %945, %942, %928 : vector<2x1xi1>, vector<2x1xi32>
    %cst_299 = arith.constant 2.000000e+00 : f32
    %947 = vector.broadcast %cst_299 : f32 to vector<2x1xf32>
    %948 = arith.cmpf ogt, %841, %947 : vector<2x1xf32>
    %c2_i32 = arith.constant 2 : i32
    %949 = vector.broadcast %c2_i32 : i32 to vector<2x8xi32>
    %950 = arith.cmpi eq, %854, %949 : vector<2x8xi32>
    %951 = arith.select %948, %946, %855 : vector<2x1xi1>, vector<2x1xi32>
    %952 = vector.shape_cast %951 : vector<2x1xi32> to vector<2x1xi32>
    %953 = vector.broadcast %952 : vector<2x1xi32> to vector<2x8xi32>
    %954 = arith.select %950, %953, %936 : vector<2x8xi1>, vector<2x8xi32>
    %955 = vector.broadcast %946 : vector<2x1xi32> to vector<2x5xi32>
    %956 = arith.cmpi eq, %853, %955 : vector<2x5xi32>
    %c0_i32_300 = arith.constant 0 : i32
    %957 = vector.broadcast %c0_i32_300 : i32 to vector<2x5xi32>
    %958 = arith.select %956, %512, %957 : vector<2x5xi1>, vector<2x5xi32>
    %cst_301 = arith.constant dense<0> : vector<2xi32>
    %959 = vector.multi_reduction <add>, %958, %cst_301 [1] : vector<2x5xi32> to vector<2xi32>
    %960 = vector.shape_cast %959 : vector<2xi32> to vector<2x1xi32>
    %961 = vector.extract_strided_slice %383 {offsets = [0, 2], sizes = [2, 1], strides = [1, 1]} : vector<2x8xf32> to vector<2x1xf32>
    %cst_302 = arith.constant 5.000000e-01 : f32
    %962 = vector.broadcast %cst_302 : f32 to vector<2x1xf32>
    %963 = arith.cmpf ogt, %961, %962 : vector<2x1xf32>
    %964 = arith.select %963, %960, %946 : vector<2x1xi1>, vector<2x1xi32>
    %cst_303 = arith.constant 1.000000e+00 : f32
    %965 = vector.broadcast %cst_303 : f32 to vector<2x1xf32>
    %966 = arith.cmpf ogt, %841, %965 : vector<2x1xf32>
    %c1_i32 = arith.constant 1 : i32
    %967 = vector.broadcast %c1_i32 : i32 to vector<2x8xi32>
    %968 = arith.cmpi eq, %854, %967 : vector<2x8xi32>
    %969 = arith.select %966, %964, %855 : vector<2x1xi1>, vector<2x1xi32>
    %970 = vector.shape_cast %969 : vector<2x1xi32> to vector<2x1xi32>
    %971 = vector.broadcast %970 : vector<2x1xi32> to vector<2x8xi32>
    %972 = arith.select %968, %971, %954 : vector<2x8xi1>, vector<2x8xi32>
    %973 = vector.broadcast %964 : vector<2x1xi32> to vector<2x5xi32>
    %974 = arith.cmpi eq, %853, %973 : vector<2x5xi32>
    %c0_i32_304 = arith.constant 0 : i32
    %975 = vector.broadcast %c0_i32_304 : i32 to vector<2x5xi32>
    %976 = arith.select %974, %453, %975 : vector<2x5xi1>, vector<2x5xi32>
    %cst_305 = arith.constant dense<0> : vector<2xi32>
    %977 = vector.multi_reduction <add>, %976, %cst_305 [1] : vector<2x5xi32> to vector<2xi32>
    %978 = vector.shape_cast %977 : vector<2xi32> to vector<2x1xi32>
    %979 = vector.extract_strided_slice %383 {offsets = [0, 1], sizes = [2, 1], strides = [1, 1]} : vector<2x8xf32> to vector<2x1xf32>
    %cst_306 = arith.constant 5.000000e-01 : f32
    %980 = vector.broadcast %cst_306 : f32 to vector<2x1xf32>
    %981 = arith.cmpf ogt, %979, %980 : vector<2x1xf32>
    %982 = arith.select %981, %978, %964 : vector<2x1xi1>, vector<2x1xi32>
    %c0_i32_307 = arith.constant 0 : i32
    %983 = vector.broadcast %c0_i32_307 : i32 to vector<2x8xi32>
    %984 = arith.cmpi eq, %854, %983 : vector<2x8xi32>
    %985 = vector.shape_cast %982 : vector<2x1xi32> to vector<2x1xi32>
    %986 = vector.broadcast %985 : vector<2x1xi32> to vector<2x8xi32>
    %987 = arith.select %984, %986, %972 : vector<2x8xi1>, vector<2x8xi32>
    %c0_308 = arith.constant 0 : index
    %c0_309 = arith.constant 0 : index
    %988 = vector.load %arg26[%c0_308, %c0_309] : memref<2x8xi32, #tpu.memory_space<vmem>>, vector<2x8xi32>
    tpu.vector_store %arg26[%c0_308, %c0_309], %987 {strides = array<i32>} : memref<2x8xi32, #tpu.memory_space<vmem>>, vector<2x8xi32>,
    return
  }
}

</mosaic_0001>

<bundles_post_ra>
// kernel: _lambda_.1
= control target key start
LH: loop header
LB: loop body
LE: loop exit
PB: predicated region body
PF: predicated region fallthrough
CT: control target
= control target key end

     0   :  { %s6938_s0 = inlined_call_operand.vmem [shape: f32[16,32], index: 0, kind: input, shape index: {}]   ;;  %s6939_s1 = inlined_call_operand.vmem [shape: f32[2,1,8], index: 1, kind: input, shape index: {}]   ;;  %s6940_s2 = inlined_call_operand.vmem [shape: f32[1,32], index: 2, kind: input, shape index: {}]   ;;  %s6941_s3 = inlined_call_operand.vmem [shape: f32[1,32], index: 3, kind: input, shape index: {}]   ;;  %s6942_s4 = inlined_call_operand.vmem [shape: bf16[2,32,96], index: 4, kind: input, shape index: {}]   ;;  %s6943_s5 = inlined_call_operand.vmem [shape: f32[2,1,96], index: 5, kind: input, shape index: {}]   ;;  %s6944_s6 = inlined_call_operand.vmem [shape: bf16[2,32,32], index: 6, kind: input, shape index: {}]   ;;  %s6945_s7 = inlined_call_operand.vmem [shape: f32[2,1,32], index: 7, kind: input, shape index: {}]   ;;  %s6946_s8 = inlined_call_operand.vmem [shape: f32[2,1,32], index: 8, kind: input, shape index: {}]   ;;  %s6947_s9 = inlined_call_operand.vmem [shape: f32[2,1,32], index: 9, kind: input, shape index: {}]   ;;  %s6948_s10 = inlined_call_operand.vmem [shape: bf16[2,32,64], index: 10, kind: input, shape index: {}]   ;;  %s6949_s11 = inlined_call_operand.vmem [shape: f32[2,1,64], index: 11, kind: input, shape index: {}]   ;;  %s6950_s12 = inlined_call_operand.vmem [shape: bf16[2,64,32], index: 12, kind: input, shape index: {}]   ;;  %s6951_s13 = inlined_call_operand.vmem [shape: f32[2,1,32], index: 13, kind: input, shape index: {}]   ;;  %s6952_s14 = inlined_call_operand.vmem [shape: f32[2,1,32], index: 14, kind: input, shape index: {}]   ;;  %s6953_s15 = inlined_call_operand.vmem [shape: f32[2,1,32], index: 15, kind: input, shape index: {}]   ;;  %s6954_s16 = inlined_call_operand.vmem [shape: f32[2,8,8], index: 16, kind: input, shape index: {}]   ;;  %s6955_s17 = inlined_call_operand.vmem [shape: f32[2,8], index: 17, kind: input, shape index: {}]   ;;  %s6956_s18 = inlined_call_operand.vmem [shape: f32[2,8,5], index: 18, kind: input, shape index: {}]   ;;  %s6957_s19 = inlined_call_operand.vmem [shape: bf16[32,5], index: 19, kind: input, shape index: {}]   ;;  %s6958_s20 = inlined_call_operand.vmem [shape: f32[1,5], index: 20, kind: input, shape index: {}]   ;;  %s6959_s21 = inlined_call_operand.vmem [shape: f32[5,5], index: 21, kind: input, shape index: {}]   ;;  %s6960_s22 = inlined_call_operand.vmem [shape: f32[5,5], index: 22, kind: input, shape index: {}]   ;;  %s6961_s23 = inlined_call_operand.vmem [shape: f32[1,5], index: 23, kind: input, shape index: {}]   ;;  %s6962_s24 = inlined_call_operand.vmem [shape: f32[1,5], index: 24, kind: input, shape index: {}]   ;;  %s6963_s25 = inlined_call_operand.hbm [shape: f32[1,1], index: 25, kind: output, shape index: {0}]   ;;  %s6964_s26 = inlined_call_operand.hbm [shape: s32[2,8], index: 26, kind: output, shape index: {1}]  }
   0x1   :  { %7012 = sst [smem:[#allocation20_spill]] %s6938_s0 }
   0x2   :  { %7013 = sst [smem:[#allocation21_spill]] %s6939_s1 }
   0x3   :  { %7014 = sst [smem:[#allocation22_spill]] %s6940_s2 }
   0x4   :  { %7015 = sst [smem:[#allocation23_spill]] %s6941_s3 }
   0x5   :  { %7016 = sst [smem:[#allocation24_spill]] %s6942_s4 }
   0x6   :  { %7017 = sst [smem:[#allocation25_spill]] %s6943_s5 }
   0x7   :  { %7018 = sst [smem:[#allocation26_spill]] %s6944_s6 }
   0x8   :  { %7019 = sst [smem:[#allocation27_spill]] %s6945_s7 }
   0x9   :  { %7020 = sst [smem:[#allocation28_spill]] %s6946_s8 }
   0xa   :  { %7021 = sst [smem:[#allocation29_spill]] %s6947_s9 }
   0xb   :  { %7022 = sst [smem:[#allocation30_spill]] %s6948_s10 }
   0xc   :  { %32 = vsyncpa [#allocation3], 0  ;;  %s7023_s7 = sld [smem:[#allocation20_spill]]  ;;  %vm91_vm0 = vcmask 261120  }
  0x12   :  { %v87_v0 = vld [vmem:[%s7023_s7] sm:$0xff]  ;;  %v88_v1 = vld [vmem:[%s7023_s7 + $0x8] sm:$0xff] }
  0x13   :  { %v92_v2 = vsel %vm91_vm0, %v87_v0, 0.0  ;;  %v95_v3 = vsel %vm91_vm0, %v88_v1, 0.0 }
  0x14   :  { %93 = vadd.xlane.f32.xlu0 %v92_v2 }
  0x18   :  { %96 = vadd.xlane.f32.xlu0 %v95_v3 }
  0x19   :  { %33 = vsyncpa [#allocation5], 0  ;;  %s7024_s0 = sld [smem:[#allocation24_spill]]  ;;  %v6991_v15 = vmov 0.0   ;;  %vm5300_vm1 = vmmov 0   ;;  %s5301_s8 = smov 96  }
  0x1a   :  { %4804 = vmatprep.subr.bf16.mxu0 %v6991_v15  ;;  %4808 = vmatprep.mubr.msk.bf16.mxu0 %vm5300_vm1, %v6991_v15  ;;  %s7025_s10 = sld [smem:[#allocation22_spill]]  ;;  %vm208_vm2 = vcmask 130048   ;;  %vm320_vm3 = vcmask 64512   ;;  %s6981_s5 = smov 64   ;;  %vm350_vm4 = vcmask 1043456   ;;  %vm952_vm7 = vcmask 523264  }
  0x1b   :  { %4812 = vmatprep.subr.bf16.mxu1 %v6991_v15  ;;  %4814 = vmatprep.mubr.msk.bf16.mxu1 %vm5300_vm1, %v6991_v15  ;;  %s7026_s27 = sld [smem:[#allocation23_spill]]  ;;  %s6977_s6 = smov 112   ;;  %vm2179_vm10 = vcmask 1041409   ;;  %vm2540_vm11 = vcmask 1043459   ;;  %vm3732_vm12 = vcmask 1047559   ;;  %vm2838_vm13 = vcmask 1044484  }
  0x1c   :  { %s7027_s28 = sld [smem:[#allocation25_spill]]  ;;  %s6975_s1 = smov 48   ;;  %vm3136_vm14 = vcmask 1045509   ;;  %vm3434_vm15 = vcmask 1046534  }
  0x1d   :  { %s7028_s9 = sld [smem:[#allocation21_spill]]  ;;  %s7036_s3 = smov 112  }
  0x1e   :  { %s7029_s7 = sld [smem:[#allocation26_spill]]  ;;  %s7037_s4 = smov 48  }
  0x1f   :  { %v5100_v14 = vld [vmem:[%s7024_s0 + $0x8] sm:$0xff]   ;;  %v5101_v16 = vld [vmem:[%s7024_s0] sm:$0xff]   ;;  %s7031_s29 = sld [smem:[#allocation30_spill]]  ;;  %s5323_s2 = smov 126  }
  0x20   :  { %4805 = vmatpush3.bf16.msra.mxu0 %v5100_v14  ;;  %v4609_v25 = vld [vmem:[%s7025_s10] ss:$0 sm:$0xff]  ;;  %s6979_s10 = smov 80  }
  0x21   :  { %4806 = vmatprep.subr.bf16.mxu0 %v6991_v15  ;;  %v4610_v29 = vld [vmem:[%s7026_s27] ss:$0 sm:$0xff]  ;;  %s7030_s27 = sld [smem:[#allocation27_spill]] }
  0x22   :  { %v4611_v34 = vld [vmem:[%s7027_s28] ss:$0 sm:$0xff] }
  0x23   :  { %v5531_v48 = vld [vmem:[%s7028_s9] ss:$0 sm:$0xff]  ;;  %v5537_v54 = vld [vmem:[%s7028_s9 + $0x1] ss:$0 sm:$0xff]  ;;  %s6974_s9 = smov 16  }
  0x24   :  { %4807 = vmatpush3.bf16.msra.mxu0 %v5101_v16 }
  0x25   :  { %4818 = vmatprep.subr.bf16.mxu0 %v6991_v15 }
  0x9d   :  { %v94_v4 = vpop.xlane.xlu0 %93 }
  0x9e   :  { %v99_v5 = vmul.f32 0.03125, %v94_v4 }
  0xa0   :  { %v101_v6 = vsub.f32 %v87_v0, %v99_v5 }
  0xa1   :  { %v97_v7 = vpop.xlane.xlu0 %96 }
  0xa2   :  { %v100_v8 = vmul.f32 0.03125, %v97_v7  ;;  %v103_v9 = vmul.f32 %v101_v6, %v101_v6 }
  0xa4   :  { %v102_v10 = vsub.f32 %v88_v1, %v100_v8  ;;  %v105_v11 = vsel %vm91_vm0, %v103_v9, 0.0 }
  0xa5   :  { %106 = vadd.xlane.f32.xlu1 %v105_v11 }
  0xa6   :  { %v104_v12 = vmul.f32 %v102_v10, %v102_v10 }
  0xa8   :  { %v108_v13 = vsel %vm91_vm0, %v104_v12, 0.0 }
  0xa9   :  { %109 = vadd.xlane.f32.xlu1 %v108_v13 }
 0x12e   :  { %v107_v17 = vpop.xlane.xlu1 %106 }
 0x12f   :  { %v111_v18 = vmul.f32 0.03125, %v107_v17 }
 0x131   :  { %v113_v19 = vadd.f32 1e-12, %v111_v18 }
 0x132   :  { %v110_v20 = vpop.xlane.xlu1 %109 }
 0x133   :  { %5122 = vrsqrt.f32 %v113_v19  ;;  %v112_v21 = vmul.f32 0.03125, %v110_v20 }
 0x135   :  { %v114_v22 = vadd.f32 1e-12, %v112_v21 }
 0x137   :  { %5124 = vrsqrt.f32 %v114_v22 }
 0x140   :  { %v5123_v23 = vpop.eup %5122 }
 0x141   :  { %v117_v24 = vmul.f32 %v5123_v23, %v101_v6 }
 0x143   :  { %v125_v28 = vmul.f32 %v4609_v25, %v117_v24 }
 0x144   :  { %v5125_v26 = vpop.eup %5124 }
 0x145   :  { %v118_v27 = vmul.f32 %v5125_v26, %v102_v10  ;;  %v5496_v31 = vadd.f32 %v4610_v29, %v125_v28 }
 0x147   :  { %v126_v30 = vmul.f32 %v4609_v25, %v118_v27 }
 0x149   :  { %v5498_v32 = vadd.f32 %v4610_v29, %v126_v30 }
 0x14b   :  { %v135_v33 = vpack.c.bf16 %v5498_v32, %v5496_v31 }
 0x14d   :  { %4809 = vmatmul.mubr.msk.bf16.vlgmr.msra.gmra.mxu0 %vm91_vm0, %v135_v33 }
 0x14e   :  { %4820 = vmatprep.mubr.msk.bf16.mxu0 %vm5300_vm1, %v6991_v15 }
 0x20d   :  { %v196_v35 = vpop.f32.mrf.mxu0 }
 0x20e   :  { %v197_v36 = vadd.f32 %v4611_v34, %v196_v35 }
 0x20f   :  { %v4810_v37 = vpop.f32.mrf.mxu0 }
 0x210   :  { %v5508_v38 = vpack.c.bf16 %v197_v36, %v197_v36 }
 0x211   :  { %v199_v39 = vpop.f32.mrf.mxu0 }
 0x212   :  { %v200_v40 = vadd.f32 %v4611_v34, %v199_v39  ;;  %206 = vrot.lane.b32.xlu0 %v5508_v38, %s5301_s8 }
 0x213   :  { %v4811_v41 = vpop.f32.mrf.mxu0 }
 0x214   :  { %v5512_v42 = vpack.c.bf16 %v200_v40, %v200_v40 }
 0x216   :  { %256 = vrot.lane.b32.xlu1 %v5512_v42, %s5301_s8 }
 0x284   :  { %v207_v43 = vpop.permute.xlu0 %206 }
 0x285   :  { %v213_v44 = vsel %vm208_vm2, %v207_v43, 0 }
 0x286   :  { %4813 = vmatpush3.bf16.xpose.msra.mxu1 %v213_v44 }
 0x287   :  { %4824 = vmatprep.subr.bf16.mxu1 %v6991_v15 }
 0x288   :  { %v257_v45 = vpop.permute.xlu1 %256 }
 0x289   :  { %v262_v46 = vsel %vm208_vm2, %v257_v45, 0 }
 0x28a   :  { %4819 = vmatpush3.bf16.xpose.msra.mxu0 %v262_v46 }
 0x28b   :  { %4830 = vmatprep.subr.bf16.mxu0 %v6991_v15 }
 0x28d   :  { %4815 = vmatmul.mubr.msk.bf16.vlgmr.msra.gmra.mxu1 %vm208_vm2, %v5508_v38 }
 0x28e   :  { %4826 = vmatprep.mubr.msk.bf16.mxu1 %vm5300_vm1, %v6991_v15 }
 0x291   :  { %4821 = vmatmul.mubr.msk.bf16.vlgmr.msra.gmra.mxu0 %vm208_vm2, %v5512_v42 }
 0x292   :  { %4832 = vmatprep.mubr.msk.bf16.mxu0 %vm5300_vm1, %v6991_v15 }
 0x34d   :  { %v249_v47 = vpop.f32.mrf.mxu1 }
 0x34e   :  { %v304_v49 = vmul.f32 0.25, %v249_v47 }
 0x34f   :  { %v4816_v50 = vpop.f32.mrf.mxu1 }
 0x350   :  { %v318_v51 = vadd.f32 %v5531_v48, %v304_v49 }
 0x351   :  { %v252_v52 = vpop.f32.mrf.mxu1  ;;  %v298_v53 = vpop.f32.mrf.mxu0 }
 0x352   :  { %v305_v55 = vmul.f32 0.25, %v298_v53  ;;  %v321_v56 = vsel %vm320_vm3, %v318_v51, -inf }
 0x353   :  { %v4817_v57 = vpop.f32.mrf.mxu1  ;;  %v4822_v58 = vpop.f32.mrf.mxu0  ;;  %322 = vmax.xlane.f32.xlu1 %v321_v56 }
 0x354   :  { %v319_v59 = vadd.f32 %v5537_v54, %v305_v55 }
 0x355   :  { %v301_v60 = vpop.f32.mrf.mxu0 }
 0x356   :  { %v324_v61 = vsel %vm320_vm3, %v319_v59, -inf }
 0x357   :  { %v4823_v62 = vpop.f32.mrf.mxu0  ;;  %325 = vmax.xlane.f32.xlu0 %v324_v61 }
 0x364   :  { %394 = vrot.lane.b32.xlu1 %v5512_v42, %s6981_s5 }
 0x368   :  { %444 = vrot.lane.b32.xlu1 %v5508_v38, %s6979_s10 }
 0x3dc   :  { %v323_v63 = vpop.xlane.xlu1 %322 }
 0x3dd   :  { %v327_v0 = vsub.f32 %v318_v51, %v323_v63 }
 0x3df   :  { %v329_v1 = vmul.f32 1.442695, %v327_v0 }
 0x3e0   :  { %v326_v2 = vpop.xlane.xlu0 %325  ;;  %v395_v3 = vpop.permute.xlu1 %394 }
 0x3e1   :  { %5126 = vpow2.f32 %v329_v1  ;;  %v328_v4 = vsub.f32 %v319_v59, %v326_v2  ;;  %v400_v5 = vsel %vm350_vm4, %v395_v3, 0 }
 0x3e2   :  { %4831 = vmatpush3.bf16.msra.mxu0 %v400_v5 }
 0x3e3   :  { %v331_v6 = vmul.f32 1.442695, %v328_v4  ;;  %4842 = vmatprep.subr.bf16.mxu0 %v6991_v15 }
 0x3e4   :  { %v445_v11 = vpop.permute.xlu1 %444 }
 0x3e5   :  { %5128 = vpow2.f32 %v331_v6  ;;  %v450_v21 = vsel %vm208_vm2, %v445_v11, 0 }
 0x3ee   :  { %v5127_v7 = vpop.eup %5126 }
 0x3ef   :  { %v333_v8 = vsel %vm320_vm3, %v5127_v7, 0.0 }
 0x3f0   :  { %334 = vadd.xlane.f32.xlu0 %v333_v8 }
 0x3f2   :  { %v5129_v9 = vpop.eup %5128 }
 0x3f3   :  { %v336_v10 = vsel %vm320_vm3, %v5129_v9, 0.0 }
 0x3f4   :  { %337 = vadd.xlane.f32.xlu1 %v336_v10 }
 0x405   :  { %494 = vrot.lane.b32.xlu1 %v5512_v42, %s6979_s10  ;;  %s5319_s10 = smov 4  }
 0x406   :  { %345 = vrot.lane.b32.xlu0 %v5508_v38, %s6981_s5 }
 0x409   :  { %492 = vrot.lane.b32.xlu1 %v5512_v42, %s6977_s6 }
 0x40a   :  { %442 = vrot.lane.b32.xlu0 %v5508_v38, %s6977_s6  ;;  %s7038_s6 = smov 16  }
 0x479   :  { %v335_v12 = vpop.xlane.xlu0 %334 }
 0x47a   :  { %5130 = vrcp.f32 %v335_v12  ;;  %v5102_v12 = vld [vmem:[%s7029_s7 + $0x8] sm:$0xff]  }
 0x47d   :  { %v346_v13 = vpop.permute.xlu0 %345  ;;  %v338_v14 = vpop.xlane.xlu1 %337 }
 0x47e   :  { %v352_v16 = vsel %vm350_vm4, %v346_v13, 0  ;;  %5132 = vrcp.f32 %v338_v14  ;;  %v5103_v13 = vld [vmem:[%s7029_s7] sm:$0xff]  }
 0x47f   :  { %4825 = vmatpush3.bf16.msra.mxu1 %v352_v16 }
 0x480   :  { %4836 = vmatprep.subr.bf16.mxu1 %v6991_v15 }
 0x481   :  { %v495_v23 = vpop.permute.xlu1 %494  ;;  %v443_v26 = vpop.permute.xlu0 %442 }
 0x482   :  { %v500_v25 = vsel %vm208_vm2, %v495_v23, 0 }
 0x485   :  { %v493_v27 = vpop.permute.xlu1 %492 }
 0x487   :  { %v5131_v17 = vpop.eup %5130 }
 0x488   :  { %v340_v18 = vmul.f32 %v5131_v17, %v5127_v7 }
 0x48a   :  { %v343_v19 = vpack.c.bf16 %v340_v18, %v340_v18 }
 0x48b   :  { %v5133_v20 = vpop.eup %5132 }
 0x48c   :  { %4827 = vmatmul.mubr.msk.bf16.vlgmr.msra.gmra.mxu1 %vm320_vm3, %v343_v19  ;;  %v342_v22 = vmul.f32 %v5133_v20, %v5129_v9 }
 0x48d   :  { %4837 = vmatpush3.bf16.xpose.msra.mxu1 %v450_v21  ;;  %4838 = vmatprep.mubr.msk.bf16.mxu1 %vm5300_vm1, %v6991_v15 }
 0x48e   :  { %v344_v24 = vpack.c.bf16 %v342_v22, %v342_v22  ;;  %4848 = vmatprep.subr.bf16.mxu1 %v6991_v15 }
 0x490   :  { %4833 = vmatmul.mubr.msk.bf16.vlgmr.msra.gmra.mxu0 %vm320_vm3, %v344_v24 }
 0x491   :  { %4843 = vmatpush3.bf16.xpose.msra.mxu0 %v500_v25  ;;  %4844 = vmatprep.mubr.msk.bf16.mxu0 %vm5300_vm1, %v6991_v15 }
 0x492   :  { %4854 = vmatprep.subr.bf16.mxu0 %v6991_v15 }
 0x494   :  { %4839 = vmatmul.mubr.msk.bf16.vlgmr.msra.gmra.mxu1 %vm208_vm2, %v443_v26 }
 0x495   :  { %4850 = vmatprep.mubr.msk.bf16.mxu1 %vm5300_vm1, %v6991_v15 }
 0x498   :  { %4845 = vmatmul.mubr.msk.bf16.vlgmr.msra.gmra.mxu0 %vm208_vm2, %v493_v27 }
 0x499   :  { %4856 = vmatprep.mubr.msk.bf16.mxu0 %vm5300_vm1, %v6991_v15 }
 0x54c   :  { %v5576_v28 = vpop.f32.mrf.mxu1 }
 0x54e   :  { %v4828_v29 = vpop.f32.mrf.mxu1 }
 0x550   :  { %v391_v30 = vpop.f32.mrf.mxu1  ;;  %v5578_v33 = vpop.f32.mrf.mxu0 }
 0x552   :  { %v4829_v34 = vpop.f32.mrf.mxu1  ;;  %v4834_v35 = vpop.f32.mrf.mxu0 }
 0x553   :  { %v4625_v34 = vld [vmem:[%s7030_s27] ss:$0 sm:$0xff] }
 0x554   :  { %v439_v36 = vpop.f32.mrf.mxu0  ;;  %v486_v37 = vpop.f32.mrf.mxu1 }
 0x555   :  { %v542_v39 = vmul.f32 0.25, %v486_v37 }
 0x556   :  { %v4835_v40 = vpop.f32.mrf.mxu0  ;;  %v4840_v41 = vpop.f32.mrf.mxu1 }
 0x557   :  { %v544_v43 = vadd.f32 %v5531_v48, %v542_v39 }
 0x558   :  { %v489_v44 = vpop.f32.mrf.mxu1  ;;  %v536_v45 = vpop.f32.mrf.mxu0 }
 0x559   :  { %v543_v46 = vmul.f32 0.25, %v536_v45  ;;  %v546_v47 = vsel %vm320_vm3, %v544_v43, -inf }
 0x55a   :  { %547 = vmax.xlane.f32.xlu0 %v546_v47  ;;  %v4841_v49 = vpop.f32.mrf.mxu1  ;;  %v4846_v50 = vpop.f32.mrf.mxu0 }
 0x55b   :  { %v545_v51 = vadd.f32 %v5537_v54, %v543_v46 }
 0x55c   :  { %v539_v52 = vpop.f32.mrf.mxu0 }
 0x55d   :  { %v549_v53 = vsel %vm320_vm3, %v545_v51, -inf }
 0x55e   :  { %550 = vmax.xlane.f32.xlu1 %v549_v53  ;;  %v4847_v55 = vpop.f32.mrf.mxu0 }
 0x56f   :  { %618 = vrot.lane.b32.xlu1 %v5512_v42, %s6975_s1 }
 0x5e3   :  { %v548_v56 = vpop.xlane.xlu0 %547 }
 0x5e4   :  { %v552_v57 = vsub.f32 %v544_v43, %v548_v56  ;;  %v5105_v56 = vld [vmem:[%s7031_s29] sm:$0xff]  }
 0x5e6   :  { %v554_v58 = vmul.f32 1.442695, %v552_v57 }
 0x5e7   :  { %v551_v59 = vpop.xlane.xlu1 %550 }
 0x5e8   :  { %5134 = vpow2.f32 %v554_v58  ;;  %v553_v60 = vsub.f32 %v545_v51, %v551_v59 }
 0x5ea   :  { %v556_v61 = vmul.f32 1.442695, %v553_v60 }
 0x5eb   :  { %v619_v62 = vpop.permute.xlu1 %618 }
 0x5ec   :  { %5136 = vpow2.f32 %v556_v61  ;;  %v624_v63 = vsel %vm350_vm4, %v619_v62, 0 }
 0x5ed   :  { %4855 = vmatpush3.bf16.msra.mxu0 %v624_v63 }
 0x5ee   :  { %4868 = vmatprep.subr.bf16.mxu0 %v6991_v15 }
 0x5f5   :  { %v5135_v0 = vpop.eup %5134 }
 0x5f6   :  { %v558_v1 = vsel %vm320_vm3, %v5135_v0, 0.0 }
 0x5f7   :  { %559 = vadd.xlane.f32.xlu0 %v558_v1 }
 0x5f9   :  { %v5137_v2 = vpop.eup %5136 }
 0x5fa   :  { %v561_v42 = vsel %vm320_vm3, %v5137_v2, 0.0 }
 0x5fb   :  { %562 = vadd.xlane.f32.xlu0 %v561_v42 }
 0x611   :  { %570 = vrot.lane.b32.xlu0 %v5508_v38, %s6975_s1  ;;  %s7033_s1 = sld [smem:[#allocation29_spill]] }
 0x680   :  { %v560_v3 = vpop.xlane.xlu0 %559 }
 0x681   :  { %5138 = vrcp.f32 %v560_v3 }
 0x684   :  { %v563_v4 = vpop.xlane.xlu0 %562 }
 0x685   :  { %5140 = vrcp.f32 %v563_v4  ;;  %v4630_v4 = vld [vmem:[%s7033_s1] ss:$0 sm:$0xff] }
 0x688   :  { %v571_v5 = vpop.permute.xlu0 %570 }
 0x689   :  { %v576_v6 = vsel %vm350_vm4, %v571_v5, 0 }
 0x68a   :  { %4849 = vmatpush3.bf16.msra.mxu1 %v576_v6 }
 0x68b   :  { %4860 = vmatprep.subr.bf16.mxu1 %v6991_v15 }
 0x68e   :  { %v5139_v7 = vpop.eup %5138 }
 0x68f   :  { %v565_v8 = vmul.f32 %v5139_v7, %v5135_v0 }
 0x691   :  { %v568_v9 = vpack.c.bf16 %v565_v8, %v565_v8 }
 0x692   :  { %v5141_v10 = vpop.eup %5140 }
 0x693   :  { %4851 = vmatmul.mubr.msk.bf16.vlgmr.msra.gmra.mxu1 %vm320_vm3, %v568_v9  ;;  %v567_v11 = vmul.f32 %v5141_v10, %v5137_v2  ;;  %v5106_v9 = vld [vmem:[%s6950_s12 + $0x18] sm:$0xff]   ;;  %v5107_v10 = vld [vmem:[%s6950_s12 + $0x10] sm:$0xff]  }
 0x694   :  { %4864 = vmatprep.mubr.msk.bf16.mxu1 %vm5300_vm1, %v6991_v15  ;;  %4861 = vmatpush3.bf16.msra.mxu1 %v5102_v12  ;;  %v4631_v12 = vld [vmem:[%s6949_s11] ss:$0 sm:$0xff] }
 0x695   :  { %v569_v38 = vpack.c.bf16 %v567_v11, %v567_v11  ;;  %4862 = vmatprep.subr.bf16.mxu1 %v6991_v15  ;;  %v5108_v11 = vld [vmem:[%s6950_s12 + $0x8] sm:$0xff]  }
 0x697   :  { %4857 = vmatmul.mubr.msk.bf16.vlgmr.msra.gmra.mxu0 %vm320_vm3, %v569_v38  ;;  %v5109_v38 = vld [vmem:[%s6950_s12] sm:$0xff]  }
 0x698   :  { %4872 = vmatprep.mubr.msk.bf16.mxu0 %vm5300_vm1, %v6991_v15  ;;  %4863 = vmatpush3.bf16.msra.mxu1 %v5103_v13 }
 0x699   :  { %4876 = vmatprep.subr.bf16.mxu1 %v6991_v15 }
 0x753   :  { %v612_v14 = vpop.f32.mrf.mxu1 }
 0x755   :  { %v4852_v16 = vpop.f32.mrf.mxu1 }
 0x757   :  { %v615_v17 = vpop.f32.mrf.mxu1  ;;  %v660_v18 = vpop.f32.mrf.mxu0 }
 0x758   :  { %v5059_v19 = vpack.i.bf16 %v660_v18, %v612_v14 }
 0x759   :  { %v4853_v20 = vpop.f32.mrf.mxu1  ;;  %v4858_v21 = vpop.f32.mrf.mxu0 }
 0x75a   :  { %5060 = vrot.lane.b32.xlu1 %v5059_v19, %s6974_s9  ;;  %s7032_s9 = sld [smem:[#allocation28_spill]] }
 0x75b   :  { %v663_v22 = vpop.f32.mrf.mxu0 }
 0x75d   :  { %v4859_v23 = vpop.f32.mrf.mxu0 }
 0x760   :  { %v4629_v1 = vld [vmem:[%s7032_s9] ss:$0 sm:$0xff] }
 0x7cc   :  { %v5061_v24 = vpop.permute.xlu1 %5060 }
 0x7cd   :  { %v5063_v25 = vunpack.i.h.bf16 %v5061_v24  ;;  %v5062_v26 = vunpack.i.l.bf16 %v5061_v24 }
 0x7cf   :  { %v675_v27 = vsel %vm208_vm2, %v5578_v33, %v5063_v25  ;;  %v674_v29 = vsel %vm208_vm2, %v5576_v28, %v5062_v26 }
 0x7d0   :  { %v676_v30 = vpack.c.bf16 %v675_v27, %v674_v29 }
 0x7d2   :  { %4865 = vmatmul.mubr.msk.bf16.vlgmr.msra.gmra.mxu1 %vm91_vm0, %v676_v30 }
 0x7d3   :  { %4884 = vmatprep.mubr.msk.bf16.mxu1 %vm5300_vm1, %v6991_v15  ;;  %4877 = vmatpush3.bf16.msra.mxu1 %v5106_v9 }
 0x7d4   :  { %4878 = vmatprep.subr.bf16.mxu1 %v6991_v15 }
 0x7d7   :  { %4879 = vmatpush3.bf16.msra.mxu1 %v5107_v10 }
 0x7d8   :  { %4880 = vmatprep.subr.bf16.mxu1 %v6991_v15 }
 0x7db   :  { %4881 = vmatpush3.bf16.msra.mxu1 %v5108_v11 }
 0x7dc   :  { %4882 = vmatprep.subr.bf16.mxu1 %v6991_v15 }
 0x7df   :  { %4883 = vmatpush3.bf16.msra.mxu1 %v5109_v38  ;;  %v4635_v38 = vld [vmem:[%s6951_s13] ss:$0 sm:$0xff] }
 0x7e0   :  { %4902 = vmatprep.subr.bf16.mxu1 %v6991_v15 }
 0x892   :  { %v737_v35 = vpop.f32.mrf.mxu1 }
 0x893   :  { %v738_v36 = vadd.f32 %v4625_v34, %v737_v35 }
 0x894   :  { %v4866_v37 = vpop.f32.mrf.mxu1 }
 0x895   :  { %v744_v39 = vadd.f32 %v738_v36, %v5496_v31 }
 0x896   :  { %v740_v40 = vpop.f32.mrf.mxu1 }
 0x897   :  { %v741_v33 = vadd.f32 %v4625_v34, %v740_v40  ;;  %v748_v41 = vsel %vm91_vm0, %v744_v39, 0.0 }
 0x898   :  { %749 = vadd.xlane.f32.xlu1 %v748_v41  ;;  %v4867_v28 = vpop.f32.mrf.mxu1 }
 0x899   :  { %v745_v43 = vadd.f32 %v741_v33, %v5498_v32  ;;  %v5104_v32 = vld [vmem:[%s7031_s29 + $0x8] sm:$0xff]  }
 0x89a   :  { %4869 = vmatpush3.bf16.msra.mxu0 %v5104_v32 }
 0x89b   :  { %v751_v44 = vsel %vm91_vm0, %v745_v43, 0.0  ;;  %4870 = vmatprep.subr.bf16.mxu0 %v6991_v15 }
 0x89c   :  { %752 = vadd.xlane.f32.xlu0 %v751_v44 }
 0x89e   :  { %4871 = vmatpush3.bf16.msra.mxu0 %v5105_v56 }
 0x89f   :  { %4888 = vmatprep.subr.bf16.mxu0 %v6991_v15 }
 0x921   :  { %v750_v45 = vpop.xlane.xlu1 %749 }
 0x922   :  { %v754_v46 = vmul.f32 0.03125, %v750_v45 }
 0x924   :  { %v756_v47 = vsub.f32 %v744_v39, %v754_v46 }
 0x925   :  { %v753_v49 = vpop.xlane.xlu0 %752 }
 0x926   :  { %v755_v50 = vmul.f32 0.03125, %v753_v49  ;;  %v758_v51 = vmul.f32 %v756_v47, %v756_v47 }
 0x928   :  { %v757_v52 = vsub.f32 %v745_v43, %v755_v50  ;;  %v760_v31 = vsel %vm91_vm0, %v758_v51, 0.0 }
 0x929   :  { %761 = vadd.xlane.f32.xlu0 %v760_v31 }
 0x92a   :  { %v759_v53 = vmul.f32 %v757_v52, %v757_v52 }
 0x92c   :  { %v763_v55 = vsel %vm91_vm0, %v759_v53, 0.0 }
 0x92d   :  { %764 = vadd.xlane.f32.xlu0 %v763_v55 }
 0x9b2   :  { %v762_v57 = vpop.xlane.xlu0 %761 }
 0x9b3   :  { %v766_v58 = vmul.f32 0.03125, %v762_v57 }
 0x9b5   :  { %v768_v59 = vadd.f32 1e-12, %v766_v58 }
 0x9b6   :  { %v765_v60 = vpop.xlane.xlu0 %764 }
 0x9b7   :  { %5142 = vrsqrt.f32 %v768_v59  ;;  %v767_v61 = vmul.f32 0.03125, %v765_v60 }
 0x9b9   :  { %v769_v62 = vadd.f32 1e-12, %v767_v61 }
 0x9bb   :  { %5144 = vrsqrt.f32 %v769_v62 }
 0x9c4   :  { %v5143_v63 = vpop.eup %5142 }
 0x9c5   :  { %v772_v0 = vmul.f32 %v5143_v63, %v756_v47 }
 0x9c7   :  { %v780_v3 = vmul.f32 %v4629_v1, %v772_v0 }
 0x9c8   :  { %v5145_v2 = vpop.eup %5144 }
 0x9c9   :  { %v773_v42 = vmul.f32 %v5145_v2, %v757_v52  ;;  %v5639_v6 = vadd.f32 %v4630_v4, %v780_v3 }
 0x9cb   :  { %v781_v5 = vmul.f32 %v4629_v1, %v773_v42 }
 0x9cd   :  { %v5641_v7 = vadd.f32 %v4630_v4, %v781_v5 }
 0x9cf   :  { %v790_v8 = vpack.c.bf16 %v5641_v7, %v5639_v6 }
 0x9d1   :  { %4873 = vmatmul.mubr.msk.bf16.vlgmr.msra.gmra.mxu0 %vm91_vm0, %v790_v8 }
 0x9d2   :  { %4892 = vmatprep.mubr.msk.bf16.mxu0 %vm5300_vm1, %v6991_v15 }
 0xa91   :  { %v851_v13 = vpop.f32.mrf.mxu0 }
 0xa92   :  { %v852_v14 = vadd.f32 %v4631_v12, %v851_v13 }
 0xa93   :  { %v4874_v16 = vpop.f32.mrf.mxu0 }
 0xa94   :  { %v860_v17 = vmul.f32 0.70710677, %v852_v14  ;;  %v858_v4 = vmul.f32 0.5, %v852_v14 }
 0xa95   :  { %v854_v18 = vpop.f32.mrf.mxu0 }
 0xa96   :  { %v862_v19 = vand.u32 2147483647, %v860_v17  ;;  %v855_v20 = vadd.f32 %v4631_v12, %v854_v18  ;;  %vm902_vm5 = vcmp.ge.f32.partialorder %v860_v17, 0.0 }
 0xa97   :  { %v4875_v21 = vpop.f32.mrf.mxu0 }
 0xa98   :  { %v864_v22 = vmul.f32 0.3275911, %v862_v19  ;;  %v861_v23 = vmul.f32 0.70710677, %v855_v20  ;;  %v890_v29 = vsub.f32 0.0, %v862_v19  ;;  %v859_v5 = vmul.f32 0.5, %v855_v20 }
 0xa9a   :  { %v866_v24 = vadd.f32 1.0, %v864_v22  ;;  %v863_v25 = vand.u32 2147483647, %v861_v23  ;;  %v892_v30 = vmul.f32 %v890_v29, %v862_v19  ;;  %vm903_vm6 = vcmp.ge.f32.partialorder %v861_v23, 0.0 }
 0xa9c   :  { %5146 = vrcp.f32 %v866_v24  ;;  %v865_v26 = vmul.f32 0.3275911, %v863_v25  ;;  %v891_v34 = vsub.f32 0.0, %v863_v25  ;;  %v894_v37 = vmul.f32 1.442695, %v892_v30 }
 0xa9e   :  { %v867_v27 = vadd.f32 1.0, %v865_v26  ;;  %v893_v39 = vmul.f32 %v891_v34, %v863_v25 }
 0xaa0   :  { %5148 = vrcp.f32 %v867_v27  ;;  %v896_v43 = vmul.f32 1.442695, %v893_v39 }
 0xaa1   :  { %5150 = vpow2.f32 %v894_v37 }
 0xaa2   :  { %5152 = vpow2.f32 %v896_v43 }
 0xaa9   :  { %v5147_v35 = vpop.eup %5146 }
 0xaaa   :  { %v872_v36 = vmul.f32 1.0614054, %v5147_v35 }
 0xaac   :  { %v874_v40 = vadd.f32 -1.4531521, %v872_v36  ;;  %v5111_v36 = vld [vmem:[%s7024_s0 + $0x10] sm:$0xff]  }
 0xaad   :  { %v5149_v33 = vpop.eup %5148 }
 0xaae   :  { %v876_v41 = vmul.f32 %v5147_v35, %v874_v40  ;;  %v873_v28 = vmul.f32 1.0614054, %v5149_v33  ;;  %v5151_v56 = vpop.eup %5150 }
 0xaaf   :  { %v5153_v61 = vpop.eup %5152 }
 0xab0   :  { %v878_v44 = vadd.f32 1.4214138, %v876_v41  ;;  %v875_v45 = vadd.f32 -1.4531521, %v873_v28 }
 0xab2   :  { %v880_v46 = vmul.f32 %v5147_v35, %v878_v44  ;;  %v877_v47 = vmul.f32 %v5149_v33, %v875_v45  ;;  %v4641_v45 = vld [vmem:[%s6952_s14] ss:$0 sm:$0xff] }
 0xab4   :  { %v882_v49 = vadd.f32 -0.28449672, %v880_v46  ;;  %v879_v50 = vadd.f32 1.4214138, %v877_v47 }
 0xab6   :  { %v884_v51 = vmul.f32 %v5147_v35, %v882_v49  ;;  %v881_v52 = vmul.f32 %v5149_v33, %v879_v50  ;;  %v4642_v50 = vld [vmem:[%s6953_s15] ss:$0 sm:$0xff] }
 0xab8   :  { %v886_v31 = vadd.f32 0.2548296, %v884_v51  ;;  %v883_v53 = vadd.f32 -0.28449672, %v881_v52 }
 0xaba   :  { %v888_v55 = vmul.f32 %v5147_v35, %v886_v31  ;;  %v885_v32 = vmul.f32 %v5149_v33, %v883_v53 }
 0xabc   :  { %v898_v57 = vmul.f32 %v5151_v56, %v888_v55  ;;  %v887_v58 = vadd.f32 0.2548296, %v885_v32  ;;  %v4648_v55 = vld [vmem:[%s7027_s28 + $0x1] ss:$0 sm:$0xff]  ;;  %s7034_s28 = smov 64  }
 0xabe   :  { %v900_v59 = vsub.f32 1.0, %v898_v57  ;;  %v889_v60 = vmul.f32 %v5149_v33, %v887_v58 }
 0xac0   :  { %v904_v62 = vsub.f32 0.0, %v900_v59  ;;  %v899_v63 = vmul.f32 %v5153_v61, %v889_v60 }
 0xac2   :  { %v906_v0 = vsel %vm902_vm5, %v900_v59, %v904_v62  ;;  %v901_v1 = vsub.f32 1.0, %v899_v63 }
 0xac3   :  { %v908_v42 = vadd.f32 1.0, %v906_v0 }
 0xac4   :  { %v905_v2 = vsub.f32 0.0, %v901_v1 }
 0xac5   :  { %v910_v9 = vmul.f32 %v908_v42, %v858_v4 }
 0xac6   :  { %v907_v3 = vsel %vm903_vm6, %v901_v1, %v905_v2 }
 0xac7   :  { %v909_v8 = vadd.f32 1.0, %v907_v3 }
 0xac9   :  { %v911_v10 = vmul.f32 %v909_v8, %v859_v5 }
 0xacb   :  { %v912_v11 = vpack.c.bf16 %v911_v10, %v910_v9 }
 0xacd   :  { %4885 = vmatmul.mubr.msk.bf16.vlgmr.msra.gmra.mxu1 %vm952_vm7, %v912_v11 }
 0xace   :  { %4904 = vmatprep.mubr.msk.bf16.mxu1 %vm5300_vm1, %v6991_v15 }
 0xb8d   :  { %v990_v12 = vpop.f32.mrf.mxu1 }
 0xb8e   :  { %v991_v13 = vadd.f32 %v4635_v38, %v990_v12 }
 0xb8f   :  { %v4886_v16 = vpop.f32.mrf.mxu1 }
 0xb90   :  { %v997_v14 = vadd.f32 %v991_v13, %v5639_v6 }
 0xb91   :  { %v993_v17 = vpop.f32.mrf.mxu1 }
 0xb92   :  { %v994_v18 = vadd.f32 %v4635_v38, %v993_v17  ;;  %v1001_v19 = vsel %vm91_vm0, %v997_v14, 0.0 }
 0xb93   :  { %1002 = vadd.xlane.f32.xlu1 %v1001_v19  ;;  %v4887_v20 = vpop.f32.mrf.mxu1 }
 0xb94   :  { %v998_v21 = vadd.f32 %v994_v18, %v5641_v7  ;;  %v5110_v7 = vld [vmem:[%s7024_s0 + $0x18] sm:$0xff]  }
 0xb95   :  { %4889 = vmatpush3.bf16.msra.mxu0 %v5110_v7 }
 0xb96   :  { %v1004_v22 = vsel %vm91_vm0, %v998_v21, 0.0  ;;  %4890 = vmatprep.subr.bf16.mxu0 %v6991_v15 }
 0xb97   :  { %1005 = vadd.xlane.f32.xlu0 %v1004_v22 }
 0xb99   :  { %4891 = vmatpush3.bf16.msra.mxu0 %v5111_v36 }
 0xb9a   :  { %4896 = vmatprep.subr.bf16.mxu0 %v6991_v15 }
 0xc1c   :  { %v1003_v23 = vpop.xlane.xlu1 %1002 }
 0xc1d   :  { %v1007_v24 = vmul.f32 0.03125, %v1003_v23 }
 0xc1f   :  { %v1009_v25 = vsub.f32 %v997_v14, %v1007_v24 }
 0xc20   :  { %v1006_v26 = vpop.xlane.xlu0 %1005 }
 0xc21   :  { %v1008_v27 = vmul.f32 0.03125, %v1006_v26  ;;  %v1011_v29 = vmul.f32 %v1009_v25, %v1009_v25 }
 0xc23   :  { %v1010_v30 = vsub.f32 %v998_v21, %v1008_v27  ;;  %v1013_v6 = vsel %vm91_vm0, %v1011_v29, 0.0 }
 0xc24   :  { %1014 = vadd.xlane.f32.xlu1 %v1013_v6 }
 0xc25   :  { %v1012_v34 = vmul.f32 %v1010_v30, %v1010_v30 }
 0xc27   :  { %v1016_v35 = vsel %vm91_vm0, %v1012_v34, 0.0 }
 0xc28   :  { %1017 = vadd.xlane.f32.xlu0 %v1016_v35 }
 0xcad   :  { %v1015_v37 = vpop.xlane.xlu1 %1014 }
 0xcae   :  { %v1019_v39 = vmul.f32 0.03125, %v1015_v37 }
 0xcb0   :  { %v1021_v40 = vadd.f32 1e-12, %v1019_v39 }
 0xcb1   :  { %v1018_v33 = vpop.xlane.xlu0 %1017 }
 0xcb2   :  { %5154 = vrsqrt.f32 %v1021_v40  ;;  %v1020_v41 = vmul.f32 0.03125, %v1018_v33 }
 0xcb4   :  { %v1022_v28 = vadd.f32 1e-12, %v1020_v41 }
 0xcb6   :  { %5156 = vrsqrt.f32 %v1022_v28 }
 0xcbf   :  { %v5155_v43 = vpop.eup %5154 }
 0xcc0   :  { %v1025_v44 = vmul.f32 %v5155_v43, %v1009_v25 }
 0xcc2   :  { %v1033_v49 = vmul.f32 %v4641_v45, %v1025_v44 }
 0xcc3   :  { %v5157_v46 = vpop.eup %5156 }
 0xcc4   :  { %v1026_v47 = vmul.f32 %v5157_v46, %v1010_v30  ;;  %v5693_v52 = vadd.f32 %v4642_v50, %v1033_v49 }
 0xcc6   :  { %v1034_v51 = vmul.f32 %v4641_v45, %v1026_v47 }
 0xcc8   :  { %v5695_v31 = vadd.f32 %v4642_v50, %v1034_v51 }
 0xcca   :  { %v1043_v53 = vpack.c.bf16 %v5695_v31, %v5693_v52 }
 0xccc   :  { %4893 = vmatmul.mubr.msk.bf16.vlgmr.msra.gmra.mxu0 %vm91_vm0, %v1043_v53 }
 0xccd   :  { %4898 = vmatprep.mubr.msk.bf16.mxu0 %vm5300_vm1, %v6991_v15 }
 0xd8c   :  { %v1106_v32 = vpop.f32.mrf.mxu0 }
 0xd8d   :  { %v1107_v56 = vadd.f32 %v4648_v55, %v1106_v32 }
 0xd8e   :  { %v4894_v57 = vpop.f32.mrf.mxu0 }
 0xd8f   :  { %v5705_v58 = vpack.c.bf16 %v1107_v56, %v1107_v56 }
 0xd90   :  { %v1109_v59 = vpop.f32.mrf.mxu0 }
 0xd91   :  { %v1110_v60 = vadd.f32 %v4648_v55, %v1109_v59  ;;  %1116 = vrot.lane.b32.xlu1 %v5705_v58, %s5301_s8 }
 0xd92   :  { %v4895_v61 = vpop.f32.mrf.mxu0 }
 0xd93   :  { %v5709_v62 = vpack.c.bf16 %v1110_v60, %v1110_v60 }
 0xd95   :  { %1165 = vrot.lane.b32.xlu0 %v5709_v62, %s5301_s8  ;;  %s7035_s8 = smov 80  }
 0xe03   :  { %v1117_v63 = vpop.permute.xlu1 %1116 }
 0xe04   :  { %v1122_v0 = vsel %vm208_vm2, %v1117_v63, 0 }
 0xe05   :  { %4897 = vmatpush3.bf16.xpose.msra.mxu0 %v1122_v0 }
 0xe06   :  { %4908 = vmatprep.subr.bf16.mxu0 %v6991_v15 }
 0xe07   :  { %v1166_v1 = vpop.permute.xlu0 %1165 }
 0xe08   :  { %v1171_v2 = vsel %vm208_vm2, %v1166_v1, 0 }
 0xe09   :  { %4903 = vmatpush3.bf16.xpose.msra.mxu1 %v1171_v2 }
 0xe0a   :  { %4914 = vmatprep.subr.bf16.mxu1 %v6991_v15 }
 0xe0c   :  { %4899 = vmatmul.mubr.msk.bf16.vlgmr.msra.gmra.mxu0 %vm208_vm2, %v5705_v58 }
 0xe0d   :  { %4910 = vmatprep.mubr.msk.bf16.mxu0 %vm5300_vm1, %v6991_v15 }
 0xe10   :  { %4905 = vmatmul.mubr.msk.bf16.vlgmr.msra.gmra.mxu1 %vm208_vm2, %v5709_v62 }
 0xe11   :  { %4916 = vmatprep.mubr.msk.bf16.mxu1 %vm5300_vm1, %v6991_v15 }
 0xecc   :  { %v1158_v42 = vpop.f32.mrf.mxu0 }
 0xecd   :  { %v1213_v3 = vmul.f32 0.25, %v1158_v42 }
 0xece   :  { %v4900_v4 = vpop.f32.mrf.mxu0 }
 0xecf   :  { %v1215_v5 = vadd.f32 %v5531_v48, %v1213_v3 }
 0xed0   :  { %v1161_v8 = vpop.f32.mrf.mxu0  ;;  %v1207_v9 = vpop.f32.mrf.mxu1 }
 0xed1   :  { %v1214_v10 = vmul.f32 0.25, %v1207_v9  ;;  %v1217_v11 = vsel %vm320_vm3, %v1215_v5, -inf }
 0xed2   :  { %v4906_v38 = vpop.f32.mrf.mxu1  ;;  %1218 = vmax.xlane.f32.xlu1 %v1217_v11  ;;  %v4901_v12 = vpop.f32.mrf.mxu0 }
 0xed3   :  { %v1216_v13 = vadd.f32 %v5537_v54, %v1214_v10 }
 0xed4   :  { %v1210_v16 = vpop.f32.mrf.mxu1 }
 0xed5   :  { %v1220_v14 = vsel %vm320_vm3, %v1216_v13, -inf }
 0xed6   :  { %1221 = vmax.xlane.f32.xlu0 %v1220_v14  ;;  %v4907_v17 = vpop.f32.mrf.mxu1 }
 0xee3   :  { %1241 = vrot.lane.b32.xlu1 %v5705_v58, %s7034_s28 }
 0xf5b   :  { %v1219_v18 = vpop.xlane.xlu1 %1218 }
 0xf5c   :  { %v1223_v19 = vsub.f32 %v1215_v5, %v1219_v18 }
 0xf5e   :  { %v1225_v20 = vmul.f32 1.442695, %v1223_v19 }
 0xf5f   :  { %v1222_v21 = vpop.xlane.xlu0 %1221  ;;  %v1242_v22 = vpop.permute.xlu1 %1241 }
 0xf60   :  { %5158 = vpow2.f32 %v1225_v20  ;;  %v1224_v23 = vsub.f32 %v1216_v13, %v1222_v21  ;;  %v1247_v24 = vsel %vm350_vm4, %v1242_v22, 0 }
 0xf61   :  { %4909 = vmatpush3.bf16.msra.mxu0 %v1247_v24 }
 0xf62   :  { %v1227_v25 = vmul.f32 1.442695, %v1224_v23  ;;  %4920 = vmatprep.subr.bf16.mxu0 %v6991_v15 }
 0xf64   :  { %5160 = vpow2.f32 %v1227_v25 }
 0xf6d   :  { %v5159_v26 = vpop.eup %5158 }
 0xf6e   :  { %v1229_v27 = vsel %vm320_vm3, %v5159_v26, 0.0 }
 0xf6f   :  { %1230 = vadd.xlane.f32.xlu1 %v1229_v27 }
 0xf71   :  { %v5161_v29 = vpop.eup %5160 }
 0xf72   :  { %v1232_v30 = vsel %vm320_vm3, %v5161_v29, 0.0 }
 0xf73   :  { %1233 = vadd.xlane.f32.xlu0 %v1232_v30  ;;  %v5112_v30 = vld [vmem:[%s7029_s7 + $0x18] sm:$0xff]  }
 0xf80   :  { %1339 = vrot.lane.b32.xlu1 %v5705_v58, %s7035_s8 }
 0xf84   :  { %1389 = vrot.lane.b32.xlu1 %v5709_v62, %s7035_s8  ;;  %s5328_s8 = smov 1  }
 0xf88   :  { %1337 = vrot.lane.b32.xlu1 %v5705_v58, %s7036_s3 }
 0xf89   :  { %1289 = vrot.lane.b32.xlu0 %v5709_v62, %s7034_s28  ;;  %s5326_s28 = smov 123  }
 0xf8d   :  { %1387 = vrot.lane.b32.xlu0 %v5709_v62, %s7036_s3 }
 0xff8   :  { %v1231_v6 = vpop.xlane.xlu1 %1230 }
 0xff9   :  { %5162 = vrcp.f32 %v1231_v6  ;;  %v5113_v6 = vld [vmem:[%s7029_s7 + $0x10] sm:$0xff]  }
 0xffc   :  { %v1234_v34 = vpop.xlane.xlu0 %1233  ;;  %v1340_v37 = vpop.permute.xlu1 %1339 }
 0xffd   :  { %5164 = vrcp.f32 %v1234_v34  ;;  %v1345_v41 = vsel %vm208_vm2, %v1340_v37, 0 }
0x1000   :  { %v1290_v35 = vpop.permute.xlu0 %1289  ;;  %v1390_v43 = vpop.permute.xlu1 %1389 }
0x1001   :  { %v1295_v7 = vsel %vm350_vm4, %v1290_v35, 0  ;;  %v1395_v45 = vsel %vm208_vm2, %v1390_v43, 0 }
0x1002   :  { %4915 = vmatpush3.bf16.msra.mxu1 %v1295_v7 }
0x1003   :  { %4926 = vmatprep.subr.bf16.mxu1 %v6991_v15 }
0x1004   :  { %v1338_v46 = vpop.permute.xlu1 %1337  ;;  %v1388_v47 = vpop.permute.xlu0 %1387 }
0x1006   :  { %v5163_v36 = vpop.eup %5162 }
0x1007   :  { %v1236_v39 = vmul.f32 %v5163_v36, %v5159_v26 }
0x1009   :  { %v1239_v40 = vpack.c.bf16 %v1236_v39, %v1236_v39 }
0x100a   :  { %v5165_v33 = vpop.eup %5164 }
0x100b   :  { %4911 = vmatmul.mubr.msk.bf16.vlgmr.msra.gmra.mxu0 %vm320_vm3, %v1239_v40  ;;  %v1238_v28 = vmul.f32 %v5165_v33, %v5161_v29 }
0x100c   :  { %4921 = vmatpush3.bf16.xpose.msra.mxu0 %v1345_v41  ;;  %4922 = vmatprep.mubr.msk.bf16.mxu0 %vm5300_vm1, %v6991_v15 }
0x100d   :  { %v1240_v44 = vpack.c.bf16 %v1238_v28, %v1238_v28  ;;  %4932 = vmatprep.subr.bf16.mxu0 %v6991_v15 }
0x100f   :  { %4917 = vmatmul.mubr.msk.bf16.vlgmr.msra.gmra.mxu1 %vm320_vm3, %v1240_v44 }
0x1010   :  { %4927 = vmatpush3.bf16.xpose.msra.mxu1 %v1395_v45  ;;  %4928 = vmatprep.mubr.msk.bf16.mxu1 %vm5300_vm1, %v6991_v15 }
0x1011   :  { %4938 = vmatprep.subr.bf16.mxu1 %v6991_v15 }
0x1013   :  { %4923 = vmatmul.mubr.msk.bf16.vlgmr.msra.gmra.mxu0 %vm208_vm2, %v1338_v46 }
0x1014   :  { %4934 = vmatprep.mubr.msk.bf16.mxu0 %vm5300_vm1, %v6991_v15 }
0x1017   :  { %4929 = vmatmul.mubr.msk.bf16.vlgmr.msra.gmra.mxu1 %vm208_vm2, %v1388_v47 }
0x1018   :  { %4940 = vmatprep.mubr.msk.bf16.mxu1 %vm5300_vm1, %v6991_v15 }
0x10cb   :  { %v5763_v49 = vpop.f32.mrf.mxu0 }
0x10cd   :  { %v4912_v50 = vpop.f32.mrf.mxu0 }
0x10ce   :  { %v4665_v50 = vld [vmem:[%s7030_s27 + $0x1] ss:$0 sm:$0xff]  ;;  %s5324_s27 = smov 125  }
0x10cf   :  { %v1286_v51 = vpop.f32.mrf.mxu0  ;;  %v5765_v53 = vpop.f32.mrf.mxu1 }
0x10d1   :  { %v4913_v55 = vpop.f32.mrf.mxu0  ;;  %v4918_v32 = vpop.f32.mrf.mxu1 }
0x10d3   :  { %v1334_v56 = vpop.f32.mrf.mxu1  ;;  %v1381_v57 = vpop.f32.mrf.mxu0 }
0x10d4   :  { %v1437_v59 = vmul.f32 0.25, %v1381_v57 }
0x10d5   :  { %v4919_v60 = vpop.f32.mrf.mxu1  ;;  %v4924_v61 = vpop.f32.mrf.mxu0 }
0x10d6   :  { %v1439_v63 = vadd.f32 %v5531_v48, %v1437_v59 }
0x10d7   :  { %v1384_v0 = vpop.f32.mrf.mxu0  ;;  %v1431_v1 = vpop.f32.mrf.mxu1 }
0x10d8   :  { %v1438_v2 = vmul.f32 0.25, %v1431_v1  ;;  %v1441_v42 = vsel %vm320_vm3, %v1439_v63, -inf }
0x10d9   :  { %v4930_v3 = vpop.f32.mrf.mxu1  ;;  %1442 = vmax.xlane.f32.xlu1 %v1441_v42  ;;  %v4925_v4 = vpop.f32.mrf.mxu0 }
0x10da   :  { %v1440_v5 = vadd.f32 %v5537_v54, %v1438_v2 }
0x10db   :  { %v1434_v8 = vpop.f32.mrf.mxu1 }
0x10dc   :  { %v1444_v9 = vsel %vm320_vm3, %v1440_v5, -inf }
0x10dd   :  { %1445 = vmax.xlane.f32.xlu0 %v1444_v9  ;;  %v4931_v10 = vpop.f32.mrf.mxu1  ;;  %v5115_v9 = vld [vmem:[%s7031_s29 + $0x10] sm:$0xff]  }
0x10ea   :  { %1465 = vrot.lane.b32.xlu1 %v5705_v58, %s7037_s4 }
0x1162   :  { %v1443_v11 = vpop.xlane.xlu1 %1442 }
0x1163   :  { %v1447_v48 = vsub.f32 %v1439_v63, %v1443_v11 }
0x1165   :  { %v1449_v38 = vmul.f32 1.442695, %v1447_v48 }
0x1166   :  { %v1446_v12 = vpop.xlane.xlu0 %1445  ;;  %v1466_v13 = vpop.permute.xlu1 %1465 }
0x1167   :  { %5166 = vpow2.f32 %v1449_v38  ;;  %v1448_v16 = vsub.f32 %v1440_v5, %v1446_v12  ;;  %v1471_v14 = vsel %vm350_vm4, %v1466_v13, 0 }
0x1168   :  { %4933 = vmatpush3.bf16.msra.mxu0 %v1471_v14 }
0x1169   :  { %v1451_v17 = vmul.f32 1.442695, %v1448_v16  ;;  %4944 = vmatprep.subr.bf16.mxu0 %v6991_v15 }
0x116b   :  { %5168 = vpow2.f32 %v1451_v17  ;;  %v4671_v17 = vld [vmem:[%s7032_s9 + $0x1] ss:$0 sm:$0xff] }
0x1174   :  { %v5167_v54 = vpop.eup %5166 }
0x1175   :  { %v1453_v18 = vsel %vm320_vm3, %v5167_v54, 0.0 }
0x1176   :  { %1454 = vadd.xlane.f32.xlu0 %v1453_v18 }
0x1178   :  { %v5169_v19 = vpop.eup %5168 }
0x1179   :  { %v1456_v58 = vsel %vm320_vm3, %v5169_v19, 0.0 }
0x117a   :  { %1457 = vadd.xlane.f32.xlu0 %v1456_v58  ;;  %v4672_v58 = vld [vmem:[%s7033_s1 + $0x1] ss:$0 sm:$0xff] }
0x1190   :  { %1513 = vrot.lane.b32.xlu0 %v5709_v62, %s7037_s4 }
0x11ff   :  { %v1455_v20 = vpop.xlane.xlu0 %1454 }
0x1200   :  { %5170 = vrcp.f32 %v1455_v20 }
0x1203   :  { %v1458_v21 = vpop.xlane.xlu0 %1457 }
0x1204   :  { %5172 = vrcp.f32 %v1458_v21 }
0x1207   :  { %v1514_v22 = vpop.permute.xlu0 %1513 }
0x1208   :  { %v1519_v23 = vsel %vm350_vm4, %v1514_v22, 0 }
0x1209   :  { %4939 = vmatpush3.bf16.msra.mxu1 %v1519_v23 }
0x120a   :  { %4952 = vmatprep.subr.bf16.mxu1 %v6991_v15 }
0x120d   :  { %v5171_v24 = vpop.eup %5170 }
0x120e   :  { %v1460_v25 = vmul.f32 %v5171_v24, %v5167_v54  ;;  %v5116_v24 = vld [vmem:[%s6950_s12 + $0x38] sm:$0xff]  }
0x1210   :  { %v1463_v26 = vpack.c.bf16 %v1460_v25, %v1460_v25  ;;  %v5117_v25 = vld [vmem:[%s6950_s12 + $0x30] sm:$0xff]  }
0x1211   :  { %v5173_v27 = vpop.eup %5172 }
0x1212   :  { %4935 = vmatmul.mubr.msk.bf16.vlgmr.msra.gmra.mxu0 %vm320_vm3, %v1463_v26  ;;  %v1462_v29 = vmul.f32 %v5173_v27, %v5169_v19  ;;  %v5118_v26 = vld [vmem:[%s6950_s12 + $0x28] sm:$0xff]   ;;  %v5119_v27 = vld [vmem:[%s6950_s12 + $0x20] sm:$0xff]  }
0x1213   :  { %4948 = vmatprep.mubr.msk.bf16.mxu0 %vm5300_vm1, %v6991_v15  ;;  %4945 = vmatpush3.bf16.msra.mxu0 %v5112_v30 }
0x1214   :  { %v1464_v62 = vpack.c.bf16 %v1462_v29, %v1462_v29  ;;  %4946 = vmatprep.subr.bf16.mxu0 %v6991_v15  ;;  %v4678_v29 = vld [vmem:[%s6949_s11 + $0x1] ss:$0 sm:$0xff]  ;;  %s5329_s11 = smov [#allocation2]  }
0x1215   :  { %s4587_s12 = sshll.u32 %s5329_s11, 4  ;;  %s4588_s12 = int_to_ptr.vmem [resolvable:$true] %s4587_s12 }
0x1216   :  { %4941 = vmatmul.mubr.msk.bf16.vlgmr.msra.gmra.mxu1 %vm320_vm3, %v1464_v62  ;;  %s5255_s3 = scalar_lea.vmem %s4588_s12, 16  ;;  %s5259_s4 = scalar_lea.vmem %s4588_s12, 32 }
0x1217   :  { %4956 = vmatprep.mubr.msk.bf16.mxu1 %vm5300_vm1, %v6991_v15  ;;  %4947 = vmatpush3.bf16.msra.mxu0 %v5113_v6  ;;  %p5256_p0 = scmp.ne.s32.totalorder %s4588_s12, %s5255_s3  ;;  %p5260_p1 = scmp.lt.s32.totalorder %s4588_s12, %s4588_s12 }
0x1218   :  { %4960 = vmatprep.subr.bf16.mxu0 %v6991_v15  ;;  %p5261_p2 = scmp.lt.s32.totalorder %s5259_s4, %s5255_s3 }
0x121a   :  { %p5262_p3 = por %p5261_p2, %p5260_p1 }
0x121c   :  { %p5263_p4 = pnand %p5262_p3, %p5256_p0 }
0x12d2   :  { %v1507_v34 = vpop.f32.mrf.mxu0 }
0x12d4   :  { %v4936_v35 = vpop.f32.mrf.mxu0 }
0x12d6   :  { %v1510_v7 = vpop.f32.mrf.mxu0  ;;  %v1555_v36 = vpop.f32.mrf.mxu1 }
0x12d7   :  { %v5064_v37 = vpack.i.bf16 %v1555_v36, %v1507_v34 }
0x12d8   :  { %v4937_v39 = vpop.f32.mrf.mxu0  ;;  %v4942_v40 = vpop.f32.mrf.mxu1 }
0x12d9   :  { %5065 = vrot.lane.b32.xlu1 %v5064_v37, %s7038_s6  ;;  %s5321_s6 = smov 7  }
0x12da   :  { %v1558_v33 = vpop.f32.mrf.mxu1 }
0x12dc   :  { %v4943_v41 = vpop.f32.mrf.mxu1 }
0x134b   :  { %v5066_v28 = vpop.permute.xlu1 %5065 }
0x134c   :  { %v5068_v43 = vunpack.i.h.bf16 %v5066_v28  ;;  %v5067_v44 = vunpack.i.l.bf16 %v5066_v28 }
0x134e   :  { %v1570_v45 = vsel %vm208_vm2, %v5765_v53, %v5068_v43  ;;  %v1569_v46 = vsel %vm208_vm2, %v5763_v49, %v5067_v44  ;;  %vm2341_vm2 = vcmask 36864  }
0x134f   :  { %v1571_v47 = vpack.c.bf16 %v1570_v45, %v1569_v46 }
0x1351   :  { %4949 = vmatmul.mubr.msk.bf16.vlgmr.msra.gmra.mxu0 %vm91_vm0, %v1571_v47 }
0x1352   :  { %4968 = vmatprep.mubr.msk.bf16.mxu0 %vm5300_vm1, %v6991_v15  ;;  %4961 = vmatpush3.bf16.msra.mxu0 %v5116_v24 }
0x1353   :  { %4962 = vmatprep.subr.bf16.mxu0 %v6991_v15 }
0x1356   :  { %4963 = vmatpush3.bf16.msra.mxu0 %v5117_v25  ;;  %v4691_v25 = vld [vmem:[%s6951_s13 + $0x1] ss:$0 sm:$0xff] }
0x1357   :  { %4964 = vmatprep.subr.bf16.mxu0 %v6991_v15 }
0x135a   :  { %4965 = vmatpush3.bf16.msra.mxu0 %v5118_v26 }
0x135b   :  { %4966 = vmatprep.subr.bf16.mxu0 %v6991_v15 }
0x135e   :  { %4967 = vmatpush3.bf16.msra.mxu0 %v5119_v27 }
0x135f   :  { %4990 = vmatprep.subr.mxu0 %v6991_v15 }
0x1411   :  { %v1634_v51 = vpop.f32.mrf.mxu0 }
0x1412   :  { %v1635_v55 = vadd.f32 %v4665_v50, %v1634_v51 }
0x1413   :  { %v4950_v32 = vpop.f32.mrf.mxu0 }
0x1414   :  { %v1641_v56 = vadd.f32 %v1635_v55, %v5693_v52 }
0x1415   :  { %v1637_v57 = vpop.f32.mrf.mxu0 }
0x1416   :  { %v1638_v53 = vadd.f32 %v4665_v50, %v1637_v57  ;;  %v1647_v59 = vsel %vm91_vm0, %v1641_v56, 0.0 }
0x1417   :  { %1648 = vadd.xlane.f32.xlu1 %v1647_v59  ;;  %v4951_v49 = vpop.f32.mrf.mxu0 }
0x1418   :  { %v1642_v60 = vadd.f32 %v1638_v53, %v5695_v31  ;;  %v5114_v31 = vld [vmem:[%s7031_s29 + $0x18] sm:$0xff]  }
0x1419   :  { %4953 = vmatpush3.bf16.msra.mxu1 %v5114_v31 }
0x141a   :  { %v1650_v61 = vsel %vm91_vm0, %v1642_v60, 0.0  ;;  %4954 = vmatprep.subr.bf16.mxu1 %v6991_v15 }
0x141b   :  { %1651 = vadd.xlane.f32.xlu0 %v1650_v61 }
0x141d   :  { %4955 = vmatpush3.bf16.msra.mxu1 %v5115_v9 }
0x141e   :  { %4972 = vmatprep.subr.bf16.mxu1 %v6991_v15 }
0x14a0   :  { %v1649_v63 = vpop.xlane.xlu1 %1648 }
0x14a1   :  { %v1653_v0 = vmul.f32 0.03125, %v1649_v63 }
0x14a3   :  { %v1655_v1 = vsub.f32 %v1641_v56, %v1653_v0 }
0x14a4   :  { %v1652_v2 = vpop.xlane.xlu0 %1651 }
0x14a5   :  { %v1654_v42 = vmul.f32 0.03125, %v1652_v2  ;;  %v1657_v3 = vmul.f32 %v1655_v1, %v1655_v1 }
0x14a7   :  { %v1656_v4 = vsub.f32 %v1642_v60, %v1654_v42  ;;  %v1659_v52 = vsel %vm91_vm0, %v1657_v3, 0.0 }
0x14a8   :  { %1660 = vadd.xlane.f32.xlu0 %v1659_v52 }
0x14a9   :  { %v1658_v5 = vmul.f32 %v1656_v4, %v1656_v4 }
0x14ab   :  { %v1662_v8 = vsel %vm91_vm0, %v1658_v5, 0.0 }
0x14ac   :  { %1663 = vadd.xlane.f32.xlu1 %v1662_v8 }
0x1531   :  { %v1661_v10 = vpop.xlane.xlu0 %1660 }
0x1532   :  { %v1665_v11 = vmul.f32 0.03125, %v1661_v10 }
0x1534   :  { %v1667_v48 = vadd.f32 1e-12, %v1665_v11 }
0x1535   :  { %v1664_v38 = vpop.xlane.xlu1 %1663 }
0x1536   :  { %5174 = vrsqrt.f32 %v1667_v48  ;;  %v1666_v12 = vmul.f32 0.03125, %v1664_v38 }
0x1538   :  { %v1668_v13 = vadd.f32 1e-12, %v1666_v12 }
0x153a   :  { %5176 = vrsqrt.f32 %v1668_v13 }
0x1543   :  { %v5175_v16 = vpop.eup %5174 }
0x1544   :  { %v1671_v14 = vmul.f32 %v5175_v16, %v1655_v1 }
0x1546   :  { %v1679_v19 = vmul.f32 %v4671_v17, %v1671_v14 }
0x1547   :  { %v5177_v54 = vpop.eup %5176 }
0x1548   :  { %v1672_v18 = vmul.f32 %v5177_v54, %v1656_v4  ;;  %v5826_v21 = vadd.f32 %v4672_v58, %v1679_v19 }
0x154a   :  { %v1680_v20 = vmul.f32 %v4671_v17, %v1672_v18 }
0x154c   :  { %v5828_v22 = vadd.f32 %v4672_v58, %v1680_v20 }
0x154e   :  { %v1689_v23 = vpack.c.bf16 %v5828_v22, %v5826_v21 }
0x1550   :  { %4957 = vmatmul.mubr.msk.bf16.vlgmr.msra.gmra.mxu1 %vm91_vm0, %v1689_v23 }
0x1551   :  { %4976 = vmatprep.mubr.msk.bf16.mxu1 %vm5300_vm1, %v6991_v15 }
0x1610   :  { %v1752_v62 = vpop.f32.mrf.mxu1 }
0x1611   :  { %v1753_v30 = vadd.f32 %v4678_v29, %v1752_v62 }
0x1612   :  { %v4958_v6 = vpop.f32.mrf.mxu1 }
0x1613   :  { %v1761_v34 = vmul.f32 0.70710677, %v1753_v30  ;;  %v1759_v18 = vmul.f32 0.5, %v1753_v30 }
0x1614   :  { %v1755_v35 = vpop.f32.mrf.mxu1 }
0x1615   :  { %v1763_v7 = vand.u32 2147483647, %v1761_v34  ;;  %v1756_v36 = vadd.f32 %v4678_v29, %v1755_v35  ;;  %vm1803_vm8 = vcmp.ge.f32.partialorder %v1761_v34, 0.0 }
0x1616   :  { %v4959_v37 = vpop.f32.mrf.mxu1 }
0x1617   :  { %v1765_v39 = vmul.f32 0.3275911, %v1763_v7  ;;  %v1762_v40 = vmul.f32 0.70710677, %v1756_v36  ;;  %v1791_v44 = vsub.f32 0.0, %v1763_v7  ;;  %v1760_v19 = vmul.f32 0.5, %v1756_v36 }
0x1619   :  { %v1767_v33 = vadd.f32 1.0, %v1765_v39  ;;  %v1764_v41 = vand.u32 2147483647, %v1762_v40  ;;  %v1793_v45 = vmul.f32 %v1791_v44, %v1763_v7  ;;  %vm1804_vm9 = vcmp.ge.f32.partialorder %v1762_v40, 0.0 }
0x161b   :  { %5178 = vrcp.f32 %v1767_v33  ;;  %v1766_v28 = vmul.f32 0.3275911, %v1764_v41  ;;  %v1792_v46 = vsub.f32 0.0, %v1764_v41  ;;  %v1795_v51 = vmul.f32 1.442695, %v1793_v45 }
0x161d   :  { %v1768_v43 = vadd.f32 1.0, %v1766_v28  ;;  %v1794_v55 = vmul.f32 %v1792_v46, %v1764_v41  ;;  %v5121_v46 = vld [vmem:[%s6957_s19] sm:$0xff]  }
0x161f   :  { %5180 = vrcp.f32 %v1768_v43  ;;  %v1797_v59 = vmul.f32 1.442695, %v1794_v55 }
0x1620   :  { %5182 = vpow2.f32 %v1795_v51 }
0x1621   :  { %5184 = vpow2.f32 %v1797_v59  ;;  %v4699_v59 = vld [vmem:[%s6952_s14 + $0x1] ss:$0 sm:$0xff]  ;;  %s5318_s14 = smov 3  }
0x1628   :  { %v5179_v47 = vpop.eup %5178 }
0x1629   :  { %v1773_v50 = vmul.f32 1.0614054, %v5179_v47 }
0x162b   :  { %v1775_v32 = vadd.f32 -1.4531521, %v1773_v50 }
0x162c   :  { %v5181_v56 = vpop.eup %5180 }
0x162d   :  { %v1777_v57 = vmul.f32 %v5179_v47, %v1775_v32  ;;  %v1774_v53 = vmul.f32 1.0614054, %v5181_v56  ;;  %v5183_v8 = vpop.eup %5182 }
0x162e   :  { %v5185_v48 = vpop.eup %5184 }
0x162f   :  { %v1779_v49 = vadd.f32 1.4214138, %v1777_v57  ;;  %v1776_v60 = vadd.f32 -1.4531521, %v1774_v53 }
0x1631   :  { %v1781_v61 = vmul.f32 %v5179_v47, %v1779_v49  ;;  %v1778_v63 = vmul.f32 %v5181_v56, %v1776_v60 }
0x1633   :  { %v1783_v0 = vadd.f32 -0.28449672, %v1781_v61  ;;  %v1780_v1 = vadd.f32 1.4214138, %v1778_v63  ;;  %v4700_v63 = vld [vmem:[%s6953_s15 + $0x1] ss:$0 sm:$0xff] }
0x1634   :  { %s5320_s15 = smov 5  }
0x1635   :  { %v1785_v2 = vmul.f32 %v5179_v47, %v1783_v0  ;;  %v1782_v42 = vmul.f32 %v5181_v56, %v1780_v1 }
0x1637   :  { %v1787_v3 = vadd.f32 0.2548296, %v1785_v2  ;;  %v1784_v4 = vadd.f32 -0.28449672, %v1782_v42 }
0x1639   :  { %v1789_v52 = vmul.f32 %v5179_v47, %v1787_v3  ;;  %v1786_v5 = vmul.f32 %v5181_v56, %v1784_v4  ;;  %v4701_v3 = vld [vmem:[%s6958_s20] ss:$0 sm:$0xff] }
0x163b   :  { %v1799_v31 = vmul.f32 %v5183_v8, %v1789_v52  ;;  %v1788_v9 = vadd.f32 0.2548296, %v1786_v5  ;;  %v2015_v5 = vld [vmem:[%s6954_s16] sm:$0xff] }
0x163d   :  { %v1801_v10 = vsub.f32 1.0, %v1799_v31  ;;  %v1790_v11 = vmul.f32 %v5181_v56, %v1788_v9 }
0x163f   :  { %v1805_v38 = vsub.f32 0.0, %v1801_v10  ;;  %v1800_v12 = vmul.f32 %v5185_v48, %v1790_v11  ;;  %v2310_v48 = vlaneseq }
0x1641   :  { %v1807_v13 = vsel %vm1803_vm8, %v1801_v10, %v1805_v38  ;;  %v1802_v16 = vsub.f32 1.0, %v1800_v12  ;;  %v2016_v10 = vld [vmem:[%s6954_s16 + $0x8] sm:$0xff]  ;;  %v5901_v38 = vshrl.u32 %v2310_v48, 7  ;;  %v5307_v12 = vmov 1966171168   ;;  %s5322_s16 = smov 6  }
0x1642   :  { %v1809_v17 = vadd.f32 1.0, %v1807_v13  ;;  %v2308_v13 = vunpack.c.l.s4 %v5307_v12 }
0x1643   :  { %v1806_v14 = vsub.f32 0.0, %v1802_v16 }
0x1644   :  { %v1811_v20 = vmul.f32 %v1809_v17, %v1759_v18  ;;  %v3223_v17 = vsub.s32 4, %v5901_v38  ;;  %v3819_v18 = vsub.s32 6, %v5901_v38 }
0x1645   :  { %v1808_v54 = vsel %vm1804_vm9, %v1802_v16, %v1806_v14  ;;  %v2627_v16 = vsub.s32 2, %v5901_v38  ;;  %v2925_v14 = vsub.s32 3, %v5901_v38 }
0x1646   :  { %v1810_v58 = vadd.f32 1.0, %v1808_v54  ;;  %v3521_v54 = vsub.s32 5, %v5901_v38 }
0x1648   :  { %v1812_v23 = vmul.f32 %v1810_v58, %v1760_v19  ;;  %v4124_v19 = vsub.s32 7, %v5901_v38 }
0x164a   :  { %v1813_v24 = vpack.c.bf16 %v1812_v23, %v1811_v20  ;;  %v2309_v20 = vunpack.c.0.s8 %v2308_v13 }
0x164c   :  { %4969 = vmatmul.mubr.msk.bf16.vlgmr.msra.gmra.mxu0 %vm952_vm7, %v1813_v24 }
0x164d   :  { %4992 = vmatprep.mubr.msk.f32.mxu0 %vm5300_vm1, %v6991_v15 }
0x170c   :  { %v1892_v26 = vpop.f32.mrf.mxu0 }
0x170d   :  { %v1893_v27 = vadd.f32 %v4691_v25, %v1892_v26  ;;  %v2165_v26 = vld [vmem:[%s6956_s18 + $0x8] sm:$0xff] }
0x170e   :  { %v4970_v29 = vpop.f32.mrf.mxu0 }
0x170f   :  { %v1899_v62 = vadd.f32 %v1893_v27, %v5826_v21 }
0x1710   :  { %v1895_v30 = vpop.f32.mrf.mxu0 }
0x1711   :  { %v1896_v6 = vadd.f32 %v4691_v25, %v1895_v30  ;;  %v1905_v34 = vsel %vm91_vm0, %v1899_v62, 0.0 }
0x1712   :  { %1906 = vadd.xlane.f32.xlu0 %v1905_v34  ;;  %v4971_v35 = vpop.f32.mrf.mxu0 }
0x1713   :  { %v1900_v7 = vadd.f32 %v1896_v6, %v5828_v22  ;;  %v5120_v22 = vld [vmem:[%s6957_s19 + $0x8] sm:$0xff]   ;;  %v2164_v6 = vld [vmem:[%s6956_s18] sm:$0xff]  ;;  %v5928_v35 = vsub.s32 %v2309_v20, %v5901_v38 }
0x1714   :  { %4973 = vmatpush3.bf16.msra.mxu1 %v5120_v22 }
0x1715   :  { %v1908_v36 = vsel %vm91_vm0, %v1900_v7, 0.0  ;;  %4974 = vmatprep.subr.bf16.mxu1 %v6991_v15 }
0x1716   :  { %1909 = vadd.xlane.f32.xlu1 %v1908_v36  ;;  %v4707_v36 = vld [vmem:[%s6961_s23] ss:$0 sm:$0xff]  ;;  %s5327_s23 = smov 122  }
0x1718   :  { %4975 = vmatpush3.bf16.msra.mxu1 %v5121_v46 }
0x1719   :  { %4980 = vmatprep.subr.mxu1 %v6991_v15 }
0x179b   :  { %v1907_v37 = vpop.xlane.xlu0 %1906 }
0x179c   :  { %v1911_v39 = vmul.f32 0.03125, %v1907_v37 }
0x179e   :  { %v1913_v40 = vsub.f32 %v1899_v62, %v1911_v39 }
0x179f   :  { %v1910_v33 = vpop.xlane.xlu1 %1909 }
0x17a0   :  { %v1912_v41 = vmul.f32 0.03125, %v1910_v33  ;;  %v1915_v28 = vmul.f32 %v1913_v40, %v1913_v40 }
0x17a2   :  { %v1914_v43 = vsub.f32 %v1900_v7, %v1912_v41  ;;  %v1917_v21 = vsel %vm91_vm0, %v1915_v28, 0.0 }
0x17a3   :  { %1918 = vadd.xlane.f32.xlu0 %v1917_v21 }
0x17a4   :  { %v1916_v44 = vmul.f32 %v1914_v43, %v1914_v43 }
0x17a6   :  { %v1920_v45 = vsel %vm91_vm0, %v1916_v44, 0.0 }
0x17a7   :  { %1921 = vadd.xlane.f32.xlu1 %v1920_v45 }
0x182c   :  { %v1919_v47 = vpop.xlane.xlu0 %1918 }
0x182d   :  { %v1923_v50 = vmul.f32 0.03125, %v1919_v47 }
0x182f   :  { %v1925_v51 = vadd.f32 1e-12, %v1923_v50 }
0x1830   :  { %v1922_v55 = vpop.xlane.xlu1 %1921 }
0x1831   :  { %5186 = vrsqrt.f32 %v1925_v51  ;;  %v1924_v32 = vmul.f32 0.03125, %v1922_v55 }
0x1833   :  { %v1926_v56 = vadd.f32 1e-12, %v1924_v32  ;;  %v5970_v32 = vsub.s32 0, %v5901_v38 }
0x1835   :  { %5188 = vrsqrt.f32 %v1926_v56 }
0x183e   :  { %v5187_v57 = vpop.eup %5186 }
0x183f   :  { %v1929_v53 = vmul.f32 %v5187_v57, %v1913_v40 }
0x1841   :  { %v1937_v61 = vmul.f32 %v4699_v59, %v1929_v53 }
0x1842   :  { %v5189_v49 = vpop.eup %5188 }
0x1843   :  { %v1930_v60 = vmul.f32 %v5189_v49, %v1914_v43  ;;  %v1945_v1 = vadd.f32 %v4700_v63, %v1937_v61 }
0x1845   :  { %v1938_v0 = vmul.f32 %v4699_v59, %v1930_v60  ;;  %v5988_v60 = vld [vmem:[%s6960_s22] sm:$0x1f] }
0x1847   :  { %v1946_v2 = vadd.f32 %v4700_v63, %v1938_v0 }
0x1849   :  { %v1947_v42 = vpack.c.bf16 %v1946_v2, %v1945_v1 }
0x184b   :  { %4977 = vmatmul.mubr.msk.bf16.vlgmr.msra.gmra.mxu1 %vm91_vm0, %v1947_v42  ;;  %vm2282_vm0 = vcmask 1042434  }
0x184c   :  { %4982 = vmatprep.mubr.msk.f32.mxu1 %vm5300_vm1, %v6991_v15 }
0x190b   :  { %v2008_v4 = vpop.f32.mrf.mxu1 }
0x190c   :  { %v2009_v52 = vadd.f32 %v4701_v3, %v2008_v4  ;;  %v2368_v4 = vsub.s32 1, %v5901_v38 }
0x190d   :  { %v4978_v8 = vpop.f32.mrf.mxu1 }
0x190e   :  { %4981 = vmatpush3.msra.mxu1 %v2009_v52  ;;  %v6993_v52 = vmov 0  }
0x190f   :  { %v2011_v31 = vpop.f32.mrf.mxu1  ;;  %4983 = vmatmul.mubr.msk.f32.vlgmr.msra.gmra.mxu1 %vm320_vm3, %v2015_v5  ;;  %4985 = vmatprep.subr.mxu1 %v6991_v15 }
0x1910   :  { %v2012_v9 = vadd.f32 %v4701_v3, %v2011_v31  ;;  %4987 = vmatprep.mubr.msk.f32.mxu1 %vm5300_vm1, %v6991_v15  ;;  %5069 = vset.pattern.permute.xlu1 %v6993_v52  ;;  %v6008_v31 = vld [vmem:[%s6955_s17] sm:$0x3] }
0x1911   :  { %v4979_v11 = vpop.f32.mrf.mxu1 }
0x1912   :  { %4986 = vmatpush3.msra.mxu1 %v2012_v9  ;;  %v6983_v9 = vmov 1  }
0x1913   :  { %4988 = vmatmul.mubr.msk.f32.vlgmr.msra.gmra.mxu1 %vm320_vm3, %v2016_v10  ;;  %4995 = vmatprep.subr.mxu1 %v6991_v15  ;;  %vm2299_vm3 = vcmp.gt.f32.partialorder %v6008_v31, 0.5 }
0x1914   :  { %4997 = vmatprep.mubr.msk.f32.mxu1 %vm5300_vm1, %v6991_v15  ;;  %5070 = vset.pattern.permute.xlu0 %v6983_v9  ;;  %v6015_v10 = vsel %vm2299_vm3, 1, %v6993_v52 }
0x19cf   :  { %v2086_v58 = vpop.f32.mrf.mxu1 }
0x19d0   :  { %v5909_v23 = vrot.slane %v2086_v58, %v2627_v16  ;;  %v5911_v24 = vrot.slane %v2086_v58, %v2925_v14  ;;  %v5916_v27 = vrot.slane %v2086_v58, %v3223_v17  ;;  %v5918_v29 = vrot.slane %v2086_v58, %v3521_v54 }
0x19d1   :  { %v4984_v25 = vpop.f32.mrf.mxu1  ;;  %v5920_v62 = vrot.slane %v2086_v58, %v3819_v18  ;;  %v5922_v30 = vrot.slane %v2086_v58, %v4124_v19  ;;  %v5943_v21 = vmul.f32 %v2164_v6, %v2086_v58  ;;  %v2369_v8 = vrot.slane %v2086_v58, %v2368_v4 }
0x19d3   :  { %v2159_v34 = vpop.f32.mrf.mxu1  ;;  %7039 = vst [vmem:[#allocation8_spill] sm:$0xff] %v5943_v21 }
0x19d4   :  { %v2278_v7 = vmul.f32 %v2165_v26, %v2159_v34  ;;  %v2178_v37 = vrot.slane %v2159_v34, 7  ;;  %v5933_v39 = vrot.slane %v2159_v34, %v2627_v16  ;;  %v5935_v33 = vrot.slane %v2159_v34, %v2925_v14 }
0x19d5   :  { %v4989_v40 = vpop.f32.mrf.mxu1  ;;  %v5937_v41 = vrot.slane %v2159_v34, %v3223_v17  ;;  %v5939_v28 = vrot.slane %v2159_v34, %v3521_v54  ;;  %v5941_v43 = vrot.slane %v2159_v34, %v3819_v18  ;;  %v5948_v22 = vrot.slane %v2159_v34, %v4124_v19 }
0x19d6   :  { %v5945_v44 = vrot.slane %v2278_v7, 7  ;;  %v2180_v45 = vsel %vm2179_vm10, %v2178_v37, %v2086_v58  ;;  %v2376_v5 = vrot.slane %v2159_v34, %v2368_v4  ;;  %v6032_v54 = vand.u32 127, %v2310_v48 }
0x19d7   :  { %v5950_v46 = vadd.f32 %v4707_v36, %v2180_v45 }
0x19d8   :  { %v5955_v47 = vsel %vm2540_vm11, %v5945_v44, %v5943_v21  ;;  %v5960_v50 = vsel %vm3732_vm12, %v5945_v44, %v5943_v21  ;;  %v5965_v51 = vsel %vm2838_vm13, %v5945_v44, %v5943_v21  ;;  %v5974_v56 = vsel %vm3136_vm14, %v5945_v44, %v5943_v21 }
0x19d9   :  { %7040 = vst [vmem:[#allocation9_spill] sm:$0xff] %v5950_v46  ;;  %v2313_v55 = vrot.slane %v5950_v46, %v5928_v35  ;;  %v5978_v57 = vsel %vm3434_vm15, %v5945_v44, %v5943_v21  ;;  %v5982_v53 = vsel %vm2282_vm0, %v5945_v44, %v5943_v21  ;;  %v6036_v19 = vsub.s32 %v6032_v54, %v5901_v38 }
0x19da   :  { %7041 = vst [vmem:[#allocation10_spill] sm:$0xff] %v5978_v57  ;;  %7042 = vst [vmem:[#allocation11_spill] sm:$0xff] %v5982_v53  ;;  %vm2189_vm12 = vcmask 33792  }
0x19db   :  { %v2321_v59 = vrot.slane %v2313_v55, %v5928_v35  ;;  %v2314_v49 = vcombine.high %v2313_v55, %v2313_v55 }
0x19dd   :  { %v2332_v61 = vrot.slane %v2321_v59, %v5970_v32  ;;  %v2328_v63 = vrot.slane %v2314_v49, %v5928_v35 }
0x19df   :  { %v5993_v0 = vadd.f32 %v2332_v61, %v5988_v60  ;;  %v2336_v1 = vrot.slane %v2328_v63, %v5970_v32 }
0x19e1   :  { %7043 = vst [vmem:[#allocation12_spill] sm:$0xff] %v5993_v0  ;;  %v2342_v2 = vsel %vm2341_vm2, %v5993_v0, -inf  ;;  %v5999_v42 = vadd.f32 %v2336_v1, %v5988_v60 }
0x19e2   :  { %2343 = vmax.xlane.f32.xlu0 %v2342_v2 }
0x19e3   :  { %7044 = vst [vmem:[#allocation13_spill] sm:$0xff] %v5999_v42  ;;  %v2345_v3 = vsel %vm2341_vm2, %v5999_v42, -inf }
0x19e4   :  { %2346 = vmax.xlane.f32.xlu1 %v2345_v3 }
0x19f5   :  { %2378 = vbcast.lane.b32.xlu1 %v2376_v5, 256 }
0x19f8   :  { %2371 = vbcast.lane.b32.xlu0 %v2369_v8, 256 }
0x19fc   :  { %2302 = vperm.xlu0 %5070, %v6015_v10  }
0x1a00   :  { %5071 = vset.pattern.permute.xlu0 %v6993_v52 }
0x1a6b   :  { %v6019_v11 = vpop.xlane.xlu0 %2343 }
0x1a6c   :  { %7045 = vst [vmem:[#allocation14_spill] sm:$0xff] %v6019_v11  ;;  %v2348_v61 = vsub.f32 %v5993_v0, %v6019_v11 }
0x1a6d   :  { %v6021_v12 = vpop.xlane.xlu1 %2346 }
0x1a6e   :  { %7046 = vst [vmem:[#allocation15_spill] sm:$0xff] %v6021_v12  ;;  %v2349_v63 = vsub.f32 %v5999_v42, %v6021_v12  ;;  %v2350_v1 = vmul.f32 1.442695, %v2348_v61  ;;  %v6985_v61 = vmov 3  }
0x1a6f   :  { %v6023_v13 = vpop.permute.xlu0 %2371 }
0x1a70   :  { %v2439_v16 = vadd.f32 %v6023_v13, %v6019_v11  ;;  %v2352_v2 = vmul.f32 1.442695, %v2349_v63  ;;  %5190 = vpow2.f32 %v2350_v1 }
0x1a71   :  { %v6027_v14 = vpop.permute.xlu1 %2378 }
0x1a72   :  { %2444 = vperm.xlu1 %5069, %v2439_v16   ;;  %v2440_v17 = vadd.f32 %v6027_v14, %v6021_v12  ;;  %5192 = vpow2.f32 %v2352_v2 }
0x1a76   :  { %2447 = vperm.xlu1 %5069, %v2440_v17  }
0x1a77   :  { %v6038_v58 = vpop.permute.xlu0 %2302 }
0x1a78   :  { %7047 = vst [vmem:[#allocation16_spill] sm:$0xff] %v6038_v58  ;;  %vm2304_vm4 = vcmp.eq.s32.totalorder %v6038_v58, 1 }
0x1a7d   :  { %v5191_v3 = vpop.eup %5190 }
0x1a7e   :  { %v2354_v5 = vsel %vm2341_vm2, %v5191_v3, 0.0 }
0x1a7f   :  { %v5193_v4 = vpop.eup %5192 }
0x1a80   :  { %v2357_v8 = vsel %vm2341_vm2, %v5193_v4, 0.0 }
0x1aed   :  { %v2445_v18 = vpop.permute.xlu1 %2444 }
0x1aee   :  { %v2452_v25 = vrot.slane %v2445_v18, %v6036_v19 }
0x1af1   :  { %v2448_v20 = vpop.permute.xlu1 %2447 }
0x1af2   :  { %v2456_v26 = vrot.slane %v2448_v20, %v6036_v19 }
0x1af4   :  { %v2457_v6 = vsel %vm2179_vm10, %v2456_v26, %v2452_v25  ;;  %v6987_v25 = vmov 2  }
0x1af5   :  { %v6047_v48 = vsel %vm2304_vm4, %v2457_v6, %v5950_v46 }
0x1af6   :  { %v2669_v38 = vrot.slane %v6047_v48, %v5928_v35 }
0x1af8   :  { %v2670_v34 = vcombine.high %v2669_v38, %v2669_v38  ;;  %v2677_v7 = vrot.slane %v2669_v38, %v5928_v35 }
0x1afa   :  { %v2688_v36 = vrot.slane %v2677_v7, %v5970_v32  ;;  %v2684_v37 = vrot.slane %v2670_v34, %v5928_v35 }
0x1afc   :  { %v6055_v40 = vadd.f32 %v2688_v36, %v5988_v60  ;;  %v2692_v45 = vrot.slane %v2684_v37, %v5970_v32 }
0x1afe   :  { %v2697_v55 = vsel %vm2341_vm2, %v6055_v40, -inf  ;;  %v6061_v59 = vadd.f32 %v2692_v45, %v5988_v60 }
0x1aff   :  { %2698 = vmax.xlane.f32.xlu1 %v2697_v55 }
0x1b00   :  { %v2700_v49 = vsel %vm2341_vm2, %v6061_v59, -inf }
0x1b01   :  { %2701 = vmax.xlane.f32.xlu0 %v2700_v49 }
0x1b10   :  { %2637 = vbcast.lane.b32.xlu1 %v5933_v39, 256 }
0x1b17   :  { %2630 = vbcast.lane.b32.xlu0 %v5909_v23, 256 }
0x1b34   :  { %2355 = vadd.xlane.f32.xlu1 %v2354_v5 }
0x1b36   :  { %2358 = vadd.xlane.f32.xlu0 %v2357_v8 }
0x1b88   :  { %v6073_v39 = vpop.xlane.xlu1 %2698 }
0x1b8a   :  { %v6075_v23 = vpop.xlane.xlu0 %2701 }
0x1b8c   :  { %v6077_v16 = vpop.permute.xlu1 %2637 }
0x1b8d   :  { %v2738_v17 = vadd.f32 %v6075_v23, %v6077_v16 }
0x1b8e   :  { %v6081_v18 = vpop.permute.xlu0 %2630 }
0x1b8f   :  { %v2737_v20 = vadd.f32 %v6073_v39, %v6081_v18  ;;  %2745 = vperm.xlu1 %5069, %v2738_v17  }
0x1b91   :  { %2742 = vperm.xlu0 %5071, %v2737_v20  }
0x1b93   :  { %5072 = vset.pattern.permute.xlu1 %v6987_v25 }
0x1b94   :  { %2562 = vperm.xlu1 %5072, %v6015_v10  }
0x1b98   :  { %5073 = vset.pattern.permute.xlu1 %v6993_v52 }
0x1bbd   :  { %v2356_v26 = vpop.xlane.xlu1 %2355 }
0x1bbe   :  { %5194 = vlog2.f32 %v2356_v26 }
0x1bbf   :  { %v2359_v6 = vpop.xlane.xlu0 %2358 }
0x1bc0   :  { %5196 = vlog2.f32 %v2359_v6 }
0x1bcb   :  { %v5195_v38 = vpop.eup %5194 }
0x1bcc   :  { %v2361_v34 = vmul.f32 0.6931472, %v5195_v38 }
0x1bcd   :  { %v5197_v7 = vpop.eup %5196 }
0x1bce   :  { %v2363_v36 = vmul.f32 0.6931472, %v5197_v7  ;;  %v2364_v37 = vadd.f32 %v2361_v34, %v6019_v11 }
0x1bd0   :  { %v2382_v45 = vadd.f32 %v6023_v13, %v2364_v37  ;;  %v2365_v55 = vadd.f32 %v2363_v36, %v6021_v12 }
0x1bd2   :  { %2387 = vperm.xlu1 %5073, %v2382_v45   ;;  %v2383_v49 = vadd.f32 %v6027_v14, %v2365_v55 }
0x1bd6   :  { %2390 = vperm.xlu1 %5073, %v2383_v49  }
0x1bda   :  { %5074 = vset.pattern.permute.xlu1 %v6985_v61 }
0x1c0a   :  { %v2746_v63 = vpop.permute.xlu1 %2745 }
0x1c0b   :  { %v2754_v2 = vrot.slane %v2746_v63, %v6036_v19 }
0x1c0c   :  { %v2743_v1 = vpop.permute.xlu0 %2742 }
0x1c0d   :  { %v2750_v3 = vrot.slane %v2743_v1, %v6036_v19 }
0x1c0f   :  { %v6095_v4 = vpop.permute.xlu1 %2562  ;;  %v2755_v5 = vsel %vm2179_vm10, %v2754_v2, %v2750_v3 }
0x1c10   :  { %7048 = vst [vmem:[#allocation17_spill] sm:$0xff] %v6095_v4  ;;  %vm2564_vm5 = vcmp.eq.s32.totalorder %v6095_v4, 1 }
0x1c11   :  { %v2757_v13 = vsel %vm2564_vm5, %v2755_v5, %v6047_v48 }
0x1c12   :  { %v2967_v14 = vrot.slane %v2757_v13, %v5928_v35 }
0x1c14   :  { %v2968_v8 = vcombine.high %v2967_v14, %v2967_v14  ;;  %v2975_v17 = vrot.slane %v2967_v14, %v5928_v35 }
0x1c16   :  { %v2986_v20 = vrot.slane %v2975_v17, %v5970_v32  ;;  %v2982_v26 = vrot.slane %v2968_v8, %v5928_v35 }
0x1c18   :  { %v6107_v6 = vadd.f32 %v2986_v20, %v5988_v60  ;;  %v2990_v38 = vrot.slane %v2982_v26, %v5970_v32 }
0x1c1a   :  { %v2995_v34 = vsel %vm2341_vm2, %v6107_v6, -inf  ;;  %v6113_v7 = vadd.f32 %v2990_v38, %v5988_v60 }
0x1c1b   :  { %2996 = vmax.xlane.f32.xlu1 %v2995_v34 }
0x1c1c   :  { %v2998_v48 = vsel %vm2341_vm2, %v6113_v7, -inf }
0x1c1d   :  { %2999 = vmax.xlane.f32.xlu0 %v2998_v48 }
0x1c2c   :  { %2935 = vbcast.lane.b32.xlu1 %v5935_v33, 256 }
0x1c30   :  { %2860 = vperm.xlu1 %5074, %v6015_v10  }
0x1c33   :  { %2928 = vbcast.lane.b32.xlu0 %v5911_v24, 256 }
0x1c34   :  { %5075 = vset.pattern.permute.xlu1 %v6993_v52 }
0x1c4d   :  { %v2388_v36 = vpop.permute.xlu1 %2387 }
0x1c4e   :  { %v2397_v45 = vrot.slane %v2388_v36, %v6036_v19 }
0x1c51   :  { %v2391_v37 = vpop.permute.xlu1 %2390 }
0x1c52   :  { %v2401_v55 = vrot.slane %v2391_v37, %v6036_v19 }
0x1c54   :  { %v2402_v49 = vsel %vm2179_vm10, %v2401_v55, %v2397_v45 }
0x1c55   :  { %v6127_v63 = vsel %vm2304_vm4, %v2402_v49, %v5950_v46 }
0x1c56   :  { %v2573_v33 = vrot.slane %v6127_v63, %v5928_v35 }
0x1c58   :  { %v2574_v1 = vcombine.high %v2573_v33, %v2573_v33  ;;  %v2581_v34 = vrot.slane %v2573_v33, %v5928_v35 }
0x1c5a   :  { %v2588_v24 = vrot.slane %v2574_v1, %v5928_v35  ;;  %v2592_v48 = vrot.slane %v2581_v34, %v5970_v32 }
0x1c5c   :  { %v2596_v2 = vrot.slane %v2588_v24, %v5970_v32  ;;  %v2599_v36 = vadd.f32 %v2592_v48, %v5988_v60 }
0x1c5e   :  { %v2600_v3 = vadd.f32 %v2596_v2, %v5988_v60  ;;  %v2601_v37 = vsel %vm2341_vm2, %v2599_v36, -inf }
0x1c60   :  { %v2604_v5 = vsel %vm2341_vm2, %v2600_v3, -inf }
0x1c61   :  { %2605 = vmax.xlane.f32.xlu0 %v2604_v5 }
0x1ca4   :  { %v6135_v14 = vpop.xlane.xlu1 %2996 }
0x1ca6   :  { %v6137_v8 = vpop.xlane.xlu0 %2999 }
0x1ca8   :  { %v6143_v26 = vpop.permute.xlu1 %2935 }
0x1ca9   :  { %v3036_v38 = vadd.f32 %v6137_v8, %v6143_v26 }
0x1caa   :  { %v6139_v17 = vpop.permute.xlu0 %2928 }
0x1cab   :  { %v3035_v20 = vadd.f32 %v6135_v14, %v6139_v17 }
0x1cac   :  { %v6151_v45 = vpop.permute.xlu1 %2860 }
0x1cad   :  { %3040 = vperm.xlu1 %5075, %v3035_v20   ;;  %7049 = vst [vmem:[#allocation18_spill] sm:$0xff] %v6151_v45  ;;  %vm2862_vm6 = vcmp.eq.s32.totalorder %v6151_v45, 1 }
0x1cb1   :  { %3043 = vperm.xlu1 %5075, %v3036_v38  }
0x1cd5   :  { %2602 = vmax.xlane.f32.xlu1 %v2601_v37 }
0x1d28   :  { %v3041_v55 = vpop.permute.xlu1 %3040 }
0x1d29   :  { %v3048_v1 = vrot.slane %v3041_v55, %v6036_v19 }
0x1d2c   :  { %v3044_v49 = vpop.permute.xlu1 %3043 }
0x1d2d   :  { %v3052_v24 = vrot.slane %v3044_v49, %v6036_v19 }
0x1d2f   :  { %v3053_v2 = vsel %vm2179_vm10, %v3052_v24, %v3048_v1  ;;  %v2606_v24 = vpop.xlane.xlu0 %2605 }
0x1d30   :  { %v6159_v33 = vsel %vm2862_vm6, %v3053_v2, %v2757_v13  ;;  %v2608_v2 = vsub.f32 %v2600_v3, %v2606_v24 }
0x1d31   :  { %v3265_v5 = vrot.slane %v6159_v33, %v5928_v35 }
0x1d33   :  { %v3273_v20 = vrot.slane %v3265_v5, %v5928_v35  ;;  %v3266_v38 = vcombine.high %v3265_v5, %v3265_v5  ;;  %v2611_v5 = vmul.f32 1.442695, %v2608_v2 }
0x1d35   :  { %v3284_v34 = vrot.slane %v3273_v20, %v5970_v32  ;;  %v3280_v48 = vrot.slane %v3266_v38, %v5928_v35  ;;  %5198 = vpow2.f32 %v2611_v5  ;;  %v6989_v5 = vmov 4  }
0x1d37   :  { %v6167_v37 = vadd.f32 %v3284_v34, %v5988_v60  ;;  %v3288_v55 = vrot.slane %v3280_v48, %v5970_v32 }
0x1d39   :  { %v3293_v49 = vsel %vm2341_vm2, %v6167_v37, -inf  ;;  %v6173_v13 = vadd.f32 %v3288_v55, %v5988_v60 }
0x1d3a   :  { %3294 = vmax.xlane.f32.xlu0 %v3293_v49 }
0x1d3b   :  { %v3296_v1 = vsel %vm2341_vm2, %v6173_v13, -inf }
0x1d3c   :  { %3297 = vmax.xlane.f32.xlu1 %v3296_v1 }
0x1d42   :  { %v5199_v48 = vpop.eup %5198 }
0x1d43   :  { %v2616_v55 = vsel %vm2341_vm2, %v5199_v48, 0.0 }
0x1d4d   :  { %3233 = vbcast.lane.b32.xlu1 %v5937_v41, 256 }
0x1d50   :  { %3226 = vbcast.lane.b32.xlu0 %v5916_v27, 256 }
0x1d5e   :  { %v2603_v20 = vpop.xlane.xlu1 %2602 }
0x1d5f   :  { %v2607_v38 = vsub.f32 %v2599_v36, %v2603_v20 }
0x1d61   :  { %v2609_v34 = vmul.f32 1.442695, %v2607_v38 }
0x1d63   :  { %5200 = vpow2.f32 %v2609_v34 }
0x1d6f   :  { %2617 = vadd.xlane.f32.xlu0 %v2616_v55 }
0x1d70   :  { %v5201_v49 = vpop.eup %5200 }
0x1d71   :  { %v2613_v9 = vsel %vm2341_vm2, %v5201_v49, 0.0 }
0x1d72   :  { %2614 = vadd.xlane.f32.xlu1 %v2613_v9 }
0x1dc3   :  { %v6181_v1 = vpop.xlane.xlu0 %3294 }
0x1dc5   :  { %v6183_v41 = vpop.xlane.xlu1 %3297 }
0x1dc7   :  { %v6185_v27 = vpop.permute.xlu0 %3226 }
0x1dc8   :  { %v3333_v3 = vadd.f32 %v6181_v1, %v6185_v27 }
0x1dc9   :  { %v6189_v36 = vpop.permute.xlu1 %3233 }
0x1dca   :  { %v3334_v2 = vadd.f32 %v6183_v41, %v6189_v36  ;;  %3338 = vperm.xlu0 %5071, %v3333_v3  }
0x1dcc   :  { %3341 = vperm.xlu1 %5075, %v3334_v2  }
0x1dd0   :  { %5076 = vset.pattern.permute.xlu1 %v6989_v5 }
0x1dd1   :  { %3158 = vperm.xlu1 %5076, %v6015_v10  }
0x1dd5   :  { %5077 = vset.pattern.permute.xlu1 %v6993_v52 }
0x1df8   :  { %v2618_v9 = vpop.xlane.xlu0 %2617 }
0x1df9   :  { %5202 = vlog2.f32 %v2618_v9 }
0x1dfb   :  { %v2615_v38 = vpop.xlane.xlu1 %2614 }
0x1dfc   :  { %5204 = vlog2.f32 %v2615_v38 }
0x1e06   :  { %v5203_v34 = vpop.eup %5202 }
0x1e07   :  { %v2622_v48 = vmul.f32 0.6931472, %v5203_v34 }
0x1e09   :  { %v5205_v55 = vpop.eup %5204  ;;  %v2624_v49 = vadd.f32 %v2622_v48, %v2606_v24 }
0x1e0a   :  { %v2620_v61 = vmul.f32 0.6931472, %v5205_v55 }
0x1e0b   :  { %v2642_v25 = vadd.f32 %v6077_v16, %v2624_v49 }
0x1e0c   :  { %v2623_v3 = vadd.f32 %v2620_v61, %v2603_v20 }
0x1e0d   :  { %2649 = vperm.xlu1 %5077, %v2642_v25  }
0x1e0e   :  { %v2641_v2 = vadd.f32 %v6081_v18, %v2623_v3 }
0x1e10   :  { %2646 = vperm.xlu0 %5071, %v2641_v2  }
0x1e45   :  { %v3339_v15 = vpop.permute.xlu0 %3338 }
0x1e46   :  { %v3346_v9 = vrot.slane %v3339_v15, %v6036_v19 }
0x1e47   :  { %v3342_v5 = vpop.permute.xlu1 %3341 }
0x1e48   :  { %v3350_v52 = vrot.slane %v3342_v5, %v6036_v19 }
0x1e4a   :  { %v3351_v24 = vsel %vm2179_vm10, %v3350_v52, %v3346_v9 }
0x1e4c   :  { %v6200_v58 = vpop.permute.xlu1 %3158 }
0x1e4d   :  { %vm3160_vm7 = vcmp.eq.s32.totalorder %v6200_v58, 1 }
0x1e4e   :  { %v6207_v16 = vsel %vm3160_vm7, %v3351_v24, %v6159_v33 }
0x1e4f   :  { %v3563_v18 = vrot.slane %v6207_v16, %v5928_v35 }
0x1e51   :  { %v3564_v25 = vcombine.high %v3563_v18, %v3563_v18  ;;  %v3571_v61 = vrot.slane %v3563_v18, %v5928_v35 }
0x1e53   :  { %v3582_v20 = vrot.slane %v3571_v61, %v5970_v32  ;;  %v3578_v15 = vrot.slane %v3564_v25, %v5928_v35 }
0x1e55   :  { %v6215_v5 = vadd.f32 %v3582_v20, %v5988_v60  ;;  %v3586_v52 = vrot.slane %v3578_v15, %v5970_v32 }
0x1e57   :  { %v3591_v38 = vsel %vm2341_vm2, %v6215_v5, -inf  ;;  %v6221_v33 = vadd.f32 %v3586_v52, %v5988_v60 }
0x1e58   :  { %3592 = vmax.xlane.f32.xlu0 %v3591_v38 }
0x1e59   :  { %v3594_v34 = vsel %vm2341_vm2, %v6221_v33, -inf }
0x1e5a   :  { %3595 = vmax.xlane.f32.xlu1 %v3594_v34 }
0x1e6b   :  { %3531 = vbcast.lane.b32.xlu1 %v5939_v28, 256 }
0x1e6e   :  { %3524 = vbcast.lane.b32.xlu0 %v5918_v29, 256 }
0x1e88   :  { %v2650_v48 = vpop.permute.xlu1 %2649 }
0x1e89   :  { %v2658_v49 = vrot.slane %v2650_v48, %v6036_v19 }
0x1e8b   :  { %v2647_v55 = vpop.permute.xlu0 %2646 }
0x1e8c   :  { %v2654_v3 = vrot.slane %v2647_v55, %v6036_v19 }
0x1e8e   :  { %v2659_v2 = vsel %vm2179_vm10, %v2658_v49, %v2654_v3 }
0x1e8f   :  { %v6233_v9 = vsel %vm2564_vm5, %v2659_v2, %v6127_v63  ;;  %v6997_v2 = vmov 5  }
0x1e90   :  { %v2871_v24 = vrot.slane %v6233_v9, %v5928_v35 }
0x1e92   :  { %v2879_v28 = vrot.slane %v2871_v24, %v5928_v35  ;;  %v2872_v18 = vcombine.high %v2871_v24, %v2871_v24  ;;  %v7050_v24 = vmov 0  }
0x1e94   :  { %v2890_v29 = vrot.slane %v2879_v28, %v5970_v32  ;;  %v2886_v25 = vrot.slane %v2872_v18, %v5928_v35 }
0x1e96   :  { %v2897_v61 = vadd.f32 %v2890_v29, %v5988_v60  ;;  %v2894_v20 = vrot.slane %v2886_v25, %v5970_v32 }
0x1e98   :  { %v2899_v15 = vsel %vm2341_vm2, %v2897_v61, -inf  ;;  %v2898_v52 = vadd.f32 %v2894_v20, %v5988_v60 }
0x1e99   :  { %2900 = vmax.xlane.f32.xlu0 %v2899_v15 }
0x1e9a   :  { %v2902_v63 = vsel %vm2341_vm2, %v2898_v52, -inf }
0x1e9b   :  { %2903 = vmax.xlane.f32.xlu1 %v2902_v63 }
0x1ee1   :  { %v6245_v38 = vpop.xlane.xlu0 %3592 }
0x1ee3   :  { %v6247_v34 = vpop.xlane.xlu1 %3595 }
0x1ee5   :  { %v6249_v48 = vpop.permute.xlu0 %3524 }
0x1ee6   :  { %v3631_v55 = vadd.f32 %v6245_v38, %v6249_v48 }
0x1ee7   :  { %v6253_v49 = vpop.permute.xlu1 %3531 }
0x1ee8   :  { %v3632_v3 = vadd.f32 %v6247_v34, %v6253_v49  ;;  %3636 = vperm.xlu0 %5071, %v3631_v55  }
0x1eea   :  { %3639 = vperm.xlu1 %5077, %v3632_v3  }
0x1eec   :  { %5078 = vset.pattern.permute.xlu0 %v6997_v2 }
0x1eed   :  { %3456 = vperm.xlu0 %5078, %v6015_v10  }
0x1ef1   :  { %5079 = vset.pattern.permute.xlu0 %v7050_v24 }
0x1f22   :  { %v2901_v28 = vpop.xlane.xlu0 %2900 }
0x1f23   :  { %v2905_v18 = vsub.f32 %v2897_v61, %v2901_v28 }
0x1f24   :  { %v2904_v29 = vpop.xlane.xlu1 %2903 }
0x1f25   :  { %v2907_v25 = vmul.f32 1.442695, %v2905_v18  ;;  %v2906_v20 = vsub.f32 %v2898_v52, %v2904_v29 }
0x1f27   :  { %5206 = vpow2.f32 %v2907_v25  ;;  %v2909_v15 = vmul.f32 1.442695, %v2906_v20 }
0x1f29   :  { %5208 = vpow2.f32 %v2909_v15 }
0x1f34   :  { %v5207_v63 = vpop.eup %5206 }
0x1f35   :  { %v2911_v4 = vsel %vm2341_vm2, %v5207_v63, 0.0 }
0x1f36   :  { %v5209_v55 = vpop.eup %5208  ;;  %2912 = vadd.xlane.f32.xlu1 %v2911_v4 }
0x1f37   :  { %v2914_v3 = vsel %vm2341_vm2, %v5209_v55, 0.0 }
0x1f38   :  { %2915 = vadd.xlane.f32.xlu0 %v2914_v3 }
0x1f63   :  { %v3637_v2 = vpop.permute.xlu0 %3636 }
0x1f64   :  { %v3644_v0 = vrot.slane %v3637_v2, %v6036_v19 }
0x1f65   :  { %v3640_v46 = vpop.permute.xlu1 %3639 }
0x1f66   :  { %v3648_v61 = vrot.slane %v3640_v46, %v6036_v19 }
0x1f68   :  { %v3649_v18 = vsel %vm2179_vm10, %v3648_v61, %v3644_v0  ;;  %v6265_v52 = vpop.permute.xlu0 %3456 }
0x1f69   :  { %vm3458_vm8 = vcmp.eq.s32.totalorder %v6265_v52, 1 }
0x1f6a   :  { %v6271_v25 = vsel %vm3458_vm8, %v3649_v18, %v6207_v16 }
0x1f6b   :  { %v3861_v4 = vrot.slane %v6271_v25, %v5928_v35 }
0x1f6d   :  { %v3862_v20 = vcombine.high %v3861_v4, %v3861_v4  ;;  %v3869_v15 = vrot.slane %v3861_v4, %v5928_v35 }
0x1f6f   :  { %v3880_v2 = vrot.slane %v3869_v15, %v5970_v32  ;;  %v3876_v46 = vrot.slane %v3862_v20, %v5928_v35 }
0x1f71   :  { %v6279_v0 = vadd.f32 %v3880_v2, %v5988_v60  ;;  %v3884_v63 = vrot.slane %v3876_v46, %v5970_v32 }
0x1f73   :  { %v3889_v55 = vsel %vm2341_vm2, %v6279_v0, -inf  ;;  %v6285_v16 = vadd.f32 %v3884_v63, %v5988_v60 }
0x1f74   :  { %3890 = vmax.xlane.f32.xlu1 %v3889_v55 }
0x1f75   :  { %v3892_v3 = vsel %vm2341_vm2, %v6285_v16, -inf }
0x1f76   :  { %3893 = vmax.xlane.f32.xlu0 %v3892_v3 }
0x1f85   :  { %3822 = vbcast.lane.b32.xlu1 %v5920_v62, 256 }
0x1f8c   :  { %3829 = vbcast.lane.b32.xlu0 %v5941_v43, 256 }
0x1fbf   :  { %v2913_v61 = vpop.xlane.xlu1 %2912 }
0x1fc0   :  { %5210 = vlog2.f32 %v2913_v61 }
0x1fc1   :  { %v2916_v18 = vpop.xlane.xlu0 %2915 }
0x1fc2   :  { %5212 = vlog2.f32 %v2916_v18 }
0x1fcd   :  { %v5211_v4 = vpop.eup %5210 }
0x1fce   :  { %v2918_v20 = vmul.f32 0.6931472, %v5211_v4 }
0x1fcf   :  { %v5213_v15 = vpop.eup %5212 }
0x1fd0   :  { %v2921_v2 = vadd.f32 %v2918_v20, %v2901_v28  ;;  %v2920_v46 = vmul.f32 0.6931472, %v5213_v15 }
0x1fd2   :  { %v2922_v63 = vadd.f32 %v2920_v46, %v2904_v29  ;;  %v2939_v55 = vadd.f32 %v6139_v17, %v2921_v2  ;;  %v7002_v17 = vmov 6  }
0x1fd4   :  { %2944 = vperm.xlu0 %5079, %v2939_v55   ;;  %v2940_v11 = vadd.f32 %v6143_v26, %v2922_v63 }
0x1fd6   :  { %2947 = vperm.xlu1 %5077, %v2940_v11   ;;  %v7004_v11 = vmov 7  }
0x1fd8   :  { %5082 = vset.pattern.permute.xlu0 %v7004_v11 }
0x1ffd   :  { %v6293_v3 = vpop.xlane.xlu1 %3890 }
0x1fff   :  { %v6295_v62 = vpop.xlane.xlu0 %3893 }
0x2001   :  { %v6297_v43 = vpop.permute.xlu1 %3822 }
0x2002   :  { %v3929_v61 = vadd.f32 %v6293_v3, %v6297_v43 }
0x2003   :  { %v6301_v18 = vpop.permute.xlu0 %3829 }
0x2004   :  { %3934 = vperm.xlu1 %5077, %v3929_v61   ;;  %v3930_v28 = vadd.f32 %v6295_v62, %v6301_v18 }
0x2008   :  { %3937 = vperm.xlu1 %5077, %v3930_v28  }
0x200c   :  { %5080 = vset.pattern.permute.xlu1 %v7002_v17 }
0x200d   :  { %3754 = vperm.xlu1 %5080, %v6015_v10  }
0x2011   :  { %5081 = vset.pattern.permute.xlu1 %v7050_v24 }
0x204f   :  { %v2945_v26 = vpop.permute.xlu0 %2944 }
0x2050   :  { %v2952_v4 = vrot.slane %v2945_v26, %v6036_v19 }
0x2051   :  { %v2948_v29 = vpop.permute.xlu1 %2947 }
0x2052   :  { %v2956_v20 = vrot.slane %v2948_v29, %v6036_v19 }
0x2054   :  { %v2957_v15 = vsel %vm2179_vm10, %v2956_v20, %v2952_v4 }
0x2055   :  { %v6315_v2 = vsel %vm2862_vm6, %v2957_v15, %v6233_v9 }
0x2056   :  { %v3169_v46 = vrot.slane %v6315_v2, %v5928_v35 }
0x2058   :  { %v3177_v63 = vrot.slane %v3169_v46, %v5928_v35  ;;  %v3170_v55 = vcombine.high %v3169_v46, %v3169_v46 }
0x205a   :  { %v3188_v61 = vrot.slane %v3177_v63, %v5970_v32  ;;  %v3184_v28 = vrot.slane %v3170_v55, %v5928_v35 }
0x205c   :  { %v3195_v26 = vadd.f32 %v3188_v61, %v5988_v60  ;;  %v3192_v29 = vrot.slane %v3184_v28, %v5970_v32 }
0x205e   :  { %v3197_v4 = vsel %vm2341_vm2, %v3195_v26, -inf  ;;  %v3196_v20 = vadd.f32 %v3192_v29, %v5988_v60 }
0x205f   :  { %3198 = vmax.xlane.f32.xlu0 %v3197_v4 }
0x2060   :  { %v3200_v9 = vsel %vm2341_vm2, %v3196_v20, -inf }
0x2063   :  { %3201 = vmax.xlane.f32.xlu0 %v3200_v9 }
0x207f   :  { %v3935_v15 = vpop.permute.xlu1 %3934 }
0x2080   :  { %v3942_v63 = vrot.slane %v3935_v15, %v6036_v19 }
0x2083   :  { %v3938_v17 = vpop.permute.xlu1 %3937 }
0x2084   :  { %v3946_v46 = vrot.slane %v3938_v17, %v6036_v19 }
0x2086   :  { %v3947_v55 = vsel %vm2179_vm10, %v3946_v46, %v3942_v63 }
0x2088   :  { %v6329_v11 = vpop.permute.xlu1 %3754 }
0x2089   :  { %vm3756_vm9 = vcmp.eq.s32.totalorder %v6329_v11, 1 }
0x208a   :  { %v3949_v61 = vsel %vm3756_vm9, %v3947_v55, %v6271_v25 }
0x208b   :  { %v4166_v28 = vrot.slane %v3949_v61, %v5928_v35 }
0x208d   :  { %v4167_v29 = vcombine.high %v4166_v28, %v4166_v28  ;;  %v4174_v4 = vrot.slane %v4166_v28, %v5928_v35 }
0x208f   :  { %v4185_v9 = vrot.slane %v4174_v4, %v5970_v32  ;;  %v4181_v17 = vrot.slane %v4167_v29, %v5928_v35 }
0x2091   :  { %v4192_v15 = vadd.f32 %v4185_v9, %v5988_v60  ;;  %v4189_v45 = vrot.slane %v4181_v17, %v5970_v32 }
0x2093   :  { %v4194_v46 = vsel %vm2341_vm2, %v4192_v15, -inf  ;;  %v6344_v63 = vadd.f32 %v4189_v45, %v5988_v60 }
0x2094   :  { %4195 = vmax.xlane.f32.xlu0 %v4194_v46 }
0x2095   :  { %v4197_v25 = vsel %vm2341_vm2, %v6344_v63, -inf }
0x2096   :  { %4198 = vmax.xlane.f32.xlu1 %v4197_v25 }
0x20a7   :  { %4127 = vbcast.lane.b32.xlu1 %v5922_v30, 256 }
0x20aa   :  { %4134 = vbcast.lane.b32.xlu0 %v5948_v22, 256 }
0x20ae   :  { %4059 = vperm.xlu0 %5082, %v6015_v10  }
0x20b2   :  { %5083 = vset.pattern.permute.xlu0 %v7050_v24 }
0x20e8   :  { %v3199_v55 = vpop.xlane.xlu0 %3198 }
0x20e9   :  { %v3203_v42 = vsub.f32 %v3195_v26, %v3199_v55 }
0x20ec   :  { %v3202_v28 = vpop.xlane.xlu0 %3201 }
0x20ed   :  { %v3204_v29 = vsub.f32 %v3196_v20, %v3202_v28  ;;  %v3205_v20 = vmul.f32 1.442695, %v3203_v42  ;;  %v4722_v42 = vld [vmem:[%s6962_s24] ss:$0 sm:$0xff] }
0x20ef   :  { %v3207_v4 = vmul.f32 1.442695, %v3204_v29 }
0x20f1   :  { %5214 = vpow2.f32 %v3207_v4 }
0x20f2   :  { %5216 = vpow2.f32 %v3205_v20 }
0x20fe   :  { %v5215_v45 = vpop.eup %5214 }
0x20ff   :  { %v3212_v9 = vsel %vm2341_vm2, %v5215_v45, 0.0  ;;  %v5217_v29 = vpop.eup %5216 }
0x2100   :  { %3213 = vadd.xlane.f32.xlu0 %v3212_v9  ;;  %v3209_v4 = vsel %vm2341_vm2, %v5217_v29, 0.0 }
0x211d   :  { %v4196_v17 = vpop.xlane.xlu0 %4195 }
0x211e   :  { %vm4200_vm13 = vcmp.ge.f32.partialorder %v4192_v15, %v4196_v17 }
0x211f   :  { %v4199_v46 = vpop.xlane.xlu1 %4198 }
0x2120   :  { %vm4201_vm14 = vcmp.ge.f32.partialorder %v6344_v63, %v4199_v46 }
0x2121   :  { %v6356_v22 = vpop.permute.xlu0 %4134 }
0x2122   :  { %v4235_v10 = vadd.f32 %v4199_v46, %v6356_v22 }
0x2123   :  { %v6353_v25 = vpop.permute.xlu1 %4127 }
0x2124   :  { %v4234_v30 = vadd.f32 %v4196_v17, %v6353_v25 }
0x2126   :  { %4239 = vperm.xlu1 %5081, %v4234_v30  }
0x2129   :  { %v6360_v45 = vpop.permute.xlu0 %4059 }
0x212a   :  { %4242 = vperm.xlu1 %5081, %v4235_v10   ;;  %7051 = vst [vmem:[#allocation19_spill] sm:$0xff] %v6360_v45  ;;  %vm4061_vm11 = vcmp.eq.s32.totalorder %v6360_v45, 1 }
0x214e   :  { %3210 = vadd.xlane.f32.xlu1 %v3209_v4 }
0x2189   :  { %v3214_v9 = vpop.xlane.xlu0 %3213 }
0x218a   :  { %5218 = vlog2.f32 %v3214_v9 }
0x2197   :  { %v5219_v4 = vpop.eup %5218 }
0x21a1   :  { %v4240_v12 = vpop.permute.xlu1 %4239 }
0x21a2   :  { %v4247_v21 = vrot.slane %v4240_v12, %v6036_v19  ;;  %v3218_v12 = vmul.f32 0.6931472, %v5219_v4 }
0x21a4   :  { %v3220_v9 = vadd.f32 %v3218_v12, %v3202_v28 }
0x21a5   :  { %v4243_v53 = vpop.permute.xlu1 %4242 }
0x21a6   :  { %v4251_v30 = vrot.slane %v4243_v53, %v6036_v19  ;;  %v3238_v53 = vadd.f32 %v6189_v36, %v3220_v9  ;;  %v4203_v36 = vsel %vm4201_vm14, %v6032_v54, 5 }
0x21a7   :  { %v4219_v15 = vsel %vm2341_vm2, %v4203_v36, 2147483647 }
0x21a8   :  { %v4252_v26 = vsel %vm2179_vm10, %v4251_v30, %v4247_v21  ;;  %v4202_v21 = vsel %vm4200_vm13, %v6032_v54, 5  ;;  %v4221_v28 = vshra.s32 %v4219_v15, 16 }
0x21a9   :  { %v4254_v10 = vsel %vm4061_vm11, %v4252_v26, %v3949_v61  ;;  %v4204_v57 = vsel %vm2341_vm2, %v4202_v21, 2147483647 }
0x21aa   :  { %v4303_v20 = vadd.f32 %v4722_v42, %v4254_v10  ;;  %v4206_v45 = vshra.s32 %v4204_v57, 16  ;;  %v4223_v17 = vcvt.s32.f32 %v4221_v28 }
0x21ac   :  { %v4304_v29 = vsel %vm2189_vm12, %v4303_v20, -inf  ;;  %v4208_v61 = vcvt.s32.f32 %v4206_v45 }
0x21ad   :  { %4305 = vmax.xlane.f32.xlu1 %v4304_v29 }
0x21be   :  { %3245 = vperm.xlu1 %5081, %v3238_v53  }
0x21d7   :  { %v3211_v30 = vpop.xlane.xlu1 %3210 }
0x21d8   :  { %5220 = vlog2.f32 %v3211_v30 }
0x21e2   :  { %4209 = vmin.xlane.f32.xlu1 %v4208_v61 }
0x21e5   :  { %v5221_v26 = vpop.eup %5220 }
0x21e6   :  { %v3216_v42 = vmul.f32 0.6931472, %v5221_v26 }
0x21e8   :  { %v3219_v10 = vadd.f32 %v3216_v42, %v3199_v55 }
0x21ea   :  { %v3237_v29 = vadd.f32 %v6185_v27, %v3219_v10 }
0x21ec   :  { %3242 = vperm.xlu0 %5083, %v3237_v29  }
0x220b   :  { %4224 = vmin.xlane.f32.xlu0 %v4223_v17 }
0x2236   :  { %v4306_v4 = vpop.xlane.xlu1 %4305 }
0x2237   :  { %vm4307_vm15 = vcmp.ge.f32.partialorder %v4303_v20, %v4306_v4 }
0x2238   :  { %v4308_v45 = vsel %vm4307_vm15, %v6032_v54, 5  ;;  %vm3895_vm15 = vcmp.ge.f32.partialorder %v6279_v0, %v6293_v3 }
0x2239   :  { %v4309_v12 = vsel %vm2189_vm12, %v4308_v45, 2147483647 }
0x223a   :  { %v4311_v9 = vshra.s32 %v4309_v12, 16  ;;  %v3246_v27 = vpop.permute.xlu1 %3245 }
0x223b   :  { %v3254_v63 = vrot.slane %v3246_v27, %v6036_v19 }
0x223c   :  { %v4313_v55 = vcvt.s32.f32 %v4311_v9  ;;  %v4205_v9 = vand.u32 65535, %v4204_v57 }
0x223e   :  { %4314 = vmin.xlane.f32.xlu1 %v4313_v55 }
0x2267   :  { %v3243_v53 = vpop.permute.xlu0 %3242 }
0x2268   :  { %v3250_v46 = vrot.slane %v3243_v53, %v6036_v19  ;;  %v4207_v53 = vcvt.s32.f32 %v4205_v9 }
0x226a   :  { %v3255_v21 = vsel %vm2179_vm10, %v3254_v63, %v3250_v46  ;;  %v4220_v46 = vand.u32 65535, %v4219_v15 }
0x226b   :  { %v6387_v30 = vsel %vm3160_vm7, %v3255_v21, %v6315_v2  ;;  %v4210_v2 = vpop.xlane.xlu1 %4209 }
0x226c   :  { %v3467_v20 = vrot.slane %v6387_v30, %v5928_v35  ;;  %vm4211_vm0 = vcmp.eq.f32.partialorder %v4208_v61, %v4210_v2 }
0x226d   :  { %v4212_v63 = vsel %vm4211_vm0, %v4207_v53, inf  ;;  %vm3896_vm0 = vcmp.ge.f32.partialorder %v6285_v16, %v6295_v62 }
0x226e   :  { %v3475_v26 = vrot.slane %v3467_v20, %v5928_v35  ;;  %v3468_v42 = vcombine.high %v3467_v20, %v3467_v20  ;;  %v4222_v20 = vcvt.s32.f32 %v4220_v46 }
0x2270   :  { %v3486_v10 = vrot.slane %v3475_v26, %v5970_v32  ;;  %v3482_v29 = vrot.slane %v3468_v42, %v5928_v35  ;;  %v4310_v42 = vand.u32 65535, %v4309_v12 }
0x2272   :  { %v3493_v36 = vadd.f32 %v3486_v10, %v5988_v60  ;;  %v3490_v28 = vrot.slane %v3482_v29, %v5970_v32  ;;  %v4312_v29 = vcvt.s32.f32 %v4310_v42  ;;  %v4216_v42 = vcvt.f32.s32 %v4210_v2 }
0x2274   :  { %v3495_v4 = vsel %vm2341_vm2, %v3493_v36, -inf  ;;  %v3494_v45 = vadd.f32 %v3490_v28, %v5988_v60 }
0x2275   :  { %3496 = vmax.xlane.f32.xlu1 %v3495_v4 }
0x2276   :  { %v3498_v27 = vsel %vm2341_vm2, %v3494_v45, -inf }
0x2279   :  { %3499 = vmax.xlane.f32.xlu1 %v3498_v27 }
0x227d   :  { %4213 = vmin.xlane.f32.xlu1 %v4212_v63 }
0x2294   :  { %v4225_v21 = vpop.xlane.xlu0 %4224 }
0x2295   :  { %vm4226_vm13 = vcmp.eq.f32.partialorder %v4223_v17, %v4225_v21  ;;  %v3897_v17 = vsel %vm3895_vm15, %v6032_v54, 5 }
0x2296   :  { %v4227_v26 = vsel %vm4226_vm13, %v4222_v20, inf  ;;  %v3899_v12 = vsel %vm2341_vm2, %v3897_v17, 2147483647 }
0x2297   :  { %4228 = vmin.xlane.f32.xlu1 %v4227_v26  ;;  %v3901_v27 = vshra.s32 %v3899_v12, 16  ;;  %v4231_v26 = vcvt.f32.s32 %v4225_v21 }
0x2299   :  { %v3903_v46 = vcvt.s32.f32 %v3901_v27 }
0x22c7   :  { %v4315_v10 = vpop.xlane.xlu1 %4314 }
0x22c8   :  { %vm4316_vm14 = vcmp.eq.f32.partialorder %v4313_v55, %v4315_v10  ;;  %v3898_v55 = vsel %vm3896_vm0, %v6032_v54, 5  ;;  %vm3598_vm0 = vcmp.ge.f32.partialorder %v6221_v33, %v6247_v34  ;;  %v7054_v34 = vmov 6  }
0x22c9   :  { %v4317_v60 = vsel %vm4316_vm14, %v4312_v29, inf }
0x22ca   :  { %4318 = vmin.xlane.f32.xlu0 %v4317_v60  ;;  %v4232_v60 = vshll.u32 %v4231_v26, 16 }
0x22fe   :  { %v6399_v57 = vpop.xlane.xlu1 %3496 }
0x22ff   :  { %v3501_v28 = vsub.f32 %v3493_v36, %v6399_v57 }
0x2301   :  { %v3503_v61 = vmul.f32 1.442695, %v3501_v28 }
0x2302   :  { %v6402_v4 = vpop.xlane.xlu1 %3499 }
0x2303   :  { %5222 = vpow2.f32 %v3503_v61  ;;  %v3502_v15 = vsub.f32 %v3494_v45, %v6402_v4  ;;  %v3914_v45 = vsel %vm2341_vm2, %v3898_v55, 2147483647  ;;  %v4217_v61 = vshll.u32 %v4216_v42, 16 }
0x2304   :  { %v3916_v0 = vshra.s32 %v3914_v45, 16 }
0x2305   :  { %v3505_v9 = vmul.f32 1.442695, %v3502_v15  ;;  %v4321_v15 = vcvt.f32.s32 %v4315_v10 }
0x2306   :  { %v3918_v20 = vcvt.s32.f32 %v3916_v0  ;;  %v4214_v16 = vpop.xlane.xlu1 %4213 }
0x2307   :  { %5224 = vpow2.f32 %v3505_v9  ;;  %v4215_v28 = vcvt.f32.s32 %v4214_v16 }
0x2309   :  { %v4218_v17 = vadd.s32 %v4217_v61, %v4215_v28 }
0x2310   :  { %v5223_v36 = vpop.eup %5222 }
0x2311   :  { %v3507_v53 = vsel %vm2341_vm2, %v5223_v36, 0.0  ;;  %v4322_v36 = vshll.u32 %v4321_v15, 16  ;;  %v3915_v15 = vand.u32 65535, %v3914_v45 }
0x2312   :  { %3508 = vadd.xlane.f32.xlu1 %v3507_v53 }
0x2314   :  { %v5225_v63 = vpop.eup %5224 }
0x2315   :  { %v3510_v3 = vsel %vm2341_vm2, %v5225_v63, 0.0  ;;  %v4332_v63 = vrot.slane %v4218_v17, %v6036_v19 }
0x2316   :  { %3511 = vadd.xlane.f32.xlu0 %v3510_v3  ;;  %3904 = vmin.xlane.f32.xlu1 %v3903_v46 }
0x231a   :  { %3919 = vmin.xlane.f32.xlu0 %v3918_v20 }
0x2320   :  { %v4229_v62 = vpop.xlane.xlu1 %4228 }
0x2321   :  { %v4230_v29 = vcvt.f32.s32 %v4229_v62 }
0x2323   :  { %v4233_v9 = vadd.s32 %v4232_v60, %v4230_v29  ;;  %v3900_v29 = vand.u32 65535, %v3899_v12 }
0x2325   :  { %v4336_v27 = vrot.slane %v4233_v9, %v6036_v19  ;;  %v3902_v61 = vcvt.s32.f32 %v3900_v29 }
0x2327   :  { %v4337_v2 = vsel %vm2179_vm10, %v4336_v27, %v4332_v63 }
0x2353   :  { %v4319_v55 = vpop.xlane.xlu0 %4318 }
0x2354   :  { %v4320_v53 = vcvt.f32.s32 %v4319_v55  ;;  %v3917_v55 = vcvt.s32.f32 %v3915_v15 }
0x2356   :  { %v6417_v0 = vadd.s32 %v4322_v36, %v4320_v53 }
0x2358   :  { %vm4328_vm13 = vcmp.eq.s32.totalorder %v6032_v54, %v6417_v0 }
0x2359   :  { %v4338_v21 = vsel %vm4328_vm13, %v4337_v2, 0  ;;  %vm3597_vm13 = vcmp.ge.f32.partialorder %v6215_v5, %v6245_v38 }
0x235a   :  { %v4339_v3 = vsel %vm2189_vm12, %v4338_v21, 0 }
0x235b   :  { %v4341_v10 = vshrl.u32 %v4339_v3, 16  ;;  %v4340_v16 = vand.u32 65535, %v4339_v3 }
0x235d   :  { %v4343_v62 = vcvt.s32.f32 %v4341_v10  ;;  %v4342_v26 = vcvt.s32.f32 %v4340_v16  ;;  %v7053_v10 = vmov 5  }
0x235f   :  { %4346 = vadd.xlane.f32.xlu1 %v4343_v62  ;;  %4344 = vadd.xlane.f32.xlu0 %v4342_v26 }
0x239b   :  { %v3509_v42 = vpop.xlane.xlu1 %3508 }
0x239c   :  { %5226 = vlog2.f32 %v3509_v42 }
0x239f   :  { %v6423_v60 = vpop.xlane.xlu1 %3904  ;;  %v3512_v28 = vpop.xlane.xlu0 %3511 }
0x23a0   :  { %vm3906_vm14 = vcmp.eq.f32.partialorder %v3903_v46, %v6423_v60  ;;  %5228 = vlog2.f32 %v3512_v28  ;;  %v7052_v46 = vmov 7   ;;  %v3599_v28 = vsel %vm3597_vm13, %v6032_v54, 5 }
0x23a1   :  { %v3907_v9 = vsel %vm3906_vm14, %v3902_v61, inf  ;;  %v3601_v61 = vsel %vm2341_vm2, %v3599_v28, 2147483647  ;;  %vm3299_vm13 = vcmp.ge.f32.partialorder %v6167_v37, %v6181_v1 }
0x23a2   :  { %3908 = vmin.xlane.f32.xlu1 %v3907_v9  ;;  %v3603_v15 = vshra.s32 %v3601_v61, 16 }
0x23a3   :  { %v3920_v17 = vpop.xlane.xlu0 %3919 }
0x23a4   :  { %vm3921_vm15 = vcmp.eq.f32.partialorder %v3918_v20, %v3920_v17  ;;  %v3600_v20 = vsel %vm3598_vm0, %v6032_v54, 5  ;;  %v3605_v9 = vcvt.s32.f32 %v3603_v15 }
0x23a5   :  { %v3922_v36 = vsel %vm3921_vm15, %v3917_v55, inf }
0x23a6   :  { %3923 = vmin.xlane.f32.xlu0 %v3922_v36 }
0x23a9   :  { %v5227_v27 = vpop.eup %5226 }
0x23aa   :  { %v3514_v53 = vmul.f32 0.6931472, %v5227_v27 }
0x23ac   :  { %v3517_v12 = vadd.f32 %v3514_v53, %v6399_v57  ;;  %v6436_v57 = vsel %vm2341_vm2, %v3600_v20, 2147483647 }
0x23ad   :  { %v5229_v63 = vpop.eup %5228 }
0x23ae   :  { %v3535_v2 = vadd.f32 %v6249_v48, %v3517_v12  ;;  %v3516_v21 = vmul.f32 0.6931472, %v5229_v63  ;;  %v3618_v48 = vshra.s32 %v6436_v57, 16 }
0x23b0   :  { %v3518_v45 = vadd.f32 %v3516_v21, %v6402_v4  ;;  %v6439_v16 = vcvt.s32.f32 %v3618_v48  ;;  %v6469_v48 = vld [vmem:[%s6960_s22] sm:$0x1f]  ;;  %s5316_s22 = smov 127  }
0x23b2   :  { %v3536_v3 = vadd.f32 %v6253_v49, %v3518_v45 }
0x23b3   :  { %3540 = vperm.xlu1 %5081, %v3535_v2  }
0x23b7   :  { %5084 = vset.pattern.permute.xlu1 %v7052_v46 }
0x23bc   :  { %3543 = vperm.xlu0 %5083, %v3536_v3  }
0x23c0   :  { %5087 = vset.pattern.permute.xlu0 %v7053_v10 }
0x23db   :  { %3621 = vmin.xlane.f32.xlu0 %v6439_v16 }
0x23e8   :  { %v4347_v4 = vpop.xlane.xlu1 %4346  ;;  %v4345_v62 = vpop.xlane.xlu0 %4344 }
0x23e9   :  { %v4349_v49 = vcvt.f32.s32 %v4347_v4  ;;  %v4348_v42 = vcvt.f32.s32 %v4345_v62 }
0x23eb   :  { %v4350_v26 = vshll.u32 %v4349_v49, 16 }
0x23ed   :  { %v4351_v29 = vadd.s32 %v4350_v26, %v4348_v42  ;;  %v3926_v42 = vcvt.f32.s32 %v3920_v17 }
0x23ef   :  { %v6445_v33 = vsel %vm2299_vm3, %v4351_v29, %v6417_v0  ;;  %v3911_v29 = vcvt.f32.s32 %v6423_v60  ;;  %v3927_v15 = vshll.u32 %v3926_v42, 16 }
0x23f0   :  { %4361 = vperm.xlu1 %5084, %v6445_v33  }
0x23f4   :  { %5085 = vset.pattern.permute.xlu1 %v7054_v34 }
0x2414   :  { %3606 = vmin.xlane.f32.xlu1 %v3605_v9 }
0x242b   :  { %v3909_v55 = vpop.xlane.xlu1 %3908 }
0x242f   :  { %v3924_v36 = vpop.xlane.xlu0 %3923  ;;  %v3541_v27 = vpop.permute.xlu1 %3540 }
0x2430   :  { %v3548_v12 = vrot.slane %v3541_v27, %v6036_v19  ;;  %v3925_v28 = vcvt.f32.s32 %v3924_v36  ;;  %v3910_v27 = vcvt.f32.s32 %v3909_v55  ;;  %v3602_v55 = vand.u32 65535, %v3601_v61 }
0x2431   :  { %v3301_v61 = vsel %vm3299_vm13, %v6032_v54, 5 }
0x2432   :  { %v3604_v42 = vcvt.s32.f32 %v3602_v55 }
0x2437   :  { %v3544_v53 = vpop.permute.xlu0 %3543 }
0x2438   :  { %v3552_v63 = vrot.slane %v3544_v53, %v6036_v19  ;;  %v3912_v53 = vshll.u32 %v3911_v29, 16  ;;  %v3617_v29 = vand.u32 65535, %v6436_v57  ;;  %v6495_v57 = vsel %vm2341_vm2, %v3301_v61, 2147483647 }
0x243a   :  { %v3553_v2 = vsel %vm2179_vm10, %v3552_v63, %v3548_v12  ;;  %v3928_v12 = vadd.s32 %v3927_v15, %v3925_v28  ;;  %v3913_v63 = vadd.s32 %v3912_v53, %v3910_v27  ;;  %v3619_v15 = vcvt.s32.f32 %v3617_v29 }
0x243b   :  { %v6459_v5 = vsel %vm3458_vm8, %v3553_v2, %v6387_v30 }
0x243c   :  { %v3765_v38 = vrot.slane %v6459_v5, %v5928_v35  ;;  %v4371_v2 = vrot.slane %v3928_v12, %v6036_v19 }
0x243e   :  { %v3773_v21 = vrot.slane %v3765_v38, %v5928_v35  ;;  %v3766_v45 = vcombine.high %v3765_v38, %v3765_v38  ;;  %v4367_v38 = vrot.slane %v3913_v63, %v6036_v19 }
0x2440   :  { %v3784_v3 = vrot.slane %v3773_v21, %v5970_v32  ;;  %v3780_v20 = vrot.slane %v3766_v45, %v5928_v35  ;;  %v4372_v45 = vsel %vm2179_vm10, %v4371_v2, %v4367_v38  ;;  %v3305_v2 = vshra.s32 %v6495_v57, 16 }
0x2442   :  { %v3791_v4 = vadd.f32 %v6469_v48, %v3784_v3  ;;  %v3788_v30 = vrot.slane %v3780_v20, %v5970_v32 }
0x2444   :  { %v3793_v62 = vsel %vm2341_vm2, %v3791_v4, -inf  ;;  %v6475_v49 = vadd.f32 %v6469_v48, %v3788_v30 }
0x2445   :  { %3794 = vmax.xlane.f32.xlu0 %v3793_v62 }
0x2446   :  { %v3796_v26 = vsel %vm2341_vm2, %v6475_v49, -inf }
0x2447   :  { %3797 = vmax.xlane.f32.xlu1 %v3796_v26 }
0x2464   :  { %v3622_v62 = vpop.xlane.xlu0 %3621 }
0x2465   :  { %vm3623_vm0 = vcmp.eq.f32.partialorder %v6439_v16, %v3622_v62 }
0x2466   :  { %v3624_v27 = vsel %vm3623_vm0, %v3619_v15, inf }
0x246b   :  { %v4362_v21 = vpop.permute.xlu1 %4361 }
0x246c   :  { %vm4363_vm14 = vcmp.eq.s32.totalorder %v6032_v54, %v4362_v21  ;;  %v6501_v21 = vcvt.s32.f32 %v3305_v2 }
0x246d   :  { %v4373_v3 = vsel %vm4363_vm14, %v4372_v45, 0  ;;  %vm3300_vm14 = vcmp.ge.f32.partialorder %v6173_v13, %v6183_v41 }
0x246e   :  { %v4374_v17 = vsel %vm2189_vm12, %v4373_v3, 0  ;;  %v3302_v16 = vsel %vm3300_vm14, %v6032_v54, 5  ;;  %vm3001_vm14 = vcmp.ge.f32.partialorder %v6107_v6, %v6135_v14 }
0x246f   :  { %v4376_v20 = vshrl.u32 %v4374_v17, 16  ;;  %v4375_v60 = vand.u32 65535, %v4374_v17  ;;  %v3318_v38 = vsel %vm2341_vm2, %v3302_v16, 2147483647 }
0x2470   :  { %v3320_v37 = vshra.s32 %v3318_v38, 16 }
0x2471   :  { %v4378_v36 = vcvt.s32.f32 %v4376_v20  ;;  %v4377_v30 = vcvt.s32.f32 %v4375_v60 }
0x2472   :  { %v3322_v1 = vcvt.s32.f32 %v3320_v37 }
0x2473   :  { %4381 = vadd.xlane.f32.xlu0 %v4378_v36  ;;  %4379 = vadd.xlane.f32.xlu1 %v4377_v30 }
0x2489   :  { %4387 = vrot.lane.b32.xlu0 %v6445_v33, %s5316_s22 }
0x249d   :  { %v3607_v26 = vpop.xlane.xlu1 %3606 }
0x249e   :  { %vm3608_vm15 = vcmp.eq.f32.partialorder %v3605_v9, %v3607_v26  ;;  %v3613_v61 = vcvt.f32.s32 %v3607_v26 }
0x249f   :  { %v3609_v28 = vsel %vm3608_vm15, %v3604_v42, inf }
0x24a0   :  { %3610 = vmin.xlane.f32.xlu1 %v3609_v28 }
0x24a4   :  { %3625 = vmin.xlane.f32.xlu1 %v3624_v27 }
0x24ce   :  { %v3795_v53 = vpop.xlane.xlu0 %3794 }
0x24cf   :  { %v3799_v12 = vsub.f32 %v3791_v4, %v3795_v53 }
0x24d0   :  { %v3798_v13 = vpop.xlane.xlu1 %3797 }
0x24d1   :  { %v3801_v63 = vmul.f32 1.442695, %v3799_v12  ;;  %v3800_v55 = vsub.f32 %v6475_v49, %v3798_v13 }
0x24d3   :  { %5230 = vpow2.f32 %v3801_v63  ;;  %v3803_v42 = vmul.f32 1.442695, %v3800_v55  ;;  %v3628_v63 = vcvt.f32.s32 %v3622_v62 }
0x24d5   :  { %5232 = vpow2.f32 %v3803_v42 }
0x24e0   :  { %v5231_v9 = vpop.eup %5230 }
0x24e1   :  { %v3805_v4 = vsel %vm2341_vm2, %v5231_v9, 0.0  ;;  %v3629_v9 = vshll.u32 %v3628_v63, 16 }
0x24e2   :  { %3806 = vadd.xlane.f32.xlu0 %v3805_v4  ;;  %v5233_v29 = vpop.eup %5232  ;;  %v3614_v4 = vshll.u32 %v3613_v61, 16 }
0x24e3   :  { %v3808_v28 = vsel %vm2341_vm2, %v5233_v29, 0.0 }
0x24e6   :  { %3308 = vmin.xlane.f32.xlu0 %v6501_v21 }
0x24ea   :  { %3323 = vmin.xlane.f32.xlu0 %v3322_v1 }
0x24fc   :  { %v4380_v41 = vpop.xlane.xlu1 %4379  ;;  %v4382_v45 = vpop.xlane.xlu0 %4381 }
0x24fd   :  { %v4384_v3 = vcvt.f32.s32 %v4382_v45  ;;  %v4383_v17 = vcvt.f32.s32 %v4380_v41 }
0x24ff   :  { %v4385_v20 = vshll.u32 %v4384_v3, 16 }
0x2500   :  { %v4388_v36 = vpop.permute.xlu0 %4387 }
0x2501   :  { %v4386_v60 = vadd.s32 %v4385_v20, %v4383_v17 }
0x2503   :  { %v6506_v30 = vsel %vm2299_vm3, %v4386_v60, %v4388_v36 }
0x2504   :  { %4398 = vperm.xlu1 %5085, %v6506_v30  }
0x2508   :  { %5086 = vset.pattern.permute.xlu1 %v7050_v24 }
0x2528   :  { %3809 = vadd.xlane.f32.xlu1 %v3808_v28 }
0x2529   :  { %v3611_v15 = vpop.xlane.xlu1 %3610 }
0x252a   :  { %v3612_v2 = vcvt.f32.s32 %v3611_v15 }
0x252c   :  { %v3615_v45 = vadd.s32 %v3614_v4, %v3612_v2 }
0x252d   :  { %v3626_v12 = vpop.xlane.xlu1 %3625 }
0x252e   :  { %v3627_v16 = vcvt.f32.s32 %v3626_v12  ;;  %v4404_v20 = vrot.slane %v3615_v45, %v6036_v19  ;;  %v3319_v12 = vand.u32 65535, %v3318_v38 }
0x2530   :  { %v3630_v37 = vadd.s32 %v3629_v9, %v3627_v16  ;;  %v3321_v63 = vcvt.s32.f32 %v3319_v12 }
0x2532   :  { %v4408_v3 = vrot.slane %v3630_v37, %v6036_v19  ;;  %v3304_v37 = vand.u32 65535, %v6495_v57 }
0x2534   :  { %v4409_v55 = vsel %vm2179_vm10, %v4408_v3, %v4404_v20 }
0x256b   :  { %v3807_v27 = vpop.xlane.xlu0 %3806 }
0x256c   :  { %5234 = vlog2.f32 %v3807_v27 }
0x256f   :  { %v6520_v15 = vpop.xlane.xlu0 %3308 }
0x2570   :  { %vm3310_vm13 = vcmp.eq.f32.partialorder %v6501_v21, %v6520_v15 }
0x2573   :  { %v6522_v27 = vpop.xlane.xlu0 %3323 }
0x2574   :  { %vm3325_vm0 = vcmp.eq.f32.partialorder %v3322_v1, %v6522_v27 }
0x2575   :  { %v3326_v61 = vsel %vm3325_vm0, %v3321_v63, inf  ;;  %vm2196_vm0 = vcmask 1044480  }
0x2579   :  { %v5235_v41 = vpop.eup %5234 }
0x257a   :  { %v3812_v49 = vmul.f32 0.6931472, %v5235_v41  ;;  %v3306_v41 = vcvt.s32.f32 %v3304_v37  ;;  %v2166_v37 = vld [vmem:[%s6959_s21] sm:$0x1f] }
0x257b   :  { %4996 = vmatpush3.msk.msra.mxu1 %vm2196_vm0, %v2166_v37  ;;  %4991 = vmatpush3.msk.msra.mxu0 %vm2196_vm0, %v2166_v37 }
0x257c   :  { %v3815_v17 = vadd.f32 %v3812_v49, %v3795_v53  ;;  %v3311_v45 = vsel %vm3310_vm13, %v3306_v41, inf  ;;  %vm2193_vm13 = vcmask 39936  }
0x257e   :  { %v3833_v60 = vadd.f32 %v6297_v43, %v3815_v17 }
0x257f   :  { %v4399_v36 = vpop.permute.xlu1 %4398 }
0x2580   :  { %vm4400_vm15 = vcmp.eq.s32.totalorder %v6032_v54, %v4399_v36  ;;  %3838 = vperm.xlu1 %5086, %v3833_v60  }
0x2581   :  { %v4410_v62 = vsel %vm4400_vm15, %v4409_v55, 0  ;;  %vm3002_vm15 = vcmp.ge.f32.partialorder %v6113_v7, %v6137_v8 }
0x2582   :  { %v4411_v26 = vsel %vm2189_vm12, %v4410_v62, 0 }
0x2583   :  { %v4413_v42 = vshrl.u32 %v4411_v26, 16  ;;  %v4412_v53 = vand.u32 65535, %v4411_v26 }
0x2585   :  { %v4415_v29 = vcvt.s32.f32 %v4413_v42  ;;  %v4414_v28 = vcvt.s32.f32 %v4412_v53 }
0x2587   :  { %4418 = vadd.xlane.f32.xlu0 %v4415_v29 }
0x259d   :  { %4424 = vrot.lane.b32.xlu0 %v6506_v30, %s5316_s22 }
0x25a4   :  { %4416 = vadd.xlane.f32.xlu1 %v4414_v28  ;;  %v3003_v28 = vsel %vm3001_vm14, %v6032_v54, 5 }
0x25a5   :  { %v6563_v12 = vsel %vm2341_vm2, %v3003_v28, 2147483647 }
0x25a6   :  { %v3007_v63 = vshra.s32 %v6563_v12, 16 }
0x25b1   :  { %v3810_v43 = vpop.xlane.xlu1 %3809 }
0x25b2   :  { %5236 = vlog2.f32 %v3810_v43 }
0x25bc   :  { %3327 = vmin.xlane.f32.xlu0 %v3326_v61 }
0x25bf   :  { %v5237_v16 = vpop.eup %5236 }
0x25c0   :  { %v3814_v9 = vmul.f32 0.6931472, %v5237_v16  ;;  %v6582_v16 = vld [vmem:[%s6956_s18 + $0x8] sm:$0xff] }
0x25c2   :  { %v3816_v2 = vadd.f32 %v3814_v9, %v3798_v13  ;;  %v2185_v9 = vrot.slane %v6582_v16, 7 }
0x25c4   :  { %v3834_v4 = vadd.f32 %v6301_v18, %v3816_v2  ;;  %v6588_v2 = vld [vmem:[%s6956_s18] sm:$0xff] }
0x25c5   :  { %v6596_v41 = vsel %vm2179_vm10, %v2185_v9, %v6588_v2 }
0x25c6   :  { %3841 = vperm.xlu1 %5086, %v3834_v4   ;;  %v2270_v4 = vrot.slane %v6588_v2, 1  ;;  %4993 = vmatmul.mubr.msk.f32.vlgmr.msra.gmra.mxu0 %vm2193_vm13, %v6596_v41 }
0x25ea   :  { %3312 = vmin.xlane.f32.xlu1 %v3311_v45  ;;  %v6600_v45 = vsel %vm2179_vm10, %v6582_v16, %v2270_v4 }
0x25eb   :  { %4998 = vmatmul.mubr.msk.f32.vlgmr.msra.gmra.mxu1 %vm2193_vm13, %v6600_v45 }
0x25fb   :  { %v3839_v49 = vpop.permute.xlu1 %3838 }
0x25fc   :  { %v3846_v21 = vrot.slane %v3839_v49, %v6036_v19  ;;  %v2533_v49 = vrot.slane %v6582_v16, 1 }
0x2610   :  { %v4419_v38 = vpop.xlane.xlu0 %4418 }
0x2611   :  { %v4421_v1 = vcvt.f32.s32 %v4419_v38  ;;  %v2532_v38 = vrot.slane %v6588_v2, 2 }
0x2613   :  { %v4422_v17 = vshll.u32 %v4421_v1, 16  ;;  %v2830_v1 = vrot.slane %v6588_v2, 3 }
0x2614   :  { %v4425_v36 = vpop.permute.xlu0 %4424 }
0x262d   :  { %v4417_v3 = vpop.xlane.xlu1 %4416 }
0x262e   :  { %v4420_v20 = vcvt.f32.s32 %v4417_v3  ;;  %v2831_v3 = vrot.slane %v6582_v16, 2 }
0x2630   :  { %v4423_v60 = vadd.s32 %v4422_v17, %v4420_v20  ;;  %v7055_v17 = vmov 0.0   ;;  %v3315_v20 = vcvt.f32.s32 %v6520_v15  ;;  %v6630_v15 = vsel %vm2179_vm10, %v2831_v3, %v2830_v1 }
0x2631   :  { %5000 = vmatprep.subr.mxu0 %v7055_v17  ;;  %5002 = vmatprep.mubr.msk.f32.mxu0 %vm5300_vm1, %v7055_v17 }
0x2632   :  { %v6531_v18 = vsel %vm2299_vm3, %v4423_v60, %v4425_v36  ;;  %5001 = vmatpush3.msk.msra.mxu0 %vm2196_vm0, %v2166_v37  ;;  %5005 = vmatprep.subr.mxu1 %v7055_v17  ;;  %v6619_v60 = vsel %vm2179_vm10, %v2533_v49, %v2532_v38  ;;  %v3128_v36 = vrot.slane %v6588_v2, 4  ;;  %v3006_v38 = vand.u32 65535, %v6563_v12 }
0x2633   :  { %4435 = vperm.xlu0 %5087, %v6531_v18   ;;  %5010 = vmatprep.subr.mxu0 %v7055_v17 }
0x2634   :  { %5006 = vmatpush3.msk.msra.mxu1 %vm2196_vm0, %v2166_v37  ;;  %5003 = vmatmul.mubr.msk.f32.vlgmr.msra.gmra.mxu0 %vm2193_vm13, %v6619_v60  ;;  %v3008_v3 = vcvt.s32.f32 %v3006_v38 }
0x2635   :  { %5007 = vmatprep.mubr.msk.f32.mxu1 %vm5300_vm1, %v7055_v17  ;;  %5011 = vmatpush3.msk.msra.mxu0 %vm2196_vm0, %v2166_v37 }
0x2636   :  { %5012 = vmatprep.mubr.msk.f32.mxu0 %vm5300_vm1, %v7055_v17  ;;  %5020 = vmatprep.subr.mxu0 %v7055_v17 }
0x2637   :  { %5088 = vset.pattern.permute.xlu0 %v7050_v24  ;;  %5008 = vmatmul.mubr.msk.f32.vlgmr.msra.gmra.mxu1 %vm2193_vm13, %v6630_v15 }
0x2638   :  { %5015 = vmatprep.subr.mxu1 %v7055_v17  ;;  %5017 = vmatprep.mubr.msk.f32.mxu1 %vm5300_vm1, %v7055_v17 }
0x2639   :  { %5016 = vmatpush3.msk.msra.mxu1 %vm2196_vm0, %v2166_v37 }
0x2641   :  { %v3842_v57 = vpop.permute.xlu1 %3841 }
0x2642   :  { %v3850_v13 = vrot.slane %v3842_v57, %v6036_v19  ;;  %v3129_v57 = vrot.slane %v6582_v16, 3 }
0x2644   :  { %v3851_v55 = vsel %vm2179_vm10, %v3850_v13, %v3846_v21  ;;  %v3426_v21 = vrot.slane %v6588_v2, 5  ;;  %v3427_v13 = vrot.slane %v6582_v16, 4 }
0x2645   :  { %v6541_v62 = vsel %vm3756_vm9, %v3851_v55, %v6459_v5 }
0x2646   :  { %v4070_v26 = vrot.slane %v6541_v62, %v5928_v35 }
0x2648   :  { %v4078_v24 = vrot.slane %v4070_v26, %v5928_v35  ;;  %v4071_v42 = vcombine.high %v4070_v26, %v4070_v26  ;;  %v3316_v26 = vshll.u32 %v3315_v20, 16 }
0x264a   :  { %v4089_v29 = vrot.slane %v4078_v24, %v5970_v32  ;;  %v4085_v53 = vrot.slane %v4071_v42, %v5928_v35  ;;  %v3004_v35 = vsel %vm3002_vm15, %v6032_v54, 5  ;;  %v6641_v42 = vsel %vm2179_vm10, %v3129_v57, %v3128_v36 }
0x264b   :  { %v6570_v8 = vsel %vm2341_vm2, %v3004_v35, 2147483647  ;;  %5013 = vmatmul.mubr.msk.f32.vlgmr.msra.gmra.mxu0 %vm2193_vm13, %v6641_v42  ;;  %vm2704_vm15 = vcmp.ge.f32.partialorder %v6061_v59, %v6075_v23 }
0x264c   :  { %v6554_v5 = vadd.f32 %v6469_v48, %v4089_v29  ;;  %v4093_v43 = vrot.slane %v4085_v53, %v5970_v32  ;;  %v6572_v32 = vcvt.s32.f32 %v3007_v63  ;;  %v3724_v29 = vrot.slane %v6588_v2, 6  ;;  %5021 = vmatpush3.msk.msra.mxu0 %vm2196_vm0, %v2166_v37  ;;  %5022 = vmatprep.mubr.msk.f32.mxu0 %vm5300_vm1, %v7055_v17 }
0x264d   :  { %v3725_v53 = vrot.slane %v6582_v16, 5  ;;  %vm2703_vm1 = vcmp.ge.f32.partialorder %v6055_v40, %v6073_v39  ;;  %v3021_v17 = vand.u32 65535, %v6570_v8  ;;  %v2706_v36 = vsel %vm2704_vm15, %v6032_v54, 5 }
0x264e   :  { %v4098_v6 = vsel %vm2341_vm2, %v6554_v5, -inf  ;;  %v6560_v14 = vadd.f32 %v6469_v48, %v4093_v43  ;;  %v3022_v48 = vshra.s32 %v6570_v8, 16  ;;  %v6652_v43 = vsel %vm2179_vm10, %v3427_v13, %v3426_v21 }
0x264f   :  { %4099 = vmax.xlane.f32.xlu1 %v4098_v6  ;;  %5018 = vmatmul.mubr.msk.f32.vlgmr.msra.gmra.mxu1 %vm2193_vm13, %v6652_v43  ;;  %v6660_v6 = vsel %vm2179_vm10, %v3725_v53, %v3724_v29  ;;  %v3023_v59 = vcvt.s32.f32 %v3021_v17  ;;  %v6695_v8 = vsel %vm2341_vm2, %v2706_v36, 2147483647  ;;  %vm3735_vm15 = vcmask 39942  }
0x2650   :  { %v4101_v7 = vsel %vm2341_vm2, %v6560_v14, -inf  ;;  %v6576_v61 = vcvt.s32.f32 %v3022_v48  ;;  %5023 = vmatmul.mubr.msk.f32.vlgmr.msra.gmra.mxu0 %vm2193_vm13, %v6660_v6  ;;  %v2724_v21 = vshra.s32 %v6695_v8, 16 }
0x2652   :  { %v6701_v13 = vcvt.s32.f32 %v2724_v21 }
0x2653   :  { %4102 = vmax.xlane.f32.xlu1 %v4101_v7 }
0x2657   :  { %3010 = vmin.xlane.f32.xlu1 %v6572_v32 }
0x265b   :  { %3025 = vmin.xlane.f32.xlu1 %v6576_v61 }
0x2673   :  { %v3313_v55 = vpop.xlane.xlu1 %3312 }
0x2674   :  { %v3314_v24 = vcvt.f32.s32 %v3313_v55  ;;  %v3330_v55 = vcvt.f32.s32 %v6522_v27 }
0x2676   :  { %v3317_v28 = vadd.s32 %v3316_v26, %v3314_v24  ;;  %v3331_v24 = vshll.u32 %v3330_v55, 16  ;;  %v7056_v55 = vmov 2  }
0x26d8   :  { %v6664_v35 = vpop.xlane.xlu1 %4099 }
0x26d9   :  { %v4104_v63 = vsub.f32 %v6554_v5, %v6664_v35  ;;  %v2705_v5 = vsel %vm2703_vm1, %v6032_v54, 5  ;;  %vm2543_vm1 = vcmask 35842  }
0x26da   :  { %v6688_v20 = vsel %vm2341_vm2, %v2705_v5, 2147483647 }
0x26db   :  { %v4106_v7 = vmul.f32 1.442695, %v4104_v63  ;;  %v2709_v23 = vshra.s32 %v6688_v20, 16  ;;  %v4441_v63 = vrot.slane %v3317_v28, %v6036_v19 }
0x26dc   :  { %v6668_v48 = vpop.xlane.xlu1 %4102 }
0x26dd   :  { %5238 = vpow2.f32 %v4106_v7  ;;  %v4105_v9 = vsub.f32 %v6560_v14, %v6668_v48  ;;  %v6697_v57 = vcvt.s32.f32 %v2709_v23 }
0x26df   :  { %v4108_v4 = vmul.f32 1.442695, %v4105_v9 }
0x26e0   :  { %v6672_v37 = vpop.xlane.xlu1 %3010 }
0x26e1   :  { %5240 = vpow2.f32 %v4108_v4  ;;  %vm3012_vm14 = vcmp.eq.f32.partialorder %v6572_v32, %v6672_v37 }
0x26e2   :  { %v3013_v12 = vsel %vm3012_vm14, %v3008_v3, inf  ;;  %v2528_v3 = vpop.f32.mrf.mxu1 }
0x26e4   :  { %v6683_v14 = vpop.xlane.xlu1 %3025  ;;  %v4999_v17 = vpop.f32.mrf.mxu1 }
0x26e5   :  { %vm3027_vm0 = vcmp.eq.f32.partialorder %v6576_v61, %v6683_v14  ;;  %v3328_v61 = vpop.xlane.xlu0 %3327 }
0x26e6   :  { %v3028_v32 = vsel %vm3027_vm0, %v3023_v59, inf  ;;  %v3329_v26 = vcvt.f32.s32 %v3328_v61  ;;  %vm2841_vm0 = vcmask 36867  }
0x26e8   :  { %v3332_v29 = vadd.s32 %v3331_v24, %v3329_v26  ;;  %v7057_v26 = vmov 4   ;;  %v2536_v24 = vmul.f32 %v6619_v60, %v2528_v3 }
0x26e9   :  { %v4436_v53 = vpop.permute.xlu0 %4435 }
0x26ea   :  { %v5239_v49 = vpop.eup %5238  ;;  %v4445_v7 = vrot.slane %v3332_v29, %v6036_v19  ;;  %vm4437_vm13 = vcmp.eq.s32.totalorder %v6032_v54, %v4436_v53  ;;  %v2537_v29 = vsel %vm2189_vm12, %v2536_v24, 0.0 }
0x26eb   :  { %v4110_v1 = vsel %vm2341_vm2, %v5239_v49, 0.0 }
0x26ec   :  { %4111 = vadd.xlane.f32.xlu0 %v4110_v1  ;;  %v4446_v9 = vsel %vm2179_vm10, %v4445_v7, %v4441_v63 }
0x26ed   :  { %v4447_v4 = vsel %vm4437_vm13, %v4446_v9, 0  ;;  %vm4036_vm13 = vcmask 32768  }
0x26ee   :  { %v5241_v40 = vpop.eup %5240  ;;  %v4448_v38 = vsel %vm2189_vm12, %v4447_v4, 0 }
0x26ef   :  { %v4113_v39 = vsel %vm2341_vm2, %v5241_v40, 0.0  ;;  %v4450_v49 = vshrl.u32 %v4448_v38, 16  ;;  %v4449_v1 = vand.u32 65535, %v4448_v38  ;;  %v6726_v38 = vpop.f32.mrf.mxu0 }
0x26f0   :  { %4114 = vadd.xlane.f32.xlu1 %v4113_v39  ;;  %3014 = vmin.xlane.f32.xlu0 %v3013_v12 }
0x26f1   :  { %v4452_v5 = vcvt.s32.f32 %v4450_v49  ;;  %v4451_v27 = vcvt.s32.f32 %v4449_v1  ;;  %v4994_v49 = vpop.f32.mrf.mxu0 }
0x26f4   :  { %3029 = vmin.xlane.f32.xlu0 %v3028_v32  ;;  %v2826_v1 = vpop.f32.mrf.mxu0 }
0x26f8   :  { %2712 = vmin.xlane.f32.xlu0 %v6697_v57 }
0x26fc   :  { %2727 = vmin.xlane.f32.xlu0 %v6701_v13 }
0x2701   :  { %4461 = vrot.lane.b32.xlu1 %v6531_v18, %s5316_s22 }
0x2725   :  { %4455 = vadd.xlane.f32.xlu1 %v4452_v5  ;;  %v5004_v5 = vpop.f32.mrf.mxu0 }
0x2729   :  { %4453 = vadd.xlane.f32.xlu1 %v4451_v27  ;;  %v6731_v27 = vpop.f32.mrf.mxu0 }
0x272b   :  { %v5014_v3 = vpop.f32.mrf.mxu0 }
0x272d   :  { %v4018_v17 = vpop.f32.mrf.mxu0 }
0x2775   :  { %v4112_v40 = vpop.xlane.xlu0 %4111 }
0x2776   :  { %5242 = vlog2.f32 %v4112_v40  ;;  %v3124_v40 = vpop.f32.mrf.mxu1 }
0x2779   :  { %v4115_v28 = vpop.xlane.xlu1 %4114 }
0x277a   :  { %5244 = vlog2.f32 %v4115_v28  ;;  %v5009_v28 = vpop.f32.mrf.mxu1 }
0x2783   :  { %v5243_v39 = vpop.eup %5242 }
0x2784   :  { %v4117_v12 = vmul.f32 0.6931472, %v5243_v39  ;;  %v5024_v39 = vpop.f32.mrf.mxu0 }
0x2786   :  { %v4120_v36 = vadd.f32 %v4117_v12, %v6664_v35  ;;  %v4462_v35 = vpop.permute.xlu1 %4461  ;;  %v6733_v12 = vpop.f32.mrf.mxu1 }
0x2787   :  { %v5245_v59 = vpop.eup %5244 }
0x2788   :  { %v4119_v23 = vmul.f32 0.6931472, %v5245_v59  ;;  %v4138_v32 = vadd.f32 %v6353_v25, %v4120_v36  ;;  %v2544_v25 = vsel %vm2543_vm1, %v5955_v47, 0.0  ;;  %v7058_v47 = vmov 3   ;;  %v5019_v36 = vpop.f32.mrf.mxu1  ;;  %v3015_v59 = vpop.xlane.xlu0 %3014 }
0x2789   :  { %v4022_v36 = vrot.slane %v6588_v2, 7  ;;  %v4037_v2 = vsel %vm4036_vm13, %v5945_v44, 0.0  ;;  %vm3139_vm1 = vcmask 37892  }
0x278a   :  { %v4121_v21 = vadd.f32 %v4119_v23, %v6668_v48  ;;  %4143 = vperm.xlu0 %5088, %v4138_v32   ;;  %v3032_v32 = vcvt.f32.s32 %v6683_v14 }
0x278c   :  { %v4139_v61 = vadd.f32 %v6356_v22, %v4121_v21  ;;  %v3030_v23 = vpop.xlane.xlu0 %3029  ;;  %v3017_v21 = vcvt.f32.s32 %v6672_v37  ;;  %v3033_v24 = vshll.u32 %v3032_v32, 16  ;;  %v3736_v32 = vsel %vm3735_vm15, %v5960_v50, 0.0 }
0x278d   :  { %v3132_v50 = vmul.f32 %v6641_v42, %v3124_v40  ;;  %vm3437_vm15 = vcmask 38917   ;;  %v3430_v40 = vmul.f32 %v6652_v43, %v6731_v27 }
0x278e   :  { %4146 = vperm.xlu1 %5086, %v4139_v61   ;;  %5091 = vset.pattern.permute.xlu0 %v7056_v55  ;;  %v3031_v61 = vcvt.f32.s32 %v3030_v23  ;;  %v2834_v23 = vmul.f32 %v6630_v15, %v2826_v1  ;;  %v2708_v1 = vand.u32 65535, %v6688_v20  ;;  %v7059_v20 = vld [vmem:[#allocation10_spill] sm:$0xff] }
0x278f   :  { %v3133_v44 = vsel %vm2189_vm12, %v3132_v50, 0.0 }
0x2792   :  { %5089 = vset.pattern.permute.xlu1 %v7057_v26 }
0x27a9   :  { %2538 = vadd.xlane.f32.xlu0 %v2537_v29  ;;  %v3016_v29 = vcvt.f32.s32 %v3015_v59  ;;  %v4023_v59 = vrot.slane %v6582_v16, 6  ;;  %v6755_v16 = vpop.xlane.xlu0 %2712 }
0x27ae   :  { %v4456_v53 = vpop.xlane.xlu1 %4455 }
0x27af   :  { %v4458_v63 = vcvt.f32.s32 %v4456_v53  ;;  %v3018_v53 = vshll.u32 %v3017_v21, 16  ;;  %v2842_v21 = vsel %vm2841_vm0, %v5965_v51, 0.0  ;;  %vm4032_vm0 = vcmask 39943  }
0x27b1   :  { %v4459_v22 = vshll.u32 %v4458_v63, 16 }
0x27b2   :  { %2545 = vadd.xlane.f32.xlu1 %v2544_v25  ;;  %v4454_v48 = vpop.xlane.xlu1 %4453  ;;  %v3034_v25 = vadd.s32 %v3033_v24, %v3031_v61  ;;  %v6750_v61 = vsel %vm2179_vm10, %v4023_v59, %v4022_v36  ;;  %v2835_v24 = vsel %vm2189_vm12, %v2834_v23, 0.0  ;;  %v2273_v23 = vmul.f32 %v6600_v45, %v6726_v38 }
0x27b3   :  { %v4457_v7 = vcvt.f32.s32 %v4454_v48  ;;  %v3019_v48 = vadd.s32 %v3018_v53, %v3016_v29  ;;  %v4026_v29 = vmul.f32 %v6750_v61, %v4018_v17  ;;  %v3140_v53 = vsel %vm3139_vm1, %v5974_v56, 0.0 }
0x27b4   :  { %v2710_v17 = vcvt.s32.f32 %v2708_v1  ;;  %vm2285_vm1 = vcmask 34817  }
0x27b5   :  { %v4460_v9 = vadd.s32 %v4459_v22, %v4457_v7  ;;  %v4482_v7 = vrot.slane %v3034_v25, %v6036_v19  ;;  %v4478_v22 = vrot.slane %v3019_v48, %v6036_v19  ;;  %v4027_v51 = vsel %vm2189_vm12, %v4026_v29, 0.0  ;;  %v6764_v48 = vpop.xlane.xlu0 %2727 }
0x27b6   :  { %vm2729_vm13 = vcmp.eq.f32.partialorder %v6701_v13, %v6764_v48 }
0x27b7   :  { %v6723_v4 = vsel %vm2299_vm3, %v4460_v9, %v4462_v35  ;;  %v4483_v14 = vsel %vm2179_vm10, %v4482_v7, %v4478_v22  ;;  %v3438_v7 = vsel %vm3437_vm15, %v7059_v20, 0.0  ;;  %v3431_v22 = vsel %vm2189_vm12, %v3430_v40, 0.0 }
0x27c3   :  { %4472 = vperm.xlu1 %5089, %v6723_v4  }
0x27c7   :  { %4498 = vrot.lane.b32.xlu1 %v6723_v4, %s5316_s22 }
0x27c8   :  { %5090 = vset.pattern.permute.xlu1 %v7058_v47 }
0x2805   :  { %v4144_v56 = vpop.permute.xlu0 %4143 }
0x2809   :  { %v4147_v35 = vpop.permute.xlu1 %4146 }
0x2832   :  { %v2539_v29 = vpop.xlane.xlu0 %2538 }
0x283b   :  { %v6737_v63 = vpop.xlane.xlu1 %2545 }
0x283f   :  { %v4473_v9 = vpop.permute.xlu1 %4472 }
0x2840   :  { %vm4474_vm14 = vcmp.eq.s32.totalorder %v6032_v54, %v4473_v9  ;;  %v4151_v9 = vrot.slane %v4144_v56, %v6036_v19 }
0x2841   :  { %v4484_v49 = vsel %vm4474_vm14, %v4483_v14, 0  ;;  %vm2714_vm14 = vcmp.eq.f32.partialorder %v6697_v57, %v6755_v16  ;;  %v4155_v57 = vrot.slane %v4147_v35, %v6036_v19 }
0x2842   :  { %v4485_v37 = vsel %vm2189_vm12, %v4484_v49, 0  ;;  %v2715_v25 = vsel %vm2714_vm14, %v2710_v17, inf  ;;  %v3728_v49 = vmul.f32 %v6660_v6, %v6733_v12  ;;  %v2723_v12 = vand.u32 65535, %v6695_v8 }
0x2843   :  { %v4486_v5 = vand.u32 65535, %v4485_v37  ;;  %v4487_v3 = vshrl.u32 %v4485_v37, 16  ;;  %v4156_v14 = vsel %vm2179_vm10, %v4155_v57, %v4151_v9  ;;  %v7060_v37 = vld [vmem:[#allocation8_spill] sm:$0xff]  ;;  %v2548_v8 = vrot.slane %v6737_v63, 2  ;;  %v4499_v13 = vpop.permute.xlu1 %4498 }
0x2844   :  { %v3729_v35 = vsel %vm2189_vm12, %v3728_v49, 0.0  ;;  %v2719_v9 = vcvt.f32.s32 %v6755_v16  ;;  %vm4042_vm14 = vcmask 1040384  }
0x2845   :  { %v4489_v28 = vcvt.s32.f32 %v4487_v3  ;;  %v4488_v39 = vcvt.s32.f32 %v4486_v5  ;;  %v4033_v5 = vsel %vm4032_vm0, %v7060_v37, 0.0  ;;  %v4158_v3 = vsel %vm4061_vm11, %v4156_v14, %v6541_v62 }
0x2846   :  { %v2725_v62 = vcvt.s32.f32 %v2723_v12 }
0x2847   :  { %4492 = vadd.xlane.f32.xlu1 %v4489_v28  ;;  %4490 = vadd.xlane.f32.xlu0 %v4488_v39  ;;  %v6783_v28 = vld [vmem:[%s6962_s24] ss:$0 sm:$0xff]  ;;  %s5317_s24 = smov 2  }
0x2848   :  { %v6786_v39 = vadd.f32 %v6783_v28, %v4158_v3  ;;  %v2730_v59 = vsel %vm2729_vm13, %v2725_v62, inf }
0x284a   :  { %v4267_v36 = vsel %vm2189_vm12, %v6786_v39, -inf }
0x284b   :  { %3737 = vadd.xlane.f32.xlu1 %v3736_v32  ;;  %2843 = vadd.xlane.f32.xlu0 %v2842_v21  ;;  %v7062_v32 = vld [vmem:[#allocation11_spill] sm:$0xff] }
0x284c   :  { %v2286_v21 = vsel %vm2285_vm1, %v7062_v32, 0.0 }
0x284f   :  { %4038 = vadd.xlane.f32.xlu1 %v4037_v2  ;;  %2836 = vadd.xlane.f32.xlu0 %v2835_v24  ;;  %v2274_v24 = vsel %vm2189_vm12, %v2273_v23, 0.0  ;;  %v2550_v2 = vadd.f32 %v2548_v8, %v2539_v29 }
0x2853   :  { %3141 = vadd.xlane.f32.xlu0 %v3140_v53  ;;  %4028 = vadd.xlane.f32.xlu1 %v4027_v51 }
0x2857   :  { %3134 = vadd.xlane.f32.xlu0 %v3133_v44  ;;  %2716 = vmin.xlane.f32.xlu1 %v2715_v25 }
0x285b   :  { %3439 = vadd.xlane.f32.xlu0 %v3438_v7 }
0x285f   :  { %3432 = vadd.xlane.f32.xlu0 %v3431_v22 }
0x2863   :  { %4034 = vadd.xlane.f32.xlu0 %v4033_v5  ;;  %v2720_v5 = vshll.u32 %v2719_v9, 16 }
0x2867   :  { %3730 = vadd.xlane.f32.xlu0 %v3729_v35 }
0x286b   :  { %4268 = vmax.xlane.f32.xlu0 %v4267_v36 }
0x286f   :  { %2731 = vmin.xlane.f32.xlu0 %v2730_v59 }
0x2873   :  { %2287 = vadd.xlane.f32.xlu0 %v2286_v21 }
0x2877   :  { %2275 = vadd.xlane.f32.xlu0 %v2274_v24 }
0x288d   :  { %2552 = vrot.lane.b32.xlu0 %v2550_v2, %s5317_s24 }
0x28d0   :  { %v4493_v50 = vpop.xlane.xlu1 %4492  ;;  %v4491_v51 = vpop.xlane.xlu0 %4490 }
0x28d1   :  { %v4495_v1 = vcvt.f32.s32 %v4493_v50  ;;  %v4494_v44 = vcvt.f32.s32 %v4491_v51  ;;  %v2734_v51 = vcvt.f32.s32 %v6764_v48  ;;  %v7064_v48 = vld [vmem:[#allocation13_spill] sm:$0xff] }
0x28d3   :  { %v4496_v53 = vshll.u32 %v4495_v1, 16 }
0x28d4   :  { %v3738_v17 = vpop.xlane.xlu1 %3737  ;;  %v2844_v38 = vpop.xlane.xlu0 %2843 }
0x28d5   :  { %v4497_v25 = vadd.s32 %v4496_v53, %v4494_v44  ;;  %v2846_v40 = vrot.slane %v2844_v38, 3  ;;  %v3740_v16 = vrot.slane %v3738_v17, 6  ;;  %v2735_v53 = vshll.u32 %v2734_v51, 16 }
0x28d7   :  { %v6800_v20 = vsel %vm2299_vm3, %v4497_v25, %v4499_v13 }
0x28d8   :  { %v4039_v7 = vpop.xlane.xlu1 %4038  ;;  %v2837_v63 = vpop.xlane.xlu0 %2836 }
0x28d9   :  { %v2848_v56 = vadd.f32 %v2846_v40, %v2837_v63  ;;  %v4044_v21 = vrot.slane %v4039_v7, 7 }
0x28db   :  { %2850 = vrot.lane.b32.xlu1 %v2848_v56, %s5318_s14 }
0x28dc   :  { %v3142_v57 = vpop.xlane.xlu0 %3141  ;;  %v4029_v22 = vpop.xlane.xlu1 %4028 }
0x28dd   :  { %v3144_v14 = vrot.slane %v3142_v57, 4 }
0x28e0   :  { %v3135_v49 = vpop.xlane.xlu0 %3134  ;;  %v2717_v37 = vpop.xlane.xlu1 %2716 }
0x28e1   :  { %v3146_v3 = vadd.f32 %v3144_v14, %v3135_v49  ;;  %v2718_v35 = vcvt.f32.s32 %v2717_v37  ;;  %v7063_v14 = vld [vmem:[#allocation15_spill] sm:$0xff] }
0x28e2   :  { %vm2406_vm15 = vcmp.ge.f32.partialorder %v7064_v48, %v7063_v14 }
0x28e3   :  { %v2721_v12 = vadd.s32 %v2720_v5, %v2718_v35  ;;  %3148 = vrot.lane.b32.xlu1 %v3146_v3, %s5319_s10  ;;  %v2408_v49 = vsel %vm2406_vm15, %v6032_v54, 5  ;;  %v7066_v5 = vld [vmem:[#allocation12_spill] sm:$0xff] }
0x28e4   :  { %v3440_v36 = vpop.xlane.xlu0 %3439  ;;  %v6815_v37 = vsel %vm2341_vm2, %v2408_v49, 2147483647 }
0x28e5   :  { %v3442_v62 = vrot.slane %v3440_v36, 5  ;;  %v4515_v40 = vrot.slane %v2721_v12, %v6036_v19  ;;  %v2426_v3 = vshra.s32 %v6815_v37, 16 }
0x28e7   :  { %v6824_v36 = vcvt.s32.f32 %v2426_v3 }
0x28e8   :  { %v3433_v59 = vpop.xlane.xlu0 %3432 }
0x28e9   :  { %v3444_v23 = vadd.f32 %v3442_v62, %v3433_v59 }
0x28eb   :  { %3446 = vrot.lane.b32.xlu1 %v3444_v23, %s5320_s15 }
0x28ec   :  { %v4035_v32 = vpop.xlane.xlu0 %4034 }
0x28ed   :  { %v4043_v24 = vrot.slane %v4035_v32, 7 }
0x28ef   :  { %v4045_v8 = vsel %vm4042_vm14, %v4043_v24, %v4044_v21  ;;  %v7067_v21 = vld [vmem:[#allocation9_spill] sm:$0xff]  ;;  %vm4297_vm14 = vcmask 0  }
0x28f0   :  { %v4047_v29 = vadd.f32 %v4045_v8, %v4029_v22  ;;  %v3731_v2 = vpop.xlane.xlu0 %3730  ;;  %v2188_v24 = vmul.f32 %v6596_v41, %v7067_v21  ;;  %v2425_v21 = vand.u32 65535, %v6815_v37 }
0x28f1   :  { %v3742_v13 = vadd.f32 %v3740_v16, %v3731_v2 }
0x28f2   :  { %4049 = vrot.lane.b32.xlu0 %v4047_v29, %s5321_s6  ;;  %v2190_v16 = vsel %vm2189_vm12, %v2188_v24, 0.0  ;;  %v6839_v29 = vld [vmem:[%s6955_s17] sm:$0x3]  ;;  %s5325_s17 = smov 124   ;;  %v2427_v11 = vcvt.s32.f32 %v2425_v21 }
0x28f3   :  { %3744 = vrot.lane.b32.xlu1 %v3742_v13, %s5322_s16 }
0x28f4   :  { %v6803_v50 = vpop.xlane.xlu0 %4268 }
0x28f5   :  { %v4270_v25 = vsub.f32 %v6786_v39, %v6803_v50  ;;  %v7065_v39 = vld [vmem:[#allocation14_spill] sm:$0xff] }
0x28f6   :  { %vm2405_vm0 = vcmp.ge.f32.partialorder %v7066_v5, %v7065_v39 }
0x28f7   :  { %v4271_v57 = vmul.f32 1.442695, %v4270_v25  ;;  %v2407_v35 = vsel %vm2405_vm0, %v6032_v54, 5 }
0x28f8   :  { %v2732_v1 = vpop.xlane.xlu0 %2731  ;;  %v6822_v12 = vsel %vm2341_vm2, %v2407_v35, 2147483647 }
0x28f9   :  { %v2733_v44 = vcvt.f32.s32 %v2732_v1  ;;  %5246 = vpow2.f32 %v4271_v57  ;;  %v2411_v59 = vshra.s32 %v6822_v12, 16 }
0x28fb   :  { %v2736_v38 = vadd.s32 %v2735_v53, %v2733_v44  ;;  %v2413_v32 = vcvt.s32.f32 %v2411_v59 }
0x28fc   :  { %v2288_v17 = vpop.xlane.xlu0 %2287 }
0x28fd   :  { %v4519_v7 = vrot.slane %v2736_v38, %v6036_v19  ;;  %v2290_v63 = vrot.slane %v2288_v17, 1 }
0x28ff   :  { %v4520_v56 = vsel %vm2179_vm10, %v4519_v7, %v4515_v40 }
0x2900   :  { %v2276_v22 = vpop.xlane.xlu0 %2275 }
0x2901   :  { %v2292_v9 = vadd.f32 %v2290_v63, %v2276_v22 }
0x2904   :  { %v2553_v8 = vpop.permute.xlu0 %2552 }
0x2905   :  { %v2555_v2 = vmul.f32 %v6839_v29, %v2553_v8 }
0x2906   :  { %v5247_v62 = vpop.eup %5246 }
0x2907   :  { %v4273_v23 = vsel %vm2189_vm12, %v5247_v62, 0.0 }
0x2911   :  { %2429 = vmin.xlane.f32.xlu0 %v6824_v36 }
0x2915   :  { %4274 = vadd.xlane.f32.xlu0 %v4273_v23 }
0x2917   :  { %2414 = vmin.xlane.f32.xlu1 %v2413_v32 }
0x2928   :  { %4509 = vperm.xlu1 %5090, %v6800_v20  }
0x292c   :  { %5093 = vset.pattern.permute.xlu1 %v7054_v34 }
0x294c   :  { %2191 = vadd.xlane.f32.xlu1 %v2190_v16 }
0x294d   :  { %v2851_v13 = vpop.permute.xlu1 %2850 }
0x294e   :  { %v2853_v34 = vmul.f32 %v6839_v29, %v2851_v13 }
0x2955   :  { %v3149_v51 = vpop.permute.xlu1 %3148 }
0x2956   :  { %v3151_v1 = vmul.f32 %v6839_v29, %v3149_v51 }
0x295d   :  { %4535 = vrot.lane.b32.xlu1 %v6800_v20, %s5316_s22  ;;  %v3447_v53 = vpop.permute.xlu1 %3446 }
0x295e   :  { %v3449_v44 = vmul.f32 %v6839_v29, %v3447_v53 }
0x2961   :  { %2557 = vrot.lane.b32.xlu1 %v2555_v2, %s5316_s22 }
0x2964   :  { %v4050_v49 = vpop.permute.xlu0 %4049 }
0x2965   :  { %2855 = vrot.lane.b32.xlu1 %v2853_v34, %s5323_s2  ;;  %v3745_v38 = vpop.permute.xlu1 %3744  ;;  %v4052_v39 = vmul.f32 %v6839_v29, %v4050_v49 }
0x2966   :  { %v3747_v25 = vmul.f32 %v6839_v29, %v3745_v38 }
0x2969   :  { %3153 = vrot.lane.b32.xlu1 %v3151_v1, %s5324_s27 }
0x296d   :  { %3451 = vrot.lane.b32.xlu1 %v3449_v44, %s5325_s17 }
0x2971   :  { %3749 = vrot.lane.b32.xlu1 %v3747_v25, %s5326_s28 }
0x299a   :  { %v2430_v58 = vpop.xlane.xlu0 %2429 }
0x299b   :  { %v2436_v3 = vcvt.f32.s32 %v2430_v58 }
0x299e   :  { %v4275_v16 = vpop.xlane.xlu0 %4274 }
0x299f   :  { %5248 = vlog2.f32 %v4275_v16  ;;  %v7071_v16 = vmov 1  }
0x29a0   :  { %v6847_v17 = vpop.xlane.xlu1 %2414 }
0x29a1   :  { %v2421_v49 = vcvt.f32.s32 %v6847_v17 }
0x29a4   :  { %v4510_v40 = vpop.permute.xlu1 %4509 }
0x29a5   :  { %vm4511_vm2 = vcmp.eq.s32.totalorder %v6032_v54, %v4510_v40 }
0x29a6   :  { %v4521_v7 = vsel %vm4511_vm2, %v4520_v56, 0  ;;  %v2305_v56 = vsel %vm2304_vm4, %v6600_v45, %v6596_v41  ;;  %vm2416_vm4 = vcmp.eq.f32.partialorder %v2413_v32, %v6847_v17 }
0x29a7   :  { %v4522_v63 = vsel %vm2189_vm12, %v4521_v7, 0  ;;  %v2565_v35 = vsel %vm2564_vm5, %v6619_v60, %v2305_v56  ;;  %v2410_v60 = vand.u32 65535, %v6822_v12  ;;  %vm2431_vm5 = vcmp.eq.f32.partialorder %v6824_v36, %v2430_v58 }
0x29a8   :  { %v4523_v57 = vand.u32 65535, %v4522_v63  ;;  %v4524_v22 = vshrl.u32 %v4522_v63, 16  ;;  %v2863_v59 = vsel %vm2862_vm6, %v6630_v15, %v2565_v35  ;;  %vm4299_vm6 = vcmask 58368  }
0x29a9   :  { %v3161_v23 = vsel %vm3160_vm7, %v6641_v42, %v2863_v59  ;;  %v2412_v42 = vcvt.s32.f32 %v2410_v60  ;;  %v2422_v59 = vshll.u32 %v2421_v49, 16 }
0x29aa   :  { %v4526_v14 = vcvt.s32.f32 %v4524_v22  ;;  %v4525_v48 = vcvt.s32.f32 %v4523_v57 }
0x29ac   :  { %4529 = vadd.xlane.f32.xlu0 %v4526_v14  ;;  %4527 = vadd.xlane.f32.xlu1 %v4525_v48  ;;  %v5249_v57 = vpop.eup %5248 }
0x29ad   :  { %v4277_v48 = vmul.f32 0.6931472, %v5249_v57 }
0x29bd   :  { %4054 = vrot.lane.b32.xlu1 %v4052_v39, %s5327_s23 }
0x29c2   :  { %2294 = vrot.lane.b32.xlu0 %v2292_v9, %s5328_s8  ;;  %v3459_v9 = vsel %vm3458_vm8, %v6652_v43, %v3161_v23  ;;  %v2417_v43 = vsel %vm2416_vm4, %v2412_v42, inf }
0x29c3   :  { %v3757_v41 = vsel %vm3756_vm9, %v6660_v6, %v3459_v9  ;;  %v2432_v6 = vsel %vm2431_vm5, %v2427_v11, inf }
0x29c4   :  { %v4062_v45 = vsel %vm4061_vm11, %v6750_v61, %v3757_v41  ;;  %v2437_v41 = vshll.u32 %v2436_v3, 16 }
0x29c5   :  { %v4261_v15 = vmul.f32 %v6783_v28, %v4062_v45 }
0x29c7   :  { %v4262_v52 = vsel %vm2189_vm12, %v4261_v15, 0.0 }
0x29d5   :  { %v2192_v61 = vpop.xlane.xlu1 %2191 }
0x29d9   :  { %v4536_v27 = vpop.permute.xlu1 %4535 }
0x29dd   :  { %v2558_v12 = vpop.permute.xlu1 %2557 }
0x29e1   :  { %4263 = vadd.xlane.f32.xlu0 %v4262_v52  ;;  %2418 = vmin.xlane.f32.xlu1 %v2417_v43  ;;  %v2856_v28 = vpop.permute.xlu1 %2855 }
0x29e5   :  { %2433 = vmin.xlane.f32.xlu0 %v2432_v6  ;;  %v3154_v24 = vpop.permute.xlu1 %3153 }
0x29e9   :  { %v3452_v32 = vpop.permute.xlu1 %3451 }
0x29ed   :  { %v3750_v8 = vpop.permute.xlu1 %3749 }
0x2a35   :  { %v4530_v2 = vpop.xlane.xlu0 %4529  ;;  %v4528_v37 = vpop.xlane.xlu1 %4527 }
0x2a36   :  { %v4532_v13 = vcvt.f32.s32 %v4530_v2  ;;  %v4531_v51 = vcvt.f32.s32 %v4528_v37 }
0x2a38   :  { %v4533_v34 = vshll.u32 %v4532_v13, 16 }
0x2a39   :  { %v2295_v53 = vpop.permute.xlu0 %2294  ;;  %v4055_v14 = vpop.permute.xlu1 %4054 }
0x2a3a   :  { %v4534_v1 = vadd.s32 %v4533_v34, %v4531_v51  ;;  %v2297_v44 = vmul.f32 %v6839_v29, %v2295_v53 }
0x2a3c   :  { %v6882_v36 = vsel %vm2299_vm3, %v4534_v1, %v4536_v27  ;;  %v2298_v38 = vadd.f32 %v2297_v44, %v2192_v61 }
0x2a3d   :  { %4546 = vperm.xlu0 %5091, %v6882_v36  }
0x2a3e   :  { %v2560_v25 = vadd.f32 %v2558_v12, %v2298_v38 }
0x2a40   :  { %v2858_v40 = vadd.f32 %v2856_v28, %v2560_v25 }
0x2a41   :  { %5092 = vset.pattern.permute.xlu0 %v7052_v46  ;;  %v4278_v46 = vadd.f32 %v4277_v48, %v6803_v50  ;;  %v4300_v50 = vsel %vm4299_vm6, %v6839_v29, 0.0 }
0x2a42   :  { %v3156_v7 = vadd.f32 %v3154_v24, %v2858_v40 }
0x2a44   :  { %v3454_v63 = vadd.f32 %v3452_v32, %v3156_v7 }
0x2a46   :  { %v3752_v22 = vadd.f32 %v3750_v8, %v3454_v63 }
0x2a48   :  { %v4057_v39 = vadd.f32 %v4055_v14, %v3752_v22 }
0x2a6a   :  { %v4264_v5 = vpop.xlane.xlu0 %4263  ;;  %v2419_v56 = vpop.xlane.xlu1 %2418 }
0x2a6b   :  { %v4265_v35 = vadd.f32 %v4264_v5, %v4057_v39  ;;  %v2420_v62 = vcvt.f32.s32 %v2419_v56 }
0x2a6d   :  { %v4279_v23 = vsub.f32 %v4265_v35, %v4278_v46  ;;  %v2423_v45 = vadd.s32 %v2422_v59, %v2420_v62 }
0x2a6e   :  { %v2434_v9 = vpop.xlane.xlu0 %2433 }
0x2a6f   :  { %v2435_v60 = vcvt.f32.s32 %v2434_v9  ;;  %4281 = vrot.lane.b32.xlu1 %v4279_v23, %s5316_s22  ;;  %v4552_v42 = vrot.slane %v2423_v45, %v6036_v19 }
0x2a71   :  { %v2438_v15 = vadd.s32 %v2437_v41, %v2435_v60 }
0x2a73   :  { %v4556_v17 = vrot.slane %v2438_v15, %v6036_v19 }
0x2a75   :  { %v4557_v21 = vsel %vm2179_vm10, %v4556_v17, %v4552_v42  ;;  %vm4284_vm10 = vcmask 1024  }
0x2a93   :  { %4301 = vadd.xlane.f32.xlu1 %v4300_v50 }
0x2ab8   :  { %v4547_v58 = vpop.permute.xlu0 %4546 }
0x2ab9   :  { %vm4548_vm7 = vcmp.eq.s32.totalorder %v6032_v54, %v4547_v58 }
0x2aba   :  { %v4558_v52 = vsel %vm4548_vm7, %v4557_v21, 0 }
0x2abb   :  { %v4559_v43 = vsel %vm2189_vm12, %v4558_v52, 0 }
0x2abc   :  { %v4560_v11 = vand.u32 65535, %v4559_v43  ;;  %v4561_v6 = vshrl.u32 %v4559_v43, 16 }
0x2abe   :  { %v4563_v61 = vcvt.s32.f32 %v4561_v6  ;;  %v4562_v27 = vcvt.s32.f32 %v4560_v11 }
0x2ac0   :  { %4566 = vadd.xlane.f32.xlu0 %v4563_v61  ;;  %4564 = vadd.xlane.f32.xlu1 %v4562_v27 }
0x2ad1   :  { %4572 = vrot.lane.b32.xlu1 %v6882_v36, %s5316_s22 }
0x2ae1   :  { %v4282_v19 = vpop.permute.xlu1 %4281 }
0x2ae2   :  { %v4285_v12 = vsel %vm4284_vm10, %v4282_v19, 0.0 }
0x2ae3   :  { %4286 = vadd.xlane.f32.xlu0 %v4285_v12 }
0x2b1c   :  { %v6899_v29 = vpop.xlane.xlu1 %4301 }
0x2b1d   :  { %vm4390_vm8 = vcmp.gt.f32.partialorder %v6899_v29, 5.0  ;;  %vm4353_vm9 = vcmp.gt.f32.partialorder %v6899_v29, 6.0  ;;  %vm4427_vm11 = vcmp.gt.f32.partialorder %v6899_v29, 4.0  ;;  %vm4464_vm12 = vcmp.gt.f32.partialorder %v6899_v29, 3.0 }
0x2b1e   :  { %v4392_v28 = vsel %vm4390_vm8, %v6506_v30, 4294967295  ;;  %v4355_v24 = vsel %vm4353_vm9, %v6445_v33, 4294967295  ;;  %v4429_v32 = vsel %vm4427_vm11, %v6531_v18, 4294967295  ;;  %v4466_v8 = vsel %vm4464_vm12, %v6723_v4, 4294967295 }
0x2b1f   :  { %4394 = vperm.xlu1 %5093, %v4392_v28   ;;  %4357 = vperm.xlu0 %5092, %v4355_v24   ;;  %vm4501_vm13 = vcmp.gt.f32.partialorder %v6899_v29, 2.0  ;;  %vm4538_vm1 = vcmp.gt.f32.partialorder %v6899_v29, 1.0 }
0x2b20   :  { %v4503_v33 = vsel %vm4501_vm13, %v6800_v20, 4294967295 }
0x2b23   :  { %5094 = vset.pattern.permute.xlu1 %v7053_v10  ;;  %5099 = vset.pattern.permute.xlu0 %v7071_v16  ;;  %v4540_v10 = vsel %vm4538_vm1, %v6882_v36, 4294967295 }
0x2b24   :  { %4431 = vperm.xlu1 %5094, %v4429_v32  }
0x2b28   :  { %5095 = vset.pattern.permute.xlu1 %v7057_v26 }
0x2b29   :  { %4468 = vperm.xlu1 %5095, %v4466_v8  }
0x2b2d   :  { %5096 = vset.pattern.permute.xlu1 %v7058_v47 }
0x2b2e   :  { %4505 = vperm.xlu1 %5096, %v4503_v33  }
0x2b32   :  { %5097 = vset.pattern.permute.xlu1 %v7056_v55 }
0x2b33   :  { %4542 = vperm.xlu1 %5097, %v4540_v10  }
0x2b37   :  { %5098 = vset.pattern.permute.xlu1 %v7071_v16 }
0x2b49   :  { %v4567_v30 = vpop.xlane.xlu0 %4566  ;;  %v4565_v18 = vpop.xlane.xlu1 %4564 }
0x2b4a   :  { %v4569_v26 = vcvt.f32.s32 %v4567_v30  ;;  %v4568_v2 = vcvt.f32.s32 %v4565_v18 }
0x2b4c   :  { %v4570_v4 = vshll.u32 %v4569_v26, 16 }
0x2b4d   :  { %v4573_v13 = vpop.permute.xlu1 %4572 }
0x2b4e   :  { %v4571_v37 = vadd.s32 %v4570_v4, %v4568_v2 }
0x2b50   :  { %v4574_v47 = vsel %vm2299_vm3, %v4571_v37, %v4573_v13 }
0x2b51   :  { %4577 = vperm.xlu1 %5098, %v4574_v47  }
0x2b6c   :  { %v4287_v20 = vpop.xlane.xlu0 %4286 }
0x2b6d   :  { %v4288_v34 = vrot.slane %v4287_v20, 4 }
0x2b6f   :  { %v4289_v51 = vadd.f32 %v4288_v34, %v4287_v20 }
0x2b71   :  { %v4290_v55 = vrot.slane %v4289_v51, 2 }
0x2b73   :  { %v4291_v1 = vadd.f32 %v4290_v55, %v4289_v51 }
0x2b75   :  { %v4292_v36 = vrot.slane %v4291_v1, 1 }
0x2b77   :  { %v4293_v53 = vadd.f32 %v4292_v36, %v4291_v1 }
0x2b79   :  { %5025 = vpush %v4293_v53 }
0x2baa   :  { %s5026_s13 = spop %5025 }
0x2bab   :  { %v4295_v44 = vstv %s5026_s13 }
0x2bac   :  { %v4296_v38 = vsub.f32 0.0, %v4295_v44 }
0x2bae   :  { %4298 = vst.msk [vmem:[#allocation2] sm:$0x1] %vm4297_vm14, %v4296_v38 }
0x2baf   :  { %5266 = shalt.err (!%p5263_p4)
}
0x2bb0   :  { %4590 = dma.vmem_to_hbm [thread:$0]  %s4588_s12, 16, %s6963_s25, [#allocation3]   ;;  %v4395_v31 = vpop.permute.xlu1 %4394  ;;  %vm4324_vm3 = vcmp.gt.f32.partialorder %v6899_v29, 7.0  ;;  %vm4325_vm15 = vcmp.eq.s32.totalorder %v6032_v54, 7  ;;  %vm4354_vm0 = vcmp.eq.s32.totalorder %v6032_v54, 6  ;;  %v4358_v63 = vpop.permute.xlu0 %4357  ;;  %vm4391_vm2 = vcmp.eq.s32.totalorder %v6032_v54, 5 }
0x2bb1   :  { %v4326_v7 = vsel %vm4324_vm3, %v6417_v0, 4294967295  ;;  %vm4428_vm4 = vcmp.eq.s32.totalorder %v6032_v54, 4  ;;  %vm4465_vm5 = vcmp.eq.s32.totalorder %v6032_v54, 3  ;;  %vm4502_vm7 = vcmp.eq.s32.totalorder %v6032_v54, 2  ;;  %s5330_s25 = smov [#allocation4]  }
0x2bb2   :  { %v4327_v22 = vsel %vm4325_vm15, %v4326_v7, 0  ;;  %vm4539_vm10 = vcmp.eq.s32.totalorder %v6032_v54, 1  ;;  %s4597_s29 = sshll.u32 %s5330_s25, 4  ;;  %vm4575_vm8 = vcmp.eq.s32.totalorder %v6032_v54, 0  ;;  %s4598_s29 = int_to_ptr.vmem [resolvable:$true] %s4597_s29 }
0x2bb3   :  { %v4359_v14 = vsel %vm4354_vm0, %v4358_v63, %v4327_v22  ;;  %s5275_s5 = scalar_lea.vmem %s4598_s29, 32  ;;  %p5280_p6 = scmp.lt.s32.totalorder %s4598_s29, %s4598_s29 }
0x2bb4   :  { %v4432_v25 = vpop.permute.xlu1 %4431  ;;  %v4396_v48 = vsel %vm4391_vm2, %v4395_v31, %v4359_v14  ;;  %p5276_p5 = scmp.ne.s32.totalorder %s4598_s29, %s5275_s5  ;;  %p5281_p7 = scmp.lt.s32.totalorder %s5275_s5, %s5275_s5 }
0x2bb5   :  { %v4433_v39 = vsel %vm4428_vm4, %v4432_v25, %v4396_v48 }
0x2bb6   :  { %p5282_p8 = por %p5281_p7, %p5280_p6 }
0x2bb8   :  { %v4469_v40 = vpop.permute.xlu1 %4468  ;;  %p5283_p9 = pnand %p5282_p8, %p5276_p5 }
0x2bb9   :  { %v4470_v0 = vsel %vm4465_vm5, %v4469_v40, %v4433_v39 }
0x2bbc   :  { %v4506_v57 = vpop.permute.xlu1 %4505 }
0x2bbd   :  { %v4507_v5 = vsel %vm4502_vm7, %v4506_v57, %v4470_v0 }
0x2bc0   :  { %v4543_v49 = vpop.permute.xlu1 %4542 }
0x2bc1   :  { %v4544_v56 = vsel %vm4539_vm10, %v4543_v49, %v4507_v5 }
0x2bcc   :  { %v4578_v3 = vpop.permute.xlu1 %4577 }
0x2bcd   :  { %v4579_v46 = vsel %vm4575_vm8, %v4578_v3, %v4544_v56 }
0x2bce   :  { %4580 = vst.msk [vmem:[#allocation4] sm:$0x3] %vm4299_vm6, %v4579_v46 }
0x2bcf   :  { %5286 = shalt.err (!%p5283_p9)
}
0x2bd0   :  { %4600 = dma.vmem_to_hbm [thread:$0]  %s4598_s29, 32, %s6964_s26, [#allocation5]  }
0x2bd1   :  { %5295 = dma.done.wait [#allocation3], 16  }
0x2bd2   :  { %5296 = vsyncadd [#allocation3], 4294967280 }
0x2bd3   :  { %5297 = dma.done.wait [#allocation5], 32  }
0x2bd4   :  { %5298 = vsyncadd [#allocation5], 4294967264 }
0x2bd5   :  { %4607 = vsyncpa [#allocation3], 1 }
0x2bd6   :  { %4608 = vsyncpa [#allocation5], 1 }

</bundles_post_ra>
